<compile_context>
chip_gen: v7x
topology: tpu7x:2x2x1
jax: 0.10.0
libtpu: 0.0.40
codegen_flags: <defaults>
</compile_context>

<pallas_src>
import functools
import math

import jax
import jax.numpy as jnp
from jax import lax
from jax.experimental import pallas as pl
from jax.experimental.pallas import tpu as pltpu


# ----------------------------------------------------------------------------
# Fused qkv -> masked attention -> proj Pallas kernel
# ----------------------------------------------------------------------------
def _fused_attn_kernel(*refs, scale, num_heads, head_dim, n_tokens, has_mask):
    if has_mask:
        (x_ref, wqkv_ref, bqkv_ref, wproj_ref, bproj_ref,
         mask_ref, wb_ref, o_ref, acc_ref, region_ref) = refs
    else:
        (x_ref, wqkv_ref, bqkv_ref, wproj_ref, bproj_ref,
         o_ref, acc_ref) = refs

    h = pl.program_id(1)
    d = head_dim
    N = n_tokens

    @pl.when(h == 0)
    def _init():
        acc_ref[...] = jnp.zeros_like(acc_ref)
        if has_mask:
            # Build both (N, N) region masks once per batch element from the
            # tiny lane-dense (2, N) mask: clip(2*m_i*m_j, -1, 1) * w + b.
            # (outer + outer^T == 2*outer since col and row are the same vector)
            for r in range(2):
                row = mask_ref[0, r:r + 1, :]                      # (1, N) f32
                rowmat = jnp.broadcast_to(row, (N, N))             # sublane bcast
                outer2 = rowmat * rowmat.T * 2.0                   # square XLU xpose
                rm = jnp.clip(outer2, -1.0, 1.0) * wb_ref[r, 0] + wb_ref[r, 1]
                region_ref[r] = rm.astype(jnp.bfloat16)

    # Per-head qkv projection: (N, C) @ (C, 3d) + (1, 3d); scale folded into q.
    x = x_ref[0]                                                    # (N, C) bf16
    qkv_h = jnp.dot(x, wqkv_ref[0],
                    preferred_element_type=jnp.float32) + bqkv_ref[0]   # (N, 3d) f32
    q_h = (qkv_h[:, 0:d] * scale).astype(jnp.bfloat16)
    k_h = qkv_h[:, d:2 * d].astype(jnp.bfloat16)
    v_h = qkv_h[:, 2 * d:3 * d].astype(jnp.bfloat16)

    # Scores + softmax (max/exp/sum/reciprocal in f32, probabilities in bf16).
    s = lax.dot_general(q_h, k_h, (((1,), (1,)), ((), ())),
                        preferred_element_type=jnp.float32)        # (N, N) f32
    s_max = jnp.max(s, axis=-1, keepdims=True)
    p = jnp.exp(s - s_max)                                          # EUP
    denom = jnp.sum(p, axis=-1, keepdims=True)
    r_inv = pl.reciprocal(denom, approx=True)                       # (N, 1) f32

    pb = p.astype(jnp.bfloat16)
    if has_mask:
        # head order in combine_att_masks is [intra, peri, intra, peri, ...]
        pb = pb * region_ref[h % 2]

    o_h = lax.dot_general(pb, v_h, (((1,), (0,)), ((), ())),
                          preferred_element_type=jnp.float32)       # (N, d) f32
    o_h = (o_h * r_inv).astype(jnp.bfloat16)   # softmax denom folded here (N*d)

    # Partial output projection: accumulate o_h @ W_proj[h*d:(h+1)*d, :].
    acc_ref[...] += jnp.dot(o_h, wproj_ref[0],
                            preferred_element_type=jnp.float32)     # (N, C) f32

    @pl.when(h == num_heads - 1)
    def _finalize():
        o_ref[0] = (acc_ref[...] + bproj_ref[...]).astype(o_ref.dtype)


def fused_attention(params, x, mask_flat=None, num_heads=8):
    """x: (B, N, C); mask_flat: optional (B, 2, N) [intra, peri] flattened masks.

    Returns (B, N, C) == proj(softmax(q k^T * scale) [* region_mask] @ v).
    """
    B, N, C = x.shape
    H = num_heads
    d = C // H
    scale = d ** (-0.5)

    xb = x.astype(jnp.bfloat16)
    w_qkv = params["w_qkv"].astype(jnp.bfloat16)          # (C, 3C), cols = [3][H][d]
    b_qkv = params["b_qkv"].astype(jnp.float32)           # (3C,)
    w_proj = params["w_proj"].astype(jnp.bfloat16)        # (C, C), rows = [H][d]
    b_proj = params["b_proj"].astype(jnp.float32).reshape(1, C)

    # Head-major weight rearrangement so each grid step DMAs only its head's
    # columns/rows (tiny blocks, no lane-padded q/k/v tensors in HBM).
    wqkv_r = w_qkv.reshape(C, 3, H, d).transpose(2, 0, 1, 3).reshape(H, C, 3 * d)
    bqkv_r = b_qkv.reshape(3, H, d).transpose(1, 0, 2).reshape(H, 1, 3 * d)
    wproj_r = w_proj.reshape(H, d, C)

    has_mask = mask_flat is not None

    in_specs = [
        pl.BlockSpec((1, N, C), lambda b, h: (b, 0, 0)),          # x (resident per b)
        pl.BlockSpec((1, C, 3 * d), lambda b, h: (h, 0, 0)),      # qkv weight (per head)
        pl.BlockSpec((1, 1, 3 * d), lambda b, h: (h, 0, 0)),      # qkv bias (per head)
        pl.BlockSpec((1, d, C), lambda b, h: (h, 0, 0)),          # proj rows (per head)
        pl.BlockSpec((1, C), lambda b, h: (0, 0)),                # proj bias
    ]
    args = [xb, wqkv_r, bqkv_r, wproj_r, b_proj]
    scratch = [pltpu.VMEM((N, C), jnp.float32)]                   # proj accumulator
    if has_mask:
        in_specs += [
            pl.BlockSpec((1, 2, N), lambda b, h: (b, 0, 0)),      # lane-dense masks
            pl.BlockSpec(memory_space=pltpu.MemorySpace.SMEM),    # (w, b) scalars
        ]
        args += [mask_flat.astype(jnp.float32),
                 params["wb_att"].astype(jnp.float32)]
        scratch += [pltpu.VMEM((2, N, N), jnp.bfloat16)]          # built region masks

    kernel = functools.partial(_fused_attn_kernel, scale=scale, num_heads=H,
                               head_dim=d, n_tokens=N, has_mask=has_mask)
    return pl.pallas_call(
        kernel,
        out_shape=jax.ShapeDtypeStruct((B, N, C), jnp.float32),
        grid=(B, H),
        in_specs=in_specs,
        out_specs=pl.BlockSpec((1, N, C), lambda b, h: (b, 0, 0)),
        scratch_shapes=scratch,
        compiler_params=pltpu.CompilerParams(
            dimension_semantics=("parallel", "arbitrary")),
    )(*args)


# ----------------------------------------------------------------------------
# Mask preprocessing glue (plain JAX, mirrors the PyTorch helpers)
# ----------------------------------------------------------------------------
def _window_max(img, k):
    # k x k stride-1 "SAME" max with -inf padding, done separably (k,1)+(1,k).
    out = lax.reduce_window(img, -jnp.inf, lax.max, (1, 1, k, 1), (1, 1, 1, 1), "SAME")
    out = lax.reduce_window(out, -jnp.inf, lax.max, (1, 1, 1, k), (1, 1, 1, 1), "SAME")
    return out


def mask_dilate(mask, iters):
    # `iters` iterations of 3x3 stride-1 pad-1 max-pool == one (2*iters+1) window max.
    return _window_max(mask, 2 * iters + 1)


def mask_shrink(mask, iters):
    return 1.0 - mask_dilate(1.0 - mask, iters)


def _interp_coords(out_size, in_size, scale):
    d = jnp.arange(out_size, dtype=jnp.float32)
    src = (d + 0.5) / scale - 0.5
    src = jnp.clip(src, 0.0, float(in_size - 1))
    i0 = jnp.floor(src).astype(jnp.int32)
    i1 = jnp.minimum(i0 + 1, in_size - 1)
    w1 = src - i0.astype(jnp.float32)
    w0 = 1.0 - w1
    return i0, i1, w0, w1


def bilinear_resize(x, scale):
    """F.interpolate(x, scale_factor=scale, mode='bilinear', align_corners=False)."""
    B, C, H, W = x.shape
    out_h, out_w = int(H * scale), int(W * scale)
    i0h, i1h, w0h, w1h = _interp_coords(out_h, H, scale)
    i0w, i1w, w0w, w1w = _interp_coords(out_w, W, scale)
    rows = (
        x[:, :, i0h, :] * w0h[None, None, :, None]
        + x[:, :, i1h, :] * w1h[None, None, :, None]
    )
    return rows[:, :, :, i0w] * w0w + rows[:, :, :, i1w] * w1w


# ----------------------------------------------------------------------------
# Full forward (single fused pallas_call)
# ----------------------------------------------------------------------------
def multi_region_attention(params, x, mask=None, num_heads=8,
                           iter_num_dilate=25, iter_num_shrink=15):
    B, N, C = x.shape
    mask_flat = None
    if mask is not None:
        Hm = mask.shape[-2]
        side = int(round(math.sqrt(N)))
        interp_scale = side / Hm
        mask_peri = (mask_dilate(mask, iter_num_dilate)
                     - mask_shrink(mask, iter_num_shrink))
        mi = bilinear_resize(mask, interp_scale).reshape(B, N)
        mp = bilinear_resize(mask_peri, interp_scale).reshape(B, N)
        mask_flat = jnp.stack([mi, mp], axis=1)              # (B, 2, N) lane-dense
    return fused_attention(params, x, mask_flat, num_heads=num_heads)


# ----------------------------------------------------------------------------
# Pure-JAX reference (for numeric verification)
# ----------------------------------------------------------------------------
def reference_forward(params, x, mask, num_heads=8,
                      iter_num_dilate=25, iter_num_shrink=15):
    B, N, C = x.shape
    head_dim = C // num_heads
    scale = head_dim ** (-0.5)
    qkv = x.reshape(B * N, C) @ params["w_qkv"] + params["b_qkv"]
    qkv = qkv.reshape(B, N, 3, num_heads, head_dim).transpose(2, 0, 3, 1, 4)
    q, k, v = qkv[0], qkv[1], qkv[2]
    attn = jnp.einsum("bhnd,bhmd->bhnm", q, k) * scale
    attn = jax.nn.softmax(attn, axis=-1)
    if mask is not None:
        Hm = mask.shape[-2]
        side = int(round(math.sqrt(N)))
        mask_peri = (mask_dilate(mask, iter_num_dilate)
                     - mask_shrink(mask, iter_num_shrink))

        def att_of(m):
            mm = bilinear_resize(m, side / Hm).reshape(B, N)
            o = mm[:, :, None] * mm[:, None, :]
            return jnp.clip(o + jnp.swapaxes(o, -1, -2), -1.0, 1.0)

        wb = params["wb_att"]
        a_i = att_of(mask) * wb[0, 0] + wb[0, 1]
        a_p = att_of(mask_peri) * wb[1, 0] + wb[1, 1]
        full = jnp.stack([a_i, a_p] * (num_heads // 2), axis=1)
        attn = attn * full
    out = jnp.einsum("bhnm,bhmd->bhnd", attn, v)
    out = out.transpose(0, 2, 1, 3).reshape(B, N, C)
    return out @ params["w_proj"] + params["b_proj"]


# ----------------------------------------------------------------------------
if __name__ == "__main__":
    B, C, num_heads = 2, 64, 8
    N = 256                      # 16x16 tokens
    Hm = Wm = 256                # segmentation-mask resolution (NCHW)

    key = jax.random.PRNGKey(0)
    k1, k2, k3, k4, k5, k6 = jax.random.split(key, 6)
    params = {
        "w_qkv": jax.random.normal(k1, (C, 3 * C), jnp.float32) * 0.02,
        "b_qkv": jax.random.normal(k2, (3 * C,), jnp.float32) * 0.02,
        "w_proj": jax.random.normal(k3, (C, C), jnp.float32) * 0.02,
        "b_proj": jax.random.normal(k4, (C,), jnp.float32) * 0.02,
        "wb_att": jnp.array([[1.0, 0.2], [1.0, 0.2]], jnp.float32),
    }
    x = jax.random.normal(k5, (B, N, C), jnp.float32)
    mask = (jax.random.uniform(k6, (B, 1, Hm, Wm)) > 0.85).astype(jnp.float32)

    # Masked path (full region-attention semantics).
    out = jax.block_until_ready(
        multi_region_attention(params, x, mask, num_heads=num_heads))
    # mask=None path (plain Conformer `Attention.forward`).
    out_nomask = jax.block_until_ready(
        multi_region_attention(params, x, None, num_heads=num_heads))

    ref = jax.block_until_ready(reference_forward(params, x, mask, num_heads))
    ref_nm = jax.block_until_ready(reference_forward(params, x, None, num_heads))

    assert out.shape == (B, N, C)
    assert out_nomask.shape == (B, N, C)
    assert float(jnp.max(jnp.abs(out - ref))) < 2e-2
    assert float(jnp.max(jnp.abs(out_nomask - ref_nm))) < 2e-2

    print("KERNEL_OK")
</pallas_src>

<mosaic_0001>
module attributes {stable_mosaic.version = 11 : i64} {
  func.func @_fused_attn_kernel(%arg0: i32, %arg1: i32, %arg2: memref<1x256x64xbf16, #tpu.memory_space<vmem>>, %arg3: memref<1x64x24xbf16, #tpu.memory_space<vmem>>, %arg4: memref<1x1x24xf32, #tpu.memory_space<vmem>>, %arg5: memref<1x8x64xbf16, #tpu.memory_space<vmem>>, %arg6: memref<1x64xf32, #tpu.memory_space<vmem>>, %arg7: memref<1x2x256xf32, #tpu.memory_space<vmem>>, %arg8: memref<2x2xf32, #tpu.memory_space<smem>>, %arg9: memref<1x256x64xf32, #tpu.memory_space<vmem>>, %arg10: memref<256x64xf32, #tpu.memory_space<vmem>>, %arg11: memref<2x256x256xbf16, #tpu.memory_space<vmem>>) attributes {dimension_semantics = [#tpu.dimension_semantics<parallel>, #tpu.dimension_semantics<arbitrary>], iteration_bounds = array<i64: 2, 8>, scalar_prefetch = 0 : i64, scratch_operands = 2 : i64, tpu.core_type = #tpu.core_type<tc>, window_params = [{transform_indices = @transform_0, window_bounds = array<i64: 1, 256, 64>}, {transform_indices = @transform_1, window_bounds = array<i64: 1, 64, 24>}, {transform_indices = @transform_2, window_bounds = array<i64: 1, 1, 24>}, {transform_indices = @transform_3, window_bounds = array<i64: 1, 8, 64>}, {pipeline_mode = #tpu.pipeline_mode<synchronous>, transform_indices = @transform_4, window_bounds = array<i64: 1, 64>}, {transform_indices = @transform_5, window_bounds = array<i64: 1, 2, 256>}, {transform_indices = @transform_6, window_bounds = array<i64: 2, 2>}, {transform_indices = @transform_7, window_bounds = array<i64: 1, 256, 64>}]} {
    %c0_i32 = arith.constant 0 : i32
    %0 = arith.cmpi eq, %arg1, %c0_i32 : i32
    %1 = arith.extui %0 : i1 to i32
    %c0_i32_0 = arith.constant 0 : i32
    %2 = arith.cmpi ne, %1, %c0_i32_0 : i32
    scf.if %2 {
      %cst_29 = arith.constant 0.000000e+00 : f32
      %57 = vector.broadcast %cst_29 : f32 to vector<256x64xf32>
      %c0_30 = arith.constant 0 : index
      %c0_31 = arith.constant 0 : index
      %58 = vector.load %arg10[%c0_30, %c0_31] : memref<256x64xf32, #tpu.memory_space<vmem>>, vector<256x64xf32>
      tpu.vector_store %arg10[%c0_30, %c0_31], %57 {strides = array<i32>} : memref<256x64xf32, #tpu.memory_space<vmem>>, vector<256x64xf32>,
      %c0_32 = arith.constant 0 : index
      %c0_33 = arith.constant 0 : index
      %c0_34 = arith.constant 0 : index
      %59 = vector.load %arg7[%c0_32, %c0_33, %c0_34] : memref<1x2x256xf32, #tpu.memory_space<vmem>>, vector<1x1x256xf32>
      %60 = vector.shape_cast %59 : vector<1x1x256xf32> to vector<1x256xf32>
      %61 = vector.shape_cast %60 : vector<1x256xf32> to vector<1x256xf32>
      %62 = vector.broadcast %61 : vector<1x256xf32> to vector<256x256xf32>
      %63 = tpu.transpose %62, [1, 0] : vector<256x256xf32> -> vector<256x256xf32>
      %64 = arith.mulf %62, %63 : vector<256x256xf32>
      %cst_35 = arith.constant 2.000000e+00 : f32
      %65 = vector.broadcast %cst_35 : f32 to vector<256x256xf32>
      %66 = arith.mulf %64, %65 : vector<256x256xf32>
      %cst_36 = arith.constant -1.000000e+00 : f32
      %cst_37 = arith.constant 1.000000e+00 : f32
      %67 = vector.broadcast %cst_36 : f32 to vector<256x256xf32>
      %68 = arith.maximumf %67, %66 : vector<256x256xf32>
      %69 = vector.broadcast %cst_37 : f32 to vector<256x256xf32>
      %70 = arith.minimumf %69, %68 : vector<256x256xf32>
      %c0_38 = arith.constant 0 : index
      %c0_39 = arith.constant 0 : index
      %71 = memref.load %arg8[%c0_38, %c0_39] : memref<2x2xf32, #tpu.memory_space<smem>>
      %72 = vector.broadcast %71 : f32 to vector<256x256xf32>
      %73 = arith.mulf %70, %72 : vector<256x256xf32>
      %c0_40 = arith.constant 0 : index
      %c1 = arith.constant 1 : index
      %74 = memref.load %arg8[%c0_40, %c1] : memref<2x2xf32, #tpu.memory_space<smem>>
      %75 = vector.broadcast %74 : f32 to vector<256x256xf32>
      %76 = arith.addf %73, %75 : vector<256x256xf32>
      %77 = arith.truncf %76 : vector<256x256xf32> to vector<256x256xbf16>
      %c0_41 = arith.constant 0 : index
      %c0_42 = arith.constant 0 : index
      %c0_43 = arith.constant 0 : index
      %78 = vector.load %arg11[%c0_41, %c0_42, %c0_43] : memref<2x256x256xbf16, #tpu.memory_space<vmem>>, vector<1x256x256xbf16>
      %79 = vector.shape_cast %78 : vector<1x256x256xbf16> to vector<256x256xbf16>
      %80 = vector.shape_cast %77 : vector<256x256xbf16> to vector<1x256x256xbf16>
      tpu.vector_store %arg11[%c0_41, %c0_42, %c0_43], %80 {strides = array<i32>} : memref<2x256x256xbf16, #tpu.memory_space<vmem>>, vector<1x256x256xbf16>,
      %c0_44 = arith.constant 0 : index
      %c1_45 = arith.constant 1 : index
      %c0_46 = arith.constant 0 : index
      %81 = vector.load %arg7[%c0_44, %c1_45, %c0_46] : memref<1x2x256xf32, #tpu.memory_space<vmem>>, vector<1x1x256xf32>
      %82 = vector.shape_cast %81 : vector<1x1x256xf32> to vector<1x256xf32>
      %83 = vector.shape_cast %82 : vector<1x256xf32> to vector<1x256xf32>
      %84 = vector.broadcast %83 : vector<1x256xf32> to vector<256x256xf32>
      %85 = tpu.transpose %84, [1, 0] : vector<256x256xf32> -> vector<256x256xf32>
      %86 = arith.mulf %84, %85 : vector<256x256xf32>
      %cst_47 = arith.constant 2.000000e+00 : f32
      %87 = vector.broadcast %cst_47 : f32 to vector<256x256xf32>
      %88 = arith.mulf %86, %87 : vector<256x256xf32>
      %cst_48 = arith.constant -1.000000e+00 : f32
      %cst_49 = arith.constant 1.000000e+00 : f32
      %89 = vector.broadcast %cst_48 : f32 to vector<256x256xf32>
      %90 = arith.maximumf %89, %88 : vector<256x256xf32>
      %91 = vector.broadcast %cst_49 : f32 to vector<256x256xf32>
      %92 = arith.minimumf %91, %90 : vector<256x256xf32>
      %c1_50 = arith.constant 1 : index
      %c0_51 = arith.constant 0 : index
      %93 = memref.load %arg8[%c1_50, %c0_51] : memref<2x2xf32, #tpu.memory_space<smem>>
      %94 = vector.broadcast %93 : f32 to vector<256x256xf32>
      %95 = arith.mulf %92, %94 : vector<256x256xf32>
      %c1_52 = arith.constant 1 : index
      %c1_53 = arith.constant 1 : index
      %96 = memref.load %arg8[%c1_52, %c1_53] : memref<2x2xf32, #tpu.memory_space<smem>>
      %97 = vector.broadcast %96 : f32 to vector<256x256xf32>
      %98 = arith.addf %95, %97 : vector<256x256xf32>
      %99 = arith.truncf %98 : vector<256x256xf32> to vector<256x256xbf16>
      %c1_54 = arith.constant 1 : index
      %c0_55 = arith.constant 0 : index
      %c0_56 = arith.constant 0 : index
      %100 = vector.load %arg11[%c1_54, %c0_55, %c0_56] : memref<2x256x256xbf16, #tpu.memory_space<vmem>>, vector<1x256x256xbf16>
      %101 = vector.shape_cast %100 : vector<1x256x256xbf16> to vector<256x256xbf16>
      %102 = vector.shape_cast %99 : vector<256x256xbf16> to vector<1x256x256xbf16>
      tpu.vector_store %arg11[%c1_54, %c0_55, %c0_56], %102 {strides = array<i32>} : memref<2x256x256xbf16, #tpu.memory_space<vmem>>, vector<1x256x256xbf16>,
    } else {
    }
    %c0 = arith.constant 0 : index
    %c0_1 = arith.constant 0 : index
    %c0_2 = arith.constant 0 : index
    %3 = vector.load %arg2[%c0, %c0_1, %c0_2] : memref<1x256x64xbf16, #tpu.memory_space<vmem>>, vector<1x256x64xbf16>
    %4 = vector.shape_cast %3 : vector<1x256x64xbf16> to vector<256x64xbf16>
    %c0_3 = arith.constant 0 : index
    %c0_4 = arith.constant 0 : index
    %c0_5 = arith.constant 0 : index
    %5 = vector.load %arg3[%c0_3, %c0_4, %c0_5] : memref<1x64x24xbf16, #tpu.memory_space<vmem>>, vector<1x64x24xbf16>
    %6 = vector.shape_cast %5 : vector<1x64x24xbf16> to vector<64x24xbf16>
    %cst = arith.constant dense<0.000000e+00> : vector<256x24xf32>
    %7 = tpu.matmul %4, %6, %cst {dimension_numbers = #tpu.dot_dimension_numbers<[1], [0], [0], [1], [0, 0, 1, 1], [], []>} : vector<256x64xbf16>, vector<64x24xbf16>, vector<256x24xf32> -> vector<256x24xf32>
    %c0_6 = arith.constant 0 : index
    %c0_7 = arith.constant 0 : index
    %c0_8 = arith.constant 0 : index
    %8 = vector.load %arg4[%c0_6, %c0_7, %c0_8] : memref<1x1x24xf32, #tpu.memory_space<vmem>>, vector<1x1x24xf32>
    %9 = vector.shape_cast %8 : vector<1x1x24xf32> to vector<1x24xf32>
    %10 = vector.broadcast %9 : vector<1x24xf32> to vector<256x24xf32>
    %11 = arith.addf %7, %10 : vector<256x24xf32>
    %12 = vector.extract_strided_slice %11 {offsets = [0, 0], sizes = [256, 8], strides = [1, 1]} : vector<256x24xf32> to vector<256x8xf32>
    %cst_9 = arith.constant 0.353553385 : f32
    %13 = vector.broadcast %cst_9 : f32 to vector<256x8xf32>
    %14 = arith.mulf %12, %13 : vector<256x8xf32>
    %15 = arith.truncf %14 : vector<256x8xf32> to vector<256x8xbf16>
    %16 = vector.extract_strided_slice %11 {offsets = [0, 8], sizes = [256, 8], strides = [1, 1]} : vector<256x24xf32> to vector<256x8xf32>
    %17 = arith.truncf %16 : vector<256x8xf32> to vector<256x8xbf16>
    %18 = vector.extract_strided_slice %11 {offsets = [0, 16], sizes = [256, 8], strides = [1, 1]} : vector<256x24xf32> to vector<256x8xf32>
    %19 = arith.truncf %18 : vector<256x8xf32> to vector<256x8xbf16>
    %cst_10 = arith.constant dense<0.000000e+00> : vector<256x256xf32>
    %20 = tpu.matmul %15, %17, %cst_10 {dimension_numbers = #tpu.dot_dimension_numbers<[1], [1], [0], [0], [0, 0, 1, 0], [], []>} : vector<256x8xbf16>, vector<256x8xbf16>, vector<256x256xf32> -> vector<256x256xf32>
    %cst_11 = arith.constant dense<0xFF800000> : vector<256xf32>
    %21 = vector.multi_reduction <maximumf>, %20, %cst_11 [1] : vector<256x256xf32> to vector<256xf32>
    %22 = vector.shape_cast %21 : vector<256xf32> to vector<256x1xf32>
    %23 = vector.broadcast %22 : vector<256x1xf32> to vector<256x256xf32>
    %24 = arith.subf %20, %23 : vector<256x256xf32>
    %25 = math.exp %24 : vector<256x256xf32>
    %cst_12 = arith.constant dense<0.000000e+00> : vector<256xf32>
    %26 = vector.multi_reduction <add>, %25, %cst_12 [1] : vector<256x256xf32> to vector<256xf32>
    %27 = vector.shape_cast %26 : vector<256xf32> to vector<256x1xf32>
    %28 = tpu.reciprocal %27 {approx = true} : vector<256x1xf32> -> vector<256x1xf32>
    %29 = arith.truncf %25 : vector<256x256xf32> to vector<256x256xbf16>
    %c2_i32 = arith.constant 2 : i32
    %c0_i32_13 = arith.constant 0 : i32
    %30 = arith.cmpi eq, %c2_i32, %c0_i32_13 : i32
    %c1_i32 = arith.constant 1 : i32
    %31 = arith.select %30, %c1_i32, %c2_i32 : i32
    %32 = arith.remsi %arg1, %31 : i32
    %c0_i32_14 = arith.constant 0 : i32
    %33 = arith.cmpi ne, %32, %c0_i32_14 : i32
    %c0_i32_15 = arith.constant 0 : i32
    %34 = arith.cmpi slt, %32, %c0_i32_15 : i32
    %c0_i32_16 = arith.constant 0 : i32
    %35 = arith.cmpi slt, %31, %c0_i32_16 : i32
    %36 = arith.xori %34, %35 : i1
    %37 = arith.andi %36, %33 : i1
    %38 = arith.addi %32, %31 : i32
    %39 = arith.select %37, %38, %32 : i32
    %40 = arith.index_cast %39 : i32 to index
    %c0_17 = arith.constant 0 : index
    %c0_18 = arith.constant 0 : index
    %41 = vector.load %arg11[%40, %c0_17, %c0_18] : memref<2x256x256xbf16, #tpu.memory_space<vmem>>, vector<1x256x256xbf16>
    %42 = vector.shape_cast %41 : vector<1x256x256xbf16> to vector<256x256xbf16>
    %43 = arith.mulf %29, %42 : vector<256x256xbf16>
    %cst_19 = arith.constant dense<0.000000e+00> : vector<256x8xf32>
    %44 = tpu.matmul %43, %19, %cst_19 {dimension_numbers = #tpu.dot_dimension_numbers<[1], [0], [0], [1], [0, 0, 1, 1], [], []>} : vector<256x256xbf16>, vector<256x8xbf16>, vector<256x8xf32> -> vector<256x8xf32>
    %45 = vector.broadcast %28 : vector<256x1xf32> to vector<256x8xf32>
    %46 = arith.mulf %44, %45 : vector<256x8xf32>
    %47 = arith.truncf %46 : vector<256x8xf32> to vector<256x8xbf16>
    %c0_20 = arith.constant 0 : index
    %c0_21 = arith.constant 0 : index
    %48 = vector.load %arg10[%c0_20, %c0_21] : memref<256x64xf32, #tpu.memory_space<vmem>>, vector<256x64xf32>
    %c0_22 = arith.constant 0 : index
    %c0_23 = arith.constant 0 : index
    %c0_24 = arith.constant 0 : index
    %49 = vector.load %arg5[%c0_22, %c0_23, %c0_24] : memref<1x8x64xbf16, #tpu.memory_space<vmem>>, vector<1x8x64xbf16>
    %50 = vector.shape_cast %49 : vector<1x8x64xbf16> to vector<8x64xbf16>
    %cst_25 = arith.constant dense<0.000000e+00> : vector<256x64xf32>
    %51 = tpu.matmul %47, %50, %cst_25 {dimension_numbers = #tpu.dot_dimension_numbers<[1], [0], [0], [1], [0, 0, 1, 1], [], []>} : vector<256x8xbf16>, vector<8x64xbf16>, vector<256x64xf32> -> vector<256x64xf32>
    %52 = arith.addf %48, %51 : vector<256x64xf32>
    %c0_26 = arith.constant 0 : index
    %c0_27 = arith.constant 0 : index
    %53 = vector.load %arg10[%c0_26, %c0_27] : memref<256x64xf32, #tpu.memory_space<vmem>>, vector<256x64xf32>
    tpu.vector_store %arg10[%c0_26, %c0_27], %52 {strides = array<i32>} : memref<256x64xf32, #tpu.memory_space<vmem>>, vector<256x64xf32>,
    %c7_i32 = arith.constant 7 : i32
    %54 = arith.cmpi eq, %arg1, %c7_i32 : i32
    %55 = arith.extui %54 : i1 to i32
    %c0_i32_28 = arith.constant 0 : i32
    %56 = arith.cmpi ne, %55, %c0_i32_28 : i32
    scf.if %56 {
      %c0_29 = arith.constant 0 : index
      %c0_30 = arith.constant 0 : index
      %57 = vector.load %arg10[%c0_29, %c0_30] : memref<256x64xf32, #tpu.memory_space<vmem>>, vector<256x64xf32>
      %c0_31 = arith.constant 0 : index
      %c0_32 = arith.constant 0 : index
      %58 = vector.load %arg6[%c0_31, %c0_32] : memref<1x64xf32, #tpu.memory_space<vmem>>, vector<1x64xf32>
      %59 = vector.broadcast %58 : vector<1x64xf32> to vector<256x64xf32>
      %60 = arith.addf %57, %59 : vector<256x64xf32>
      %c0_33 = arith.constant 0 : index
      %c0_34 = arith.constant 0 : index
      %c0_35 = arith.constant 0 : index
      %61 = vector.load %arg9[%c0_33, %c0_34, %c0_35] : memref<1x256x64xf32, #tpu.memory_space<vmem>>, vector<1x256x64xf32>
      %62 = vector.shape_cast %61 : vector<1x256x64xf32> to vector<256x64xf32>
      %63 = vector.shape_cast %60 : vector<256x64xf32> to vector<1x256x64xf32>
      tpu.vector_store %arg9[%c0_33, %c0_34, %c0_35], %63 {strides = array<i32>} : memref<1x256x64xf32, #tpu.memory_space<vmem>>, vector<1x256x64xf32>,
    } else {
    }
    return
  }
  func.func @transform_0(%arg0: i32, %arg1: i32) -> (i32, i32, i32) {
    %c0_i32 = arith.constant 0 : i32
    %c0_i32_0 = arith.constant 0 : i32
    %c0_i32_1 = arith.constant 0 : i32
    return %arg0, %c0_i32, %c0_i32_0 : i32, i32, i32
  }
  func.func @transform_1(%arg0: i32, %arg1: i32) -> (i32, i32, i32) {
    %c0_i32 = arith.constant 0 : i32
    %c0_i32_0 = arith.constant 0 : i32
    %c0_i32_1 = arith.constant 0 : i32
    return %arg1, %c0_i32, %c0_i32_0 : i32, i32, i32
  }
  func.func @transform_2(%arg0: i32, %arg1: i32) -> (i32, i32, i32) {
    %c0_i32 = arith.constant 0 : i32
    %c0_i32_0 = arith.constant 0 : i32
    %c0_i32_1 = arith.constant 0 : i32
    return %arg1, %c0_i32, %c0_i32_0 : i32, i32, i32
  }
  func.func @transform_3(%arg0: i32, %arg1: i32) -> (i32, i32, i32) {
    %c0_i32 = arith.constant 0 : i32
    %c0_i32_0 = arith.constant 0 : i32
    %c0_i32_1 = arith.constant 0 : i32
    return %arg1, %c0_i32, %c0_i32_0 : i32, i32, i32
  }
  func.func @transform_4(%arg0: i32, %arg1: i32) -> (i32, i32) {
    %c0_i32 = arith.constant 0 : i32
    %c0_i32_0 = arith.constant 0 : i32
    %c0_i32_1 = arith.constant 0 : i32
    return %c0_i32, %c0_i32_0 : i32, i32
  }
  func.func @transform_5(%arg0: i32, %arg1: i32) -> (i32, i32, i32) {
    %c0_i32 = arith.constant 0 : i32
    %c0_i32_0 = arith.constant 0 : i32
    %c0_i32_1 = arith.constant 0 : i32
    return %arg0, %c0_i32, %c0_i32_0 : i32, i32, i32
  }
  func.func @transform_6(%arg0: i32, %arg1: i32) -> (i32, i32) {
    %c0_i32 = arith.constant 0 : i32
    %c0_i32_0 = arith.constant 0 : i32
    %c0_i32_1 = arith.constant 0 : i32
    return %c0_i32, %c0_i32_0 : i32, i32
  }
  func.func @transform_7(%arg0: i32, %arg1: i32) -> (i32, i32, i32) {
    %c0_i32 = arith.constant 0 : i32
    %c0_i32_0 = arith.constant 0 : i32
    %c0_i32_1 = arith.constant 0 : i32
    return %arg0, %c0_i32, %c0_i32_0 : i32, i32, i32
  }
}

</mosaic_0001>

<bundles_post_ra>
// kernel: tpu_custom_call.1
= control target key start
LH: loop header
LB: loop body
LE: loop exit
PB: predicated region body
PF: predicated region fallthrough
CT: control target
= control target key end

     0   :  { %s5966_s0 = inlined_call_operand.vmem [shape: bf16[2,256,64], index: 0, kind: input, shape index: {}]   ;;  %s5967_s1 = inlined_call_operand.vmem [shape: bf16[8,64,24], index: 1, kind: input, shape index: {}]   ;;  %s5968_s2 = inlined_call_operand.vmem [shape: f32[8,1,24], index: 2, kind: input, shape index: {}]   ;;  %s5969_s3 = inlined_call_operand.vmem [shape: bf16[8,8,64], index: 3, kind: input, shape index: {}]   ;;  %s5970_s4 = inlined_call_operand.vmem [shape: f32[1,64], index: 4, kind: input, shape index: {}]   ;;  %s5971_s5 = inlined_call_operand.vmem [shape: f32[2,2,256], index: 5, kind: input, shape index: {}]   ;;  %s5972_s6 = inlined_call_operand.vmem [shape: f32[2,2], index: 6, kind: input, shape index: {}]   ;;  %s5973_s7 = inlined_call_operand.vmem [shape: f32[2,256,64], index: 7, kind: output, shape index: {}]  }
   0x1   :  { %5985 = sst [smem:[#allocation19_spill]] %s5966_s0 }
   0x2   :  { %5986 = sst [smem:[#allocation20_spill]] %s5972_s6 }
   0x3   :  { %12 = vsyncpa [#allocation5], 0  ;;  %s4446_s24 = smov 0   ;;  %s4448_s25 = smov 0  }
   0x4   :  { %s4450_s26 = smov 0   ;;  %s4452_s27 = smov 0  }
   0x5   :  { %s4454_s28 = smov 0  }
   0x6 LB: > { %s3562_s29 = sadd.s32 4294967295, %s4400_s28   ;;  %s27_s30 = sadd.s32 1, %s4392_s26  ;;  %s4400_s28 = sphi %s4454_s28, %s18_s28   ;;  %s4396_s27 = sphi %s4452_s27, %s6018_s27   ;;  %s4392_s26 = sphi %s4450_s26, %s6017_s26   ;;  %s4388_s25 = sphi %s4448_s25, %s6016_s25   ;;  %s4384_s24 = sphi %s4446_s24, %s6015_s24  }
   0x7   : > { %p28_p0 = scmp.ge.s32.totalorder %s27_s30, 8  ;;  %s30_s8 = sadd.s32 1, %s4396_s27 }
   0x8   : > { %p3564_p1 = scmp.ge.s32.totalorder %s4400_s28, 1  ;;  %p233_p2 = scmp.lt.s32.totalorder %s4400_s28, 17 }
   0x9   : > { %s6020_s30 = smov (%p28_p0, %s27_s30), 0  ;;  %s6022_s8 = smov (!%p28_p0, %s30_s8), %s4396_s27 }
   0xa   : > { %p4479_p3 = pnand %p3564_p1, %p233_p2  ;;  %p32_p4 = scmp.ge.s32.totalorder %s6022_s8, 2 }
   0xb   : > { %p4483_p5 = scmp.eq.s32.totalorder %s3562_s29, 0  ;;  %s5989_s6 = sld [smem:[#allocation20_spill]] }
   0xc   : > { %p4081_p6 = pneg %p4479_p3  ;;  %s6024_s8 = smov (%p32_p4, %s6022_s8), 0 }
   0xd   : > { %5990 = sst [smem:[#allocation7_spill]] %s6024_s8 }
   0xe   : > { %p4082_p7 = pnand %p4483_p5, %p4081_p6 }
  0x10   : > { %p4345_p9 = pneg %p4082_p7 }
  0x11   : > { %s249_s13 = sshll.u32 %s5989_s6, 4  ;;  %s250_s13 = int_to_ptr.vmem [resolvable:$true] %s249_s13 }
  0x12   : > { %s4343_s14 = scalar_lea.vmem %s250_s13, 32  ;;  %p4351_p12 = scmp.lt.s32.totalorder %s250_s13, %s250_s13 }
  0x13   : > { %p4344_p8 = scmp.ne.s32.totalorder %s250_s13, %s4343_s14  ;;  %p4352_p13 = scmp.lt.s32.totalorder %s4343_s14, %s4343_s14 }
  0x15   : > { %p4346_p10 = pnand %p4345_p9, %p4344_p8  ;;  %p4353_p0 = por %p4352_p13, %p4351_p12 }
  0x17   : > { %p4347_p11 = pneg %p4346_p10 }
  0x19   : > { %p4354_p1 = pnand %p4353_p0, %p4347_p11 }
  0x1b   : > { %4357 = shalt.err (!%p4354_p1)
}
  0x1c   : > { %s4402_s15 = smov [#allocation4]   ;;  %299 = sbr.rel (%p4479_p3) target bundleno = 1813 (0x715), region = 48 }
  0x1d   : > { %4084 = dma.vmem_to_smem (!%p4082_p7), %s250_s13, 32, %s4402_s15, [#allocation5]  }
  0x23   : > { %4379 = dma.done.wait (%p4483_p5), [#allocation5], 32  }
  0x24   : > { %4381 = vsyncadd (%p4483_p5), [#allocation5], 4294967264 }
  0x25   : > { %305 = sfence }
  0x26   : > { %p349_p2 = scmp.lt.s32.totalorder %s4388_s25, 1  ;;  %p354_p4 = scmp.lt.s32.totalorder %s4384_s24, 7 }
  0x27   : > { %s5991_s0 = sld [smem:[#allocation19_spill]]  ;;  %p3578_p3 = scmp.ne.s32.totalorder %s4384_s24, 0 }
  0x28   : > { %s6026_s25 = smov (!%p349_p2, %s4388_s25), 1  ;;  %v416_v0 = vlaneseq (!%p3578_p3)  ;;  %s4656_s8 = sld [smem:[#allocation4 + $0x81]] (!%p3578_p3)  ;;  %vm381_vm0 = vcmask (!%p3578_p3), 523264  }
  0x29   : > { %s4506_s16 = scalar_select %p354_p4, %s4384_s24, 7 }
  0x2a   : > { %s3789_s17 = sshll.u32 %s6026_s25, 7  ;;  %s3791_s18 = sshll.u32 %s6026_s25, 2  ;;  %v417_v1 = vshrl.u32 (!%p3578_p3), %v416_v0, 7 }
  0x2b   : > { %s3790_s22 = sshll.u32 %s4506_s16, 5  ;;  %s361_s12 = scalar_lea.vmem %s5968_s2, %s4506_s16 }
  0x2c   : > { %s4517_s9 = scalar_lea.vmem %s5967_s1, %s3790_s22  ;;  %s3573_s13 = sshll.u32 %s4506_s16, 2  ;;  %v422_v3 = vsub.s32 (!%p3578_p3), 1, %v417_v1  ;;  %v418_v4 = vsub.s32 (!%p3578_p3), 0, %v417_v1 }
  0x2d   : > { %s4511_s21 = scalar_lea.vmem %s5991_s0, %s3789_s17  ;;  %s4527_s6 = scalar_lea.vmem %s5971_s5, %s3791_s18 }
  0x2e   : > { %s4532_s17 = scalar_lea.vmem %s5969_s3, %s3573_s13  ;;  %s3792_s20 = sshll.u32 %s6026_s25, 8  ;;  %v414_v2 = vld [vmem:[%s4527_s6] ss:$2 sm:$0x3] (!%p3578_p3) }
  0x2f   : > { %s4537_s22 = scalar_lea.vmem %s5973_s7, %s3792_s20  ;;  %380 = sbr.rel (%p3578_p3) target bundleno = 370 (0x172), region = 56  ;;  %v4541_v5 = vrot.slane (!%p3578_p3), %v414_v2, %v422_v3  ;;  %v4543_v6 = vrot.slane (!%p3578_p3), %v414_v2, %v418_v4  ;;  %v3644_v7 = vld [vmem:[%s4527_s6 + $0x1] ss:$2 sm:$0x3] (!%p3578_p3) }
  0x30   : > { %v4578_v8 = vrot.slane (!%p3578_p3), %v3644_v7, %v422_v3  ;;  %v4580_v9 = vrot.slane (!%p3578_p3), %v3644_v7, %v418_v4  ;;  %s746_s0 = sld [smem:[#allocation4]] (!%p3578_p3)  ;;  %s3643_s6 = sld [smem:[#allocation4 + $0x1]] (!%p3578_p3) }
  0x31   : > { %458 = vxpose.xlu1.b32.start [1/16] (!%p3578_p3), %v4541_v5, 128  ;;  %426 = vxpose.xlu0.b32.start [1/16] (!%p3578_p3), %v4543_v6, 128  ;;  %s4654_s25 = sld [smem:[#allocation4 + $0x80]] (!%p3578_p3) }
  0x35   : > { %459 = vxpose.xlu1.b32.cont [2/16] (!%p3578_p3), %v4541_v5, 128  ;;  %427 = vxpose.xlu0.b32.cont [2/16] (!%p3578_p3), %v4543_v6, 128 }
  0x36   : > { %v4618_v20 = vstv %s746_s0  ;;  %v4620_v21 = vstv %s3643_s6 }
  0x39   : > { %460 = vxpose.xlu1.b32.cont [3/16] %v4541_v5, 128  ;;  %428 = vxpose.xlu0.b32.cont [3/16] %v4543_v6, 128 }
  0x3d   : > { %461 = vxpose.xlu1.b32.cont [4/16] %v4541_v5, 128  ;;  %429 = vxpose.xlu0.b32.cont [4/16] %v4543_v6, 128 }
  0x41   : > { %462 = vxpose.xlu1.b32.cont [5/16] %v4541_v5, 128  ;;  %430 = vxpose.xlu0.b32.cont [5/16] %v4543_v6, 128 }
  0x45   : > { %463 = vxpose.xlu1.b32.cont [6/16] %v4541_v5, 128  ;;  %431 = vxpose.xlu0.b32.cont [6/16] %v4543_v6, 128 }
  0x49   : > { %464 = vxpose.xlu1.b32.cont [7/16] %v4541_v5, 128  ;;  %432 = vxpose.xlu0.b32.cont [7/16] %v4543_v6, 128 }
  0x4d   : > { %465 = vxpose.xlu1.b32.cont [8/16] %v4541_v5, 128  ;;  %433 = vxpose.xlu0.b32.cont [8/16] %v4543_v6, 128 }
  0x51   : > { %466 = vxpose.xlu1.b32.cont [9/16] %v4541_v5, 128  ;;  %434 = vxpose.xlu0.b32.cont [9/16] %v4543_v6, 128 }
  0x55   : > { %467 = vxpose.xlu1.b32.cont [10/16] %v4541_v5, 128  ;;  %435 = vxpose.xlu0.b32.cont [10/16] %v4543_v6, 128 }
  0x59   : > { %468 = vxpose.xlu1.b32.cont [11/16] %v4541_v5, 128  ;;  %436 = vxpose.xlu0.b32.cont [11/16] %v4543_v6, 128 }
  0x5d   : > { %469 = vxpose.xlu1.b32.cont [12/16] %v4541_v5, 128  ;;  %437 = vxpose.xlu0.b32.cont [12/16] %v4543_v6, 128 }
  0x61   : > { %470 = vxpose.xlu1.b32.cont [13/16] %v4541_v5, 128  ;;  %438 = vxpose.xlu0.b32.cont [13/16] %v4543_v6, 128 }
  0x65   : > { %471 = vxpose.xlu1.b32.cont [14/16] %v4541_v5, 128  ;;  %439 = vxpose.xlu0.b32.cont [14/16] %v4543_v6, 128 }
  0x69   : > { %472 = vxpose.xlu1.b32.cont [15/16] %v4541_v5, 128  ;;  %440 = vxpose.xlu0.b32.cont [15/16] %v4543_v6, 128 }
  0x6d   : > { %473 = vxpose.xlu1.b32.end [16/16] %v4541_v5, 128  ;;  %441 = vxpose.xlu0.b32.end [16/16] %v4543_v6, 128 }
  0x71   : > { %987 = vxpose.xlu1.b32.start [1/16] %v4578_v8, 128  ;;  %955 = vxpose.xlu0.b32.start [1/16] %v4580_v9, 128 }
  0x75   : > { %988 = vxpose.xlu1.b32.cont [2/16] %v4578_v8, 128  ;;  %956 = vxpose.xlu0.b32.cont [2/16] %v4580_v9, 128 }
  0x79   : > { %989 = vxpose.xlu1.b32.cont [3/16] %v4578_v8, 128  ;;  %957 = vxpose.xlu0.b32.cont [3/16] %v4580_v9, 128 }
  0x7d   : > { %990 = vxpose.xlu1.b32.cont [4/16] %v4578_v8, 128  ;;  %958 = vxpose.xlu0.b32.cont [4/16] %v4580_v9, 128 }
  0x81   : > { %991 = vxpose.xlu1.b32.cont [5/16] %v4578_v8, 128  ;;  %959 = vxpose.xlu0.b32.cont [5/16] %v4580_v9, 128 }
  0x85   : > { %992 = vxpose.xlu1.b32.cont [6/16] %v4578_v8, 128  ;;  %960 = vxpose.xlu0.b32.cont [6/16] %v4580_v9, 128 }
  0x89   : > { %993 = vxpose.xlu1.b32.cont [7/16] %v4578_v8, 128  ;;  %961 = vxpose.xlu0.b32.cont [7/16] %v4580_v9, 128 }
  0x8d   : > { %994 = vxpose.xlu1.b32.cont [8/16] %v4578_v8, 128  ;;  %962 = vxpose.xlu0.b32.cont [8/16] %v4580_v9, 128 }
  0x91   : > { %995 = vxpose.xlu1.b32.cont [9/16] %v4578_v8, 128  ;;  %963 = vxpose.xlu0.b32.cont [9/16] %v4580_v9, 128 }
  0x95   : > { %996 = vxpose.xlu1.b32.cont [10/16] %v4578_v8, 128  ;;  %964 = vxpose.xlu0.b32.cont [10/16] %v4580_v9, 128 }
  0x99   : > { %997 = vxpose.xlu1.b32.cont [11/16] %v4578_v8, 128  ;;  %965 = vxpose.xlu0.b32.cont [11/16] %v4580_v9, 128 }
  0x9d   : > { %998 = vxpose.xlu1.b32.cont [12/16] %v4578_v8, 128  ;;  %966 = vxpose.xlu0.b32.cont [12/16] %v4580_v9, 128 }
  0xa1   : > { %999 = vxpose.xlu1.b32.cont [13/16] %v4578_v8, 128  ;;  %967 = vxpose.xlu0.b32.cont [13/16] %v4580_v9, 128 }
  0xa5   : > { %1000 = vxpose.xlu1.b32.cont [14/16] %v4578_v8, 128  ;;  %968 = vxpose.xlu0.b32.cont [14/16] %v4580_v9, 128 }
  0xa9   : > { %1001 = vxpose.xlu1.b32.cont [15/16] %v4578_v8, 128  ;;  %969 = vxpose.xlu0.b32.cont [15/16] %v4580_v9, 128 }
  0xad   : > { %1002 = vxpose.xlu1.b32.end [16/16] %v4578_v8, 128  ;;  %970 = vxpose.xlu0.b32.end [16/16] %v4580_v9, 128 }
  0xb1   : > { %v474_v10 = vpop.trf.xlu1  ;;  %v442_v11 = vpop.trf.xlu0 }
  0xb2   : > { %v522_v12 = vmul.f32 %v474_v10, %v4543_v6  ;;  %v523_v13 = vmul.f32 %v474_v10, %v4541_v5  ;;  %v490_v14 = vmul.f32 %v442_v11, %v4543_v6  ;;  %v491_v15 = vmul.f32 %v442_v11, %v4541_v5 }
  0xb4   : > { %v586_v16 = vmul.f32 2.0, %v522_v12  ;;  %v587_v17 = vmul.f32 2.0, %v523_v13  ;;  %v554_v18 = vmul.f32 2.0, %v490_v14  ;;  %v555_v19 = vmul.f32 2.0, %v491_v15 }
  0xb5   : > { %v475_v22 = vpop.trf.xlu1  ;;  %v443_v23 = vpop.trf.xlu0 }
  0xb6   : > { %v3611_v24 = vclamps-f32 %v586_v16, 1.0  ;;  %v3612_v25 = vclamps-f32 %v587_v17, 1.0  ;;  %v3579_v26 = vclamps-f32 %v554_v18, 1.0  ;;  %v3580_v27 = vclamps-f32 %v555_v19, 1.0 }
  0xb7   : > { %v524_v28 = vmul.f32 %v475_v22, %v4543_v6  ;;  %v525_v29 = vmul.f32 %v475_v22, %v4541_v5  ;;  %v492_v30 = vmul.f32 %v443_v23, %v4543_v6  ;;  %v493_v31 = vmul.f32 %v443_v23, %v4541_v5 }
  0xb8   : > { %v780_v32 = vmul.f32 %v3611_v24, %v4618_v20  ;;  %v781_v33 = vmul.f32 %v3612_v25, %v4618_v20  ;;  %v748_v34 = vmul.f32 %v3579_v26, %v4618_v20  ;;  %v749_v35 = vmul.f32 %v3580_v27, %v4618_v20 }
  0xb9   : > { %v588_v36 = vmul.f32 2.0, %v524_v28  ;;  %v589_v37 = vmul.f32 2.0, %v525_v29  ;;  %v556_v38 = vmul.f32 2.0, %v492_v30  ;;  %v557_v39 = vmul.f32 2.0, %v493_v31  ;;  %v476_v40 = vpop.trf.xlu1  ;;  %v444_v41 = vpop.trf.xlu0 }
  0xba   : > { %v846_v42 = vadd.f32 %v4620_v21, %v780_v32  ;;  %v847_v43 = vadd.f32 %v4620_v21, %v781_v33  ;;  %v814_v44 = vadd.f32 %v4620_v21, %v748_v34  ;;  %v815_v45 = vadd.f32 %v4620_v21, %v749_v35 }
  0xbb   : > { %v3613_v46 = vclamps-f32 %v588_v36, 1.0  ;;  %v3614_v47 = vclamps-f32 %v589_v37, 1.0  ;;  %v3581_v48 = vclamps-f32 %v556_v38, 1.0  ;;  %v3582_v49 = vclamps-f32 %v557_v39, 1.0 }
  0xbc   : > { %v526_v50 = vmul.f32 %v476_v40, %v4543_v6  ;;  %v527_v51 = vmul.f32 %v476_v40, %v4541_v5  ;;  %v494_v52 = vmul.f32 %v444_v41, %v4543_v6  ;;  %v495_v53 = vmul.f32 %v444_v41, %v4541_v5 }
  0xbd   : > { %v782_v54 = vmul.f32 %v3613_v46, %v4618_v20  ;;  %v783_v55 = vmul.f32 %v3614_v47, %v4618_v20  ;;  %v750_v56 = vmul.f32 %v3581_v48, %v4618_v20  ;;  %v751_v57 = vmul.f32 %v3582_v49, %v4618_v20  ;;  %v477_v58 = vpop.trf.xlu1  ;;  %v445_v59 = vpop.trf.xlu0 }
  0xbe   : > { %v590_v60 = vmul.f32 2.0, %v526_v50  ;;  %v591_v61 = vmul.f32 2.0, %v527_v51  ;;  %v558_v62 = vmul.f32 2.0, %v494_v52  ;;  %v559_v63 = vmul.f32 2.0, %v495_v53 }
  0xbf   : > { %v848_v0 = vadd.f32 %v4620_v21, %v782_v54  ;;  %v849_v1 = vadd.f32 %v4620_v21, %v783_v55  ;;  %v816_v2 = vadd.f32 %v4620_v21, %v750_v56  ;;  %v817_v3 = vadd.f32 %v4620_v21, %v751_v57 }
  0xc0   : > { %v3615_v4 = vclamps-f32 %v590_v60, 1.0  ;;  %v3616_v7 = vclamps-f32 %v591_v61, 1.0  ;;  %v3583_v10 = vclamps-f32 %v558_v62, 1.0  ;;  %v3584_v11 = vclamps-f32 %v559_v63, 1.0 }
  0xc1   : > { %v894_v12 = vpack.c.bf16 %v848_v0, %v846_v42  ;;  %v895_v13 = vpack.c.bf16 %v849_v1, %v847_v43  ;;  %v878_v14 = vpack.c.bf16 %v816_v2, %v814_v44  ;;  %v879_v15 = vpack.c.bf16 %v817_v3, %v815_v45  ;;  %v478_v16 = vpop.trf.xlu1  ;;  %v446_v17 = vpop.trf.xlu0 }
  0xc2   : > { %v528_v18 = vmul.f32 %v477_v58, %v4543_v6  ;;  %v529_v19 = vmul.f32 %v477_v58, %v4541_v5  ;;  %v496_v22 = vmul.f32 %v445_v59, %v4543_v6  ;;  %v497_v23 = vmul.f32 %v445_v59, %v4541_v5 }
  0xc3   : > { %926 = vst [vmem:[#allocation3 + $0x80] sm:$0xff] %v894_v12  ;;  %927 = vst [vmem:[#allocation3 + $0x88] sm:$0xff] %v895_v13  ;;  %v784_v24 = vmul.f32 %v3615_v4, %v4618_v20  ;;  %v785_v25 = vmul.f32 %v3616_v7, %v4618_v20  ;;  %v752_v26 = vmul.f32 %v3583_v10, %v4618_v20  ;;  %v4675_v60 = vstv %s4654_s25 }
  0xc4   : > { %910 = vst [vmem:[#allocation3] sm:$0xff] %v878_v14  ;;  %911 = vst [vmem:[#allocation3 + $0x8] sm:$0xff] %v879_v15  ;;  %v753_v27 = vmul.f32 %v3584_v11, %v4618_v20  ;;  %v592_v28 = vmul.f32 2.0, %v528_v18  ;;  %v593_v29 = vmul.f32 2.0, %v529_v19  ;;  %v560_v30 = vmul.f32 2.0, %v496_v22 }
  0xc5   : > { %v561_v31 = vmul.f32 2.0, %v497_v23  ;;  %v479_v32 = vpop.trf.xlu1  ;;  %v447_v33 = vpop.trf.xlu0  ;;  %v530_v34 = vmul.f32 %v478_v16, %v4543_v6  ;;  %v531_v35 = vmul.f32 %v478_v16, %v4541_v5  ;;  %v498_v36 = vmul.f32 %v446_v17, %v4543_v6 }
  0xc6   : > { %v499_v37 = vmul.f32 %v446_v17, %v4541_v5  ;;  %v3617_v38 = vclamps-f32 %v592_v28, 1.0  ;;  %v3618_v39 = vclamps-f32 %v593_v29, 1.0  ;;  %v3585_v40 = vclamps-f32 %v560_v30, 1.0 }
  0xc7   : > { %v3586_v41 = vclamps-f32 %v561_v31, 1.0  ;;  %v850_v42 = vadd.f32 %v4620_v21, %v784_v24  ;;  %v851_v43 = vadd.f32 %v4620_v21, %v785_v25  ;;  %v818_v44 = vadd.f32 %v4620_v21, %v752_v26 }
  0xc8   : > { %v819_v45 = vadd.f32 %v4620_v21, %v753_v27  ;;  %v786_v46 = vmul.f32 %v3617_v38, %v4618_v20  ;;  %v787_v47 = vmul.f32 %v3618_v39, %v4618_v20  ;;  %v754_v48 = vmul.f32 %v3585_v40, %v4618_v20 }
  0xc9   : > { %v755_v49 = vmul.f32 %v3586_v41, %v4618_v20  ;;  %v480_v50 = vpop.trf.xlu1  ;;  %v448_v51 = vpop.trf.xlu0  ;;  %v594_v52 = vmul.f32 2.0, %v530_v34  ;;  %v595_v53 = vmul.f32 2.0, %v531_v35  ;;  %v562_v54 = vmul.f32 2.0, %v498_v36 }
  0xca   : > { %v563_v55 = vmul.f32 2.0, %v499_v37  ;;  %v852_v56 = vadd.f32 %v4620_v21, %v786_v46  ;;  %v853_v57 = vadd.f32 %v4620_v21, %v787_v47  ;;  %v820_v58 = vadd.f32 %v4620_v21, %v754_v48 }
  0xcb   : > { %v821_v59 = vadd.f32 %v4620_v21, %v755_v49  ;;  %v4678_v61 = vstv %s4656_s8  ;;  %v3619_v4 = vclamps-f32 %v594_v52, 1.0  ;;  %v3620_v7 = vclamps-f32 %v595_v53, 1.0 }
  0xcc   : > { %v896_v62 = vpack.c.bf16 %v852_v56, %v850_v42  ;;  %v897_v63 = vpack.c.bf16 %v853_v57, %v851_v43  ;;  %v880_v0 = vpack.c.bf16 %v820_v58, %v818_v44  ;;  %v3587_v10 = vclamps-f32 %v562_v54, 1.0 }
  0xcd   : > { %v881_v1 = vpack.c.bf16 %v821_v59, %v819_v45  ;;  %v481_v2 = vpop.trf.xlu1  ;;  %v449_v3 = vpop.trf.xlu0  ;;  %v3588_v11 = vclamps-f32 %v563_v55, 1.0  ;;  %v532_v12 = vmul.f32 %v479_v32, %v4543_v6  ;;  %v533_v13 = vmul.f32 %v479_v32, %v4541_v5 }
  0xce   : > { %928 = vst [vmem:[#allocation3 + $0x90] sm:$0xff] %v896_v62  ;;  %929 = vst [vmem:[#allocation3 + $0x98] sm:$0xff] %v897_v63  ;;  %v500_v14 = vmul.f32 %v447_v33, %v4543_v6  ;;  %v501_v15 = vmul.f32 %v447_v33, %v4541_v5  ;;  %v534_v16 = vmul.f32 %v480_v50, %v4543_v6 }
  0xcf   : > { %912 = vst [vmem:[#allocation3 + $0x10] sm:$0xff] %v880_v0  ;;  %913 = vst [vmem:[#allocation3 + $0x18] sm:$0xff] %v881_v1  ;;  %v535_v17 = vmul.f32 %v480_v50, %v4541_v5  ;;  %v502_v18 = vmul.f32 %v448_v51, %v4543_v6  ;;  %v503_v19 = vmul.f32 %v448_v51, %v4541_v5  ;;  %v596_v22 = vmul.f32 2.0, %v532_v12 }
  0xd0   : > { %v597_v23 = vmul.f32 2.0, %v533_v13  ;;  %v564_v24 = vmul.f32 2.0, %v500_v14  ;;  %v565_v25 = vmul.f32 2.0, %v501_v15  ;;  %v788_v28 = vmul.f32 %v3619_v4, %v4618_v20 }
  0xd1   : > { %v482_v26 = vpop.trf.xlu1  ;;  %v450_v27 = vpop.trf.xlu0  ;;  %v789_v29 = vmul.f32 %v3620_v7, %v4618_v20  ;;  %v756_v30 = vmul.f32 %v3587_v10, %v4618_v20  ;;  %v757_v31 = vmul.f32 %v3588_v11, %v4618_v20  ;;  %v3621_v32 = vclamps-f32 %v596_v22, 1.0 }
  0xd2   : > { %v3622_v33 = vclamps-f32 %v597_v23, 1.0  ;;  %v3589_v34 = vclamps-f32 %v564_v24, 1.0  ;;  %v3590_v35 = vclamps-f32 %v565_v25, 1.0  ;;  %v598_v36 = vmul.f32 2.0, %v534_v16 }
  0xd3   : > { %v599_v37 = vmul.f32 2.0, %v535_v17  ;;  %v566_v38 = vmul.f32 2.0, %v502_v18  ;;  %v567_v39 = vmul.f32 2.0, %v503_v19  ;;  %v790_v40 = vmul.f32 %v3621_v32, %v4618_v20 }
  0xd4   : > { %v791_v41 = vmul.f32 %v3622_v33, %v4618_v20  ;;  %v758_v42 = vmul.f32 %v3589_v34, %v4618_v20  ;;  %v759_v43 = vmul.f32 %v3590_v35, %v4618_v20  ;;  %v854_v46 = vadd.f32 %v4620_v21, %v788_v28 }
  0xd5   : > { %v4696_v44 = vpop.trf.xlu1  ;;  %v4698_v45 = vpop.trf.xlu0  ;;  %v855_v47 = vadd.f32 %v4620_v21, %v789_v29  ;;  %v822_v48 = vadd.f32 %v4620_v21, %v756_v30  ;;  %v823_v49 = vadd.f32 %v4620_v21, %v757_v31  ;;  %v856_v50 = vadd.f32 %v4620_v21, %v790_v40 }
  0xd6   : > { %v857_v51 = vadd.f32 %v4620_v21, %v791_v41  ;;  %v824_v52 = vadd.f32 %v4620_v21, %v758_v42  ;;  %v825_v53 = vadd.f32 %v4620_v21, %v759_v43  ;;  %v3623_v54 = vclamps-f32 %v598_v36, 1.0 }
  0xd7   : > { %v3624_v55 = vclamps-f32 %v599_v37, 1.0  ;;  %v3591_v56 = vclamps-f32 %v566_v38, 1.0  ;;  %v3592_v57 = vclamps-f32 %v567_v39, 1.0  ;;  %v898_v58 = vpack.c.bf16 %v856_v50, %v854_v46 }
  0xd8   : > { %v899_v59 = vpack.c.bf16 %v857_v51, %v855_v47  ;;  %v882_v62 = vpack.c.bf16 %v824_v52, %v822_v48  ;;  %v883_v63 = vpack.c.bf16 %v825_v53, %v823_v49  ;;  %v536_v4 = vmul.f32 %v481_v2, %v4543_v6 }
  0xd9   : > { %v4708_v0 = vpop.trf.xlu1  ;;  %v4710_v1 = vpop.trf.xlu0  ;;  %v537_v7 = vmul.f32 %v481_v2, %v4541_v5  ;;  %v504_v10 = vmul.f32 %v449_v3, %v4543_v6  ;;  %v505_v11 = vmul.f32 %v449_v3, %v4541_v5  ;;  %930 = vst [vmem:[#allocation3 + $0xa0] sm:$0xff] %v898_v58  ;;  %v538_v12 = vmul.f32 %v482_v26, %v4543_v6 }
  0xda   : > { %931 = vst [vmem:[#allocation3 + $0xa8] sm:$0xff] %v899_v59  ;;  %914 = vst [vmem:[#allocation3 + $0x20] sm:$0xff] %v882_v62  ;;  %v539_v13 = vmul.f32 %v482_v26, %v4541_v5  ;;  %v506_v14 = vmul.f32 %v450_v27, %v4543_v6  ;;  %v507_v15 = vmul.f32 %v450_v27, %v4541_v5  ;;  %v600_v16 = vmul.f32 2.0, %v536_v4 }
  0xdb   : > { %915 = vst [vmem:[#allocation3 + $0x28] sm:$0xff] %v883_v63  ;;  %v601_v17 = vmul.f32 2.0, %v537_v7  ;;  %v568_v18 = vmul.f32 2.0, %v504_v10  ;;  %v569_v2 = vmul.f32 2.0, %v505_v11  ;;  %v792_v19 = vmul.f32 %v3623_v54, %v4618_v20 }
  0xdc   : > { %v793_v3 = vmul.f32 %v3624_v55, %v4618_v20  ;;  %v760_v22 = vmul.f32 %v3591_v56, %v4618_v20  ;;  %v761_v23 = vmul.f32 %v3592_v57, %v4618_v20  ;;  %v3625_v24 = vclamps-f32 %v600_v16, 1.0 }
  0xdd   : > { %v3626_v25 = vclamps-f32 %v601_v17, 1.0  ;;  %v3593_v28 = vclamps-f32 %v568_v18, 1.0  ;;  %v3594_v26 = vclamps-f32 %v569_v2, 1.0  ;;  %v602_v29 = vmul.f32 2.0, %v538_v12  ;;  %v4724_v32 = vpop.trf.xlu1  ;;  %v4726_v33 = vpop.trf.xlu0 }
  0xde   : > { %v603_v30 = vmul.f32 2.0, %v539_v13  ;;  %v570_v31 = vmul.f32 2.0, %v506_v14  ;;  %v571_v27 = vmul.f32 2.0, %v507_v15  ;;  %v794_v34 = vmul.f32 %v3625_v24, %v4618_v20 }
  0xdf   : > { %v795_v35 = vmul.f32 %v3626_v25, %v4618_v20  ;;  %v762_v36 = vmul.f32 %v3593_v28, %v4618_v20  ;;  %v763_v37 = vmul.f32 %v3594_v26, %v4618_v20  ;;  %v858_v38 = vadd.f32 %v4620_v21, %v792_v19 }
  0xe0   : > { %v859_v39 = vadd.f32 %v4620_v21, %v793_v3  ;;  %v826_v40 = vadd.f32 %v4620_v21, %v760_v22  ;;  %v827_v41 = vadd.f32 %v4620_v21, %v761_v23  ;;  %v860_v42 = vadd.f32 %v4620_v21, %v794_v34 }
  0xe1   : > { %v861_v43 = vadd.f32 %v4620_v21, %v795_v35  ;;  %v828_v46 = vadd.f32 %v4620_v21, %v762_v36  ;;  %v829_v47 = vadd.f32 %v4620_v21, %v763_v37  ;;  %v3627_v48 = vclamps-f32 %v602_v29, 1.0  ;;  %v486_v62 = vpop.trf.xlu1  ;;  %v454_v63 = vpop.trf.xlu0 }
  0xe2   : > { %v3628_v49 = vclamps-f32 %v603_v30, 1.0  ;;  %v3595_v50 = vclamps-f32 %v570_v31, 1.0  ;;  %v3596_v51 = vclamps-f32 %v571_v27, 1.0  ;;  %v900_v52 = vpack.c.bf16 %v860_v42, %v858_v38 }
  0xe3   : > { %v901_v53 = vpack.c.bf16 %v861_v43, %v859_v39  ;;  %v884_v54 = vpack.c.bf16 %v828_v46, %v826_v40  ;;  %v885_v55 = vpack.c.bf16 %v829_v47, %v827_v41  ;;  %v540_v56 = vmul.f32 %v4696_v44, %v4543_v6 }
  0xe4   : > { %v541_v57 = vmul.f32 %v4696_v44, %v4541_v5  ;;  %v508_v58 = vmul.f32 %v4698_v45, %v4543_v6  ;;  %v509_v59 = vmul.f32 %v4698_v45, %v4541_v5  ;;  %932 = vst [vmem:[#allocation3 + $0xb0] sm:$0xff] %v900_v52  ;;  %v542_v4 = vmul.f32 %v4708_v0, %v4543_v6 }
  0xe5   : > { %933 = vst [vmem:[#allocation3 + $0xb8] sm:$0xff] %v901_v53  ;;  %916 = vst [vmem:[#allocation3 + $0x30] sm:$0xff] %v884_v54  ;;  %v543_v7 = vmul.f32 %v4708_v0, %v4541_v5  ;;  %v510_v44 = vmul.f32 %v4710_v1, %v4543_v6  ;;  %v511_v10 = vmul.f32 %v4710_v1, %v4541_v5  ;;  %v604_v11 = vmul.f32 2.0, %v540_v56  ;;  %v4764_v29 = vpop.trf.xlu1  ;;  %v4766_v30 = vpop.trf.xlu0 }
  0xe6   : > { %917 = vst [vmem:[#allocation3 + $0x38] sm:$0xff] %v885_v55  ;;  %v605_v45 = vmul.f32 2.0, %v541_v57  ;;  %v572_v12 = vmul.f32 2.0, %v508_v58  ;;  %v573_v13 = vmul.f32 2.0, %v509_v59  ;;  %v796_v14 = vmul.f32 %v3627_v48, %v4618_v20 }
  0xe7   : > { %v797_v15 = vmul.f32 %v3628_v49, %v4618_v20  ;;  %v764_v16 = vmul.f32 %v3595_v50, %v4618_v20  ;;  %v765_v17 = vmul.f32 %v3596_v51, %v4618_v20  ;;  %v3629_v18 = vclamps-f32 %v604_v11, 1.0 }
  0xe8   : > { %v3630_v0 = vclamps-f32 %v605_v45, 1.0  ;;  %v3597_v2 = vclamps-f32 %v572_v12, 1.0  ;;  %v3598_v19 = vclamps-f32 %v573_v13, 1.0  ;;  %v606_v3 = vmul.f32 2.0, %v542_v4 }
  0xe9   : > { %v607_v22 = vmul.f32 2.0, %v543_v7  ;;  %v574_v23 = vmul.f32 2.0, %v510_v44  ;;  %v575_v1 = vmul.f32 2.0, %v511_v10  ;;  %v798_v24 = vmul.f32 %v3629_v18, %v4618_v20  ;;  %v488_v58 = vpop.trf.xlu1 }
  0xea   : > { %v799_v25 = vmul.f32 %v3630_v0, %v4618_v20  ;;  %v766_v28 = vmul.f32 %v3597_v2, %v4618_v20  ;;  %v767_v26 = vmul.f32 %v3598_v19, %v4618_v20  ;;  %v862_v31 = vadd.f32 %v4620_v21, %v796_v14 }
  0xeb   : > { %v863_v27 = vadd.f32 %v4620_v21, %v797_v15  ;;  %v830_v34 = vadd.f32 %v4620_v21, %v764_v16  ;;  %v831_v35 = vadd.f32 %v4620_v21, %v765_v17  ;;  %v864_v36 = vadd.f32 %v4620_v21, %v798_v24 }
  0xec   : > { %v865_v37 = vadd.f32 %v4620_v21, %v799_v25  ;;  %v832_v38 = vadd.f32 %v4620_v21, %v766_v28  ;;  %v833_v39 = vadd.f32 %v4620_v21, %v767_v26  ;;  %v3631_v40 = vclamps-f32 %v606_v3, 1.0 }
  0xed   : > { %v3632_v41 = vclamps-f32 %v607_v22, 1.0  ;;  %v3599_v42 = vclamps-f32 %v574_v23, 1.0  ;;  %v3600_v43 = vclamps-f32 %v575_v1, 1.0  ;;  %v902_v46 = vpack.c.bf16 %v864_v36, %v862_v31  ;;  %v4800_v24 = vpop.trf.xlu1 }
  0xee   : > { %v903_v47 = vpack.c.bf16 %v865_v37, %v863_v27  ;;  %v886_v48 = vpack.c.bf16 %v832_v38, %v830_v34  ;;  %v887_v49 = vpack.c.bf16 %v833_v39, %v831_v35  ;;  %v544_v50 = vmul.f32 %v4724_v32, %v4543_v6 }
  0xef   : > { %v545_v51 = vmul.f32 %v4724_v32, %v4541_v5  ;;  %v512_v52 = vmul.f32 %v4726_v33, %v4543_v6  ;;  %v513_v53 = vmul.f32 %v4726_v33, %v4541_v5  ;;  %934 = vst [vmem:[#allocation3 + $0xc0] sm:$0xff] %v902_v46  ;;  %v546_v54 = vmul.f32 %v486_v62, %v4543_v6  ;;  %v456_v32 = vpop.trf.xlu0 }
  0xf0   : > { %935 = vst [vmem:[#allocation3 + $0xc8] sm:$0xff] %v903_v47  ;;  %918 = vst [vmem:[#allocation3 + $0x40] sm:$0xff] %v886_v48  ;;  %v547_v55 = vmul.f32 %v486_v62, %v4541_v5  ;;  %v514_v56 = vmul.f32 %v454_v63, %v4543_v6  ;;  %v515_v57 = vmul.f32 %v454_v63, %v4541_v5  ;;  %v608_v59 = vmul.f32 2.0, %v544_v50 }
  0xf1   : > { %919 = vst [vmem:[#allocation3 + $0x48] sm:$0xff] %v887_v49  ;;  %v609_v4 = vmul.f32 2.0, %v545_v51  ;;  %v576_v7 = vmul.f32 2.0, %v512_v52  ;;  %v577_v44 = vmul.f32 2.0, %v513_v53  ;;  %v800_v33 = vmul.f32 %v3631_v40, %v4618_v20 }
  0xf2   : > { %v801_v10 = vmul.f32 %v3632_v41, %v4618_v20  ;;  %v768_v11 = vmul.f32 %v3599_v42, %v4618_v20  ;;  %v769_v45 = vmul.f32 %v3600_v43, %v4618_v20  ;;  %v3633_v12 = vclamps-f32 %v608_v59, 1.0 }
  0xf3   : > { %v3634_v62 = vclamps-f32 %v609_v4, 1.0  ;;  %v3601_v13 = vclamps-f32 %v576_v7, 1.0  ;;  %v3602_v14 = vclamps-f32 %v577_v44, 1.0  ;;  %v610_v15 = vmul.f32 2.0, %v546_v54  ;;  %v4802_v25 = vpop.trf.xlu0 }
  0xf4   : > { %v611_v63 = vmul.f32 2.0, %v547_v55  ;;  %v578_v16 = vmul.f32 2.0, %v514_v56  ;;  %v579_v17 = vmul.f32 2.0, %v515_v57  ;;  %v802_v18 = vmul.f32 %v3633_v12, %v4618_v20  ;;  %v1003_v55 = vpop.trf.xlu1 }
  0xf5   : > { %v803_v0 = vmul.f32 %v3634_v62, %v4618_v20  ;;  %v770_v2 = vmul.f32 %v3601_v13, %v4618_v20  ;;  %v771_v19 = vmul.f32 %v3602_v14, %v4618_v20  ;;  %v866_v3 = vadd.f32 %v4620_v21, %v800_v33 }
  0xf6   : > { %v867_v22 = vadd.f32 %v4620_v21, %v801_v10  ;;  %v834_v23 = vadd.f32 %v4620_v21, %v768_v11  ;;  %v835_v1 = vadd.f32 %v4620_v21, %v769_v45  ;;  %v868_v28 = vadd.f32 %v4620_v21, %v802_v18 }
  0xf7   : > { %v869_v26 = vadd.f32 %v4620_v21, %v803_v0  ;;  %v836_v31 = vadd.f32 %v4620_v21, %v770_v2  ;;  %v837_v27 = vadd.f32 %v4620_v21, %v771_v19  ;;  %v3635_v34 = vclamps-f32 %v610_v15, 1.0  ;;  %v971_v56 = vpop.trf.xlu0 }
  0xf8   : > { %v3636_v35 = vclamps-f32 %v611_v63, 1.0  ;;  %v3603_v36 = vclamps-f32 %v578_v16, 1.0  ;;  %v3604_v37 = vclamps-f32 %v579_v17, 1.0  ;;  %v904_v38 = vpack.c.bf16 %v868_v28, %v866_v3  ;;  %v4836_v3 = vpop.trf.xlu1 }
  0xf9   : > { %v905_v39 = vpack.c.bf16 %v869_v26, %v867_v22  ;;  %v888_v40 = vpack.c.bf16 %v836_v31, %v834_v23  ;;  %v889_v41 = vpack.c.bf16 %v837_v27, %v835_v1  ;;  %v548_v42 = vmul.f32 %v4764_v29, %v4543_v6 }
  0xfa   : > { %v549_v43 = vmul.f32 %v4764_v29, %v4541_v5  ;;  %v516_v46 = vmul.f32 %v4766_v30, %v4543_v6  ;;  %v517_v47 = vmul.f32 %v4766_v30, %v4541_v5  ;;  %936 = vst [vmem:[#allocation3 + $0xd0] sm:$0xff] %v904_v38  ;;  %v550_v48 = vmul.f32 %v488_v58, %v4543_v6 }
  0xfb   : > { %937 = vst [vmem:[#allocation3 + $0xd8] sm:$0xff] %v905_v39  ;;  %920 = vst [vmem:[#allocation3 + $0x50] sm:$0xff] %v888_v40  ;;  %v551_v49 = vmul.f32 %v488_v58, %v4541_v5  ;;  %v518_v50 = vmul.f32 %v456_v32, %v4543_v6  ;;  %v519_v51 = vmul.f32 %v456_v32, %v4541_v5  ;;  %v612_v52 = vmul.f32 2.0, %v548_v42  ;;  %v4838_v22 = vpop.trf.xlu0 }
  0xfc   : > { %921 = vst [vmem:[#allocation3 + $0x58] sm:$0xff] %v889_v41  ;;  %v613_v29 = vmul.f32 2.0, %v549_v43  ;;  %v580_v53 = vmul.f32 2.0, %v516_v46  ;;  %v581_v54 = vmul.f32 2.0, %v517_v47  ;;  %v804_v30 = vmul.f32 %v3635_v34, %v4618_v20 }
  0xfd   : > { %v805_v57 = vmul.f32 %v3636_v35, %v4618_v20  ;;  %v772_v59 = vmul.f32 %v3603_v36, %v4618_v20  ;;  %v773_v4 = vmul.f32 %v3604_v37, %v4618_v20  ;;  %v3637_v7 = vclamps-f32 %v612_v52, 1.0 }
  0xfe   : > { %v3638_v58 = vclamps-f32 %v613_v29, 1.0  ;;  %v3605_v44 = vclamps-f32 %v580_v53, 1.0  ;;  %v3606_v33 = vclamps-f32 %v581_v54, 1.0  ;;  %v614_v10 = vmul.f32 2.0, %v550_v48 }
  0xff   : > { %v615_v32 = vmul.f32 2.0, %v551_v49  ;;  %v582_v11 = vmul.f32 2.0, %v518_v50  ;;  %v583_v45 = vmul.f32 2.0, %v519_v51  ;;  %v806_v12 = vmul.f32 %v3637_v7, %v4618_v20  ;;  %v1005_v50 = vpop.trf.xlu1  ;;  %v973_v51 = vpop.trf.xlu0 }
 0x100   : > { %v807_v62 = vmul.f32 %v3638_v58, %v4618_v20  ;;  %v774_v13 = vmul.f32 %v3605_v44, %v4618_v20  ;;  %v775_v14 = vmul.f32 %v3606_v33, %v4618_v20  ;;  %v870_v15 = vadd.f32 %v4620_v21, %v804_v30 }
 0x101   : > { %v871_v63 = vadd.f32 %v4620_v21, %v805_v57  ;;  %v838_v16 = vadd.f32 %v4620_v21, %v772_v59  ;;  %v839_v17 = vadd.f32 %v4620_v21, %v773_v4  ;;  %v872_v18 = vadd.f32 %v4620_v21, %v806_v12 }
 0x102   : > { %v873_v0 = vadd.f32 %v4620_v21, %v807_v62  ;;  %v840_v2 = vadd.f32 %v4620_v21, %v774_v13  ;;  %v841_v19 = vadd.f32 %v4620_v21, %v775_v14  ;;  %v3639_v23 = vclamps-f32 %v614_v10, 1.0 }
 0x103   : > { %v3640_v1 = vclamps-f32 %v615_v32, 1.0  ;;  %v3607_v28 = vclamps-f32 %v582_v11, 1.0  ;;  %v3608_v26 = vclamps-f32 %v583_v45, 1.0  ;;  %v906_v31 = vpack.c.bf16 %v872_v18, %v870_v15 }
 0x104   : > { %v907_v27 = vpack.c.bf16 %v873_v0, %v871_v63  ;;  %v890_v34 = vpack.c.bf16 %v840_v2, %v838_v16  ;;  %v891_v35 = vpack.c.bf16 %v841_v19, %v839_v17  ;;  %v552_v36 = vmul.f32 %v4800_v24, %v4543_v6  ;;  %v1006_v63 = vpop.trf.xlu1  ;;  %v974_v16 = vpop.trf.xlu0 }
 0x105   : > { %v553_v37 = vmul.f32 %v4800_v24, %v4541_v5  ;;  %v520_v38 = vmul.f32 %v4802_v25, %v4543_v6  ;;  %v521_v39 = vmul.f32 %v4802_v25, %v4541_v5  ;;  %938 = vst [vmem:[#allocation3 + $0xe0] sm:$0xff] %v906_v31  ;;  %v1051_v40 = vmul.f32 %v1003_v55, %v4580_v9 }
 0x106   : > { %939 = vst [vmem:[#allocation3 + $0xe8] sm:$0xff] %v907_v27  ;;  %922 = vst [vmem:[#allocation3 + $0x60] sm:$0xff] %v890_v34  ;;  %v1052_v41 = vmul.f32 %v1003_v55, %v4578_v8  ;;  %v1019_v42 = vmul.f32 %v971_v56, %v4580_v9  ;;  %v1020_v43 = vmul.f32 %v971_v56, %v4578_v8  ;;  %v616_v46 = vmul.f32 2.0, %v552_v36 }
 0x107   : > { %923 = vst [vmem:[#allocation3 + $0x68] sm:$0xff] %v891_v35  ;;  %v617_v24 = vmul.f32 2.0, %v553_v37  ;;  %v584_v47 = vmul.f32 2.0, %v520_v38  ;;  %v585_v48 = vmul.f32 2.0, %v521_v39  ;;  %v808_v6 = vmul.f32 %v3639_v23, %v4618_v20 }
 0x108   : > { %v809_v5 = vmul.f32 %v3640_v1, %v4618_v20  ;;  %v776_v25 = vmul.f32 %v3607_v28, %v4618_v20  ;;  %v777_v49 = vmul.f32 %v3608_v26, %v4618_v20  ;;  %v3641_v52 = vclamps-f32 %v616_v46, 1.0  ;;  %v1007_v46 = vpop.trf.xlu1 }
 0x109   : > { %v3642_v29 = vclamps-f32 %v617_v24, 1.0  ;;  %v3609_v53 = vclamps-f32 %v584_v47, 1.0  ;;  %v3610_v54 = vclamps-f32 %v585_v48, 1.0  ;;  %v1115_v55 = vmul.f32 2.0, %v1051_v40  ;;  %v975_v24 = vpop.trf.xlu0 }
 0x10a   : > { %v1116_v56 = vmul.f32 2.0, %v1052_v41  ;;  %v1083_v30 = vmul.f32 2.0, %v1019_v42  ;;  %v1084_v57 = vmul.f32 2.0, %v1020_v43  ;;  %v810_v59 = vmul.f32 %v3641_v52, %v4618_v20 }
 0x10b   : > { %v811_v4 = vmul.f32 %v3642_v29, %v4618_v20  ;;  %v778_v7 = vmul.f32 %v3609_v53, %v4618_v20  ;;  %v779_v58 = vmul.f32 %v3610_v54, %v4618_v20  ;;  %v874_v44 = vadd.f32 %v4620_v21, %v808_v6 }
 0x10c   : > { %v875_v33 = vadd.f32 %v4620_v21, %v809_v5  ;;  %v842_v10 = vadd.f32 %v4620_v21, %v776_v25  ;;  %v843_v32 = vadd.f32 %v4620_v21, %v777_v49  ;;  %v876_v11 = vadd.f32 %v4620_v21, %v810_v59 }
 0x10d   : > { %v877_v45 = vadd.f32 %v4620_v21, %v811_v4  ;;  %v844_v12 = vadd.f32 %v4620_v21, %v778_v7  ;;  %v845_v62 = vadd.f32 %v4620_v21, %v779_v58  ;;  %v3677_v13 = vclamps-f32 %v1115_v55, 1.0 }
 0x10e   : > { %v3678_v14 = vclamps-f32 %v1116_v56, 1.0  ;;  %v3645_v15 = vclamps-f32 %v1083_v30, 1.0  ;;  %v3646_v20 = vclamps-f32 %v1084_v57, 1.0  ;;  %v908_v17 = vpack.c.bf16 %v876_v11, %v874_v44  ;;  %v1008_v11 = vpop.trf.xlu1 }
 0x10f   : > { %v909_v18 = vpack.c.bf16 %v877_v45, %v875_v33  ;;  %v892_v0 = vpack.c.bf16 %v844_v12, %v842_v10  ;;  %v893_v2 = vpack.c.bf16 %v845_v62, %v843_v32  ;;  %v1053_v19 = vmul.f32 %v4836_v3, %v4580_v9  ;;  %v976_v45 = vpop.trf.xlu0 }
 0x110   : > { %v1054_v23 = vmul.f32 %v4836_v3, %v4578_v8  ;;  %v1021_v1 = vmul.f32 %v4838_v22, %v4580_v9  ;;  %v1022_v21 = vmul.f32 %v4838_v22, %v4578_v8  ;;  %940 = vst [vmem:[#allocation3 + $0xf0] sm:$0xff] %v908_v17  ;;  %v1055_v28 = vmul.f32 %v1005_v50, %v4580_v9 }
 0x111   : > { %941 = vst [vmem:[#allocation3 + $0xf8] sm:$0xff] %v909_v18  ;;  %924 = vst [vmem:[#allocation3 + $0x70] sm:$0xff] %v892_v0  ;;  %v1056_v26 = vmul.f32 %v1005_v50, %v4578_v8  ;;  %v1023_v31 = vmul.f32 %v973_v51, %v4580_v9  ;;  %v1024_v27 = vmul.f32 %v973_v51, %v4578_v8  ;;  %v1117_v34 = vmul.f32 2.0, %v1053_v19 }
 0x112   : > { %925 = vst [vmem:[#allocation3 + $0x78] sm:$0xff] %v893_v2  ;;  %v1118_v3 = vmul.f32 2.0, %v1054_v23  ;;  %v1085_v35 = vmul.f32 2.0, %v1021_v1  ;;  %v1086_v36 = vmul.f32 2.0, %v1022_v21  ;;  %v1309_v37 = vmul.f32 %v3677_v13, %v4675_v60 }
 0x113   : > { %v1310_v22 = vmul.f32 %v3678_v14, %v4675_v60  ;;  %v1277_v38 = vmul.f32 %v3645_v15, %v4675_v60  ;;  %v1278_v39 = vmul.f32 %v3646_v20, %v4675_v60  ;;  %v3679_v40 = vclamps-f32 %v1117_v34, 1.0 }
 0x114   : > { %v3680_v41 = vclamps-f32 %v1118_v3, 1.0  ;;  %v3647_v42 = vclamps-f32 %v1085_v35, 1.0  ;;  %v3648_v43 = vclamps-f32 %v1086_v36, 1.0  ;;  %v1119_v47 = vmul.f32 2.0, %v1055_v28 }
 0x115   : > { %v1120_v48 = vmul.f32 2.0, %v1056_v26  ;;  %v1087_v6 = vmul.f32 2.0, %v1023_v31  ;;  %v1088_v5 = vmul.f32 2.0, %v1024_v27  ;;  %v1311_v25 = vmul.f32 %v3679_v40, %v4675_v60 }
 0x116   : > { %v1312_v49 = vmul.f32 %v3680_v41, %v4675_v60  ;;  %v1279_v50 = vmul.f32 %v3647_v42, %v4675_v60  ;;  %v1280_v51 = vmul.f32 %v3648_v43, %v4675_v60  ;;  %v1375_v52 = vadd.f32 %v4678_v61, %v1309_v37  ;;  %v1009_v37 = vpop.trf.xlu1 }
 0x117   : > { %v1376_v29 = vadd.f32 %v4678_v61, %v1310_v22  ;;  %v1343_v53 = vadd.f32 %v4678_v61, %v1277_v38  ;;  %v1344_v54 = vadd.f32 %v4678_v61, %v1278_v39  ;;  %v1377_v55 = vadd.f32 %v4678_v61, %v1311_v25  ;;  %v977_v22 = vpop.trf.xlu0 }
 0x118   : > { %v1378_v56 = vadd.f32 %v4678_v61, %v1312_v49  ;;  %v1345_v30 = vadd.f32 %v4678_v61, %v1279_v50  ;;  %v1346_v57 = vadd.f32 %v4678_v61, %v1280_v51  ;;  %v3681_v59 = vclamps-f32 %v1119_v47, 1.0 }
 0x119   : > { %v3682_v4 = vclamps-f32 %v1120_v48, 1.0  ;;  %v3649_v7 = vclamps-f32 %v1087_v6, 1.0  ;;  %v3650_v58 = vclamps-f32 %v1088_v5, 1.0  ;;  %v1423_v44 = vpack.c.bf16 %v1377_v55, %v1375_v52 }
 0x11a   : > { %v1424_v33 = vpack.c.bf16 %v1378_v56, %v1376_v29  ;;  %v1407_v10 = vpack.c.bf16 %v1345_v30, %v1343_v53  ;;  %v1408_v32 = vpack.c.bf16 %v1346_v57, %v1344_v54  ;;  %v1057_v12 = vmul.f32 %v1006_v63, %v4580_v9 }
 0x11b   : > { %v1058_v62 = vmul.f32 %v1006_v63, %v4578_v8  ;;  %v1025_v13 = vmul.f32 %v974_v16, %v4580_v9  ;;  %v1026_v14 = vmul.f32 %v974_v16, %v4578_v8  ;;  %1456 = vst [vmem:[#allocation3 + $0x180] sm:$0xff] %v1423_v44  ;;  %v1059_v15 = vmul.f32 %v1007_v46, %v4580_v9 }
 0x11c   : > { %1457 = vst [vmem:[#allocation3 + $0x188] sm:$0xff] %v1424_v33  ;;  %1440 = vst [vmem:[#allocation3 + $0x100] sm:$0xff] %v1407_v10  ;;  %v1060_v20 = vmul.f32 %v1007_v46, %v4578_v8  ;;  %v1027_v17 = vmul.f32 %v975_v24, %v4580_v9  ;;  %v1028_v18 = vmul.f32 %v975_v24, %v4578_v8  ;;  %v1121_v0 = vmul.f32 2.0, %v1057_v12 }
 0x11d   : > { %1441 = vst [vmem:[#allocation3 + $0x108] sm:$0xff] %v1408_v32  ;;  %v1122_v2 = vmul.f32 2.0, %v1058_v62  ;;  %v1089_v19 = vmul.f32 2.0, %v1025_v13  ;;  %v1090_v63 = vmul.f32 2.0, %v1026_v14  ;;  %v1313_v23 = vmul.f32 %v3681_v59, %v4675_v60  ;;  %v1010_v59 = vpop.trf.xlu1 }
 0x11e   : > { %v1314_v16 = vmul.f32 %v3682_v4, %v4675_v60  ;;  %v1281_v1 = vmul.f32 %v3649_v7, %v4675_v60  ;;  %v1282_v21 = vmul.f32 %v3650_v58, %v4675_v60  ;;  %v3683_v28 = vclamps-f32 %v1121_v0, 1.0  ;;  %v978_v4 = vpop.trf.xlu0 }
 0x11f   : > { %v3684_v26 = vclamps-f32 %v1122_v2, 1.0  ;;  %v3651_v31 = vclamps-f32 %v1089_v19, 1.0  ;;  %v3652_v27 = vclamps-f32 %v1090_v63, 1.0  ;;  %v1123_v34 = vmul.f32 2.0, %v1059_v15 }
 0x120   : > { %v1124_v3 = vmul.f32 2.0, %v1060_v20  ;;  %v1091_v35 = vmul.f32 2.0, %v1027_v17  ;;  %v1092_v36 = vmul.f32 2.0, %v1028_v18  ;;  %v1315_v38 = vmul.f32 %v3683_v28, %v4675_v60 }
 0x121   : > { %v1316_v39 = vmul.f32 %v3684_v26, %v4675_v60  ;;  %v1283_v40 = vmul.f32 %v3651_v31, %v4675_v60  ;;  %v1284_v41 = vmul.f32 %v3652_v27, %v4675_v60  ;;  %v1379_v42 = vadd.f32 %v4678_v61, %v1313_v23  ;;  %v1011_v28 = vpop.trf.xlu1 }
 0x122   : > { %v1380_v43 = vadd.f32 %v4678_v61, %v1314_v16  ;;  %v1347_v46 = vadd.f32 %v4678_v61, %v1281_v1  ;;  %v1348_v24 = vadd.f32 %v4678_v61, %v1282_v21  ;;  %v1381_v47 = vadd.f32 %v4678_v61, %v1315_v38  ;;  %v979_v26 = vpop.trf.xlu0 }
 0x123   : > { %v1382_v48 = vadd.f32 %v4678_v61, %v1316_v39  ;;  %v1349_v6 = vadd.f32 %v4678_v61, %v1283_v40  ;;  %v1350_v5 = vadd.f32 %v4678_v61, %v1284_v41  ;;  %v3685_v25 = vclamps-f32 %v1123_v34, 1.0 }
 0x124   : > { %v3686_v49 = vclamps-f32 %v1124_v3, 1.0  ;;  %v3653_v50 = vclamps-f32 %v1091_v35, 1.0  ;;  %v3654_v51 = vclamps-f32 %v1092_v36, 1.0  ;;  %v1425_v52 = vpack.c.bf16 %v1381_v47, %v1379_v42 }
 0x125   : > { %v1426_v29 = vpack.c.bf16 %v1382_v48, %v1380_v43  ;;  %v1409_v53 = vpack.c.bf16 %v1349_v6, %v1347_v46  ;;  %v1410_v54 = vpack.c.bf16 %v1350_v5, %v1348_v24  ;;  %v1061_v55 = vmul.f32 %v1008_v11, %v4580_v9 }
 0x126   : > { %v1062_v56 = vmul.f32 %v1008_v11, %v4578_v8  ;;  %v1029_v30 = vmul.f32 %v976_v45, %v4580_v9  ;;  %v1030_v57 = vmul.f32 %v976_v45, %v4578_v8  ;;  %1458 = vst [vmem:[#allocation3 + $0x190] sm:$0xff] %v1425_v52  ;;  %v1063_v7 = vmul.f32 %v1009_v37, %v4580_v9  ;;  %v1012_v52 = vpop.trf.xlu1 }
 0x127   : > { %1459 = vst [vmem:[#allocation3 + $0x198] sm:$0xff] %v1426_v29  ;;  %1442 = vst [vmem:[#allocation3 + $0x110] sm:$0xff] %v1409_v53  ;;  %v1064_v58 = vmul.f32 %v1009_v37, %v4578_v8  ;;  %v1031_v44 = vmul.f32 %v977_v22, %v4580_v9  ;;  %v1032_v33 = vmul.f32 %v977_v22, %v4578_v8  ;;  %v1125_v10 = vmul.f32 2.0, %v1061_v55  ;;  %v980_v29 = vpop.trf.xlu0 }
 0x128   : > { %1443 = vst [vmem:[#allocation3 + $0x118] sm:$0xff] %v1410_v54  ;;  %v1126_v32 = vmul.f32 2.0, %v1062_v56  ;;  %v1093_v11 = vmul.f32 2.0, %v1029_v30  ;;  %v1094_v12 = vmul.f32 2.0, %v1030_v57  ;;  %v1317_v45 = vmul.f32 %v3685_v25, %v4675_v60 }
 0x129   : > { %v1318_v62 = vmul.f32 %v3686_v49, %v4675_v60  ;;  %v1285_v13 = vmul.f32 %v3653_v50, %v4675_v60  ;;  %v1286_v14 = vmul.f32 %v3654_v51, %v4675_v60  ;;  %v3687_v15 = vclamps-f32 %v1125_v10, 1.0 }
 0x12a   : > { %v3688_v20 = vclamps-f32 %v1126_v32, 1.0  ;;  %v3655_v17 = vclamps-f32 %v1093_v11, 1.0  ;;  %v3656_v18 = vclamps-f32 %v1094_v12, 1.0  ;;  %v1127_v0 = vmul.f32 2.0, %v1063_v7 }
 0x12b   : > { %v1128_v2 = vmul.f32 2.0, %v1064_v58  ;;  %v1095_v19 = vmul.f32 2.0, %v1031_v44  ;;  %v1096_v63 = vmul.f32 2.0, %v1032_v33  ;;  %v1319_v23 = vmul.f32 %v3687_v15, %v4675_v60 }
 0x12c   : > { %v1320_v16 = vmul.f32 %v3688_v20, %v4675_v60  ;;  %v1287_v1 = vmul.f32 %v3655_v17, %v4675_v60  ;;  %v1288_v21 = vmul.f32 %v3656_v18, %v4675_v60  ;;  %v1383_v31 = vadd.f32 %v4678_v61, %v1317_v45 }
 0x12d   : > { %v1384_v27 = vadd.f32 %v4678_v61, %v1318_v62  ;;  %v1351_v34 = vadd.f32 %v4678_v61, %v1285_v13  ;;  %v1352_v3 = vadd.f32 %v4678_v61, %v1286_v14  ;;  %v1385_v35 = vadd.f32 %v4678_v61, %v1319_v23 }
 0x12e   : > { %v1386_v36 = vadd.f32 %v4678_v61, %v1320_v16  ;;  %v1353_v37 = vadd.f32 %v4678_v61, %v1287_v1  ;;  %v1354_v22 = vadd.f32 %v4678_v61, %v1288_v21  ;;  %v3689_v38 = vclamps-f32 %v1127_v0, 1.0  ;;  %v1013_v0 = vpop.trf.xlu1 }
 0x12f   : > { %v3690_v39 = vclamps-f32 %v1128_v2, 1.0  ;;  %v3657_v40 = vclamps-f32 %v1095_v19, 1.0  ;;  %v3658_v41 = vclamps-f32 %v1096_v63, 1.0  ;;  %v1427_v42 = vpack.c.bf16 %v1385_v35, %v1383_v31  ;;  %v981_v2 = vpop.trf.xlu0 }
 0x130   : > { %v1428_v43 = vpack.c.bf16 %v1386_v36, %v1384_v27  ;;  %v1411_v46 = vpack.c.bf16 %v1353_v37, %v1351_v34  ;;  %v1412_v24 = vpack.c.bf16 %v1354_v22, %v1352_v3  ;;  %v1065_v47 = vmul.f32 %v1010_v59, %v4580_v9 }
 0x131   : > { %v1066_v48 = vmul.f32 %v1010_v59, %v4578_v8  ;;  %v1033_v6 = vmul.f32 %v978_v4, %v4580_v9  ;;  %v1034_v5 = vmul.f32 %v978_v4, %v4578_v8  ;;  %1460 = vst [vmem:[#allocation3 + $0x1a0] sm:$0xff] %v1427_v42  ;;  %v1067_v25 = vmul.f32 %v1011_v28, %v4580_v9 }
 0x132   : > { %1461 = vst [vmem:[#allocation3 + $0x1a8] sm:$0xff] %v1428_v43  ;;  %1444 = vst [vmem:[#allocation3 + $0x120] sm:$0xff] %v1411_v46  ;;  %v1068_v49 = vmul.f32 %v1011_v28, %v4578_v8  ;;  %v1035_v50 = vmul.f32 %v979_v26, %v4580_v9  ;;  %v1036_v51 = vmul.f32 %v979_v26, %v4578_v8  ;;  %v1129_v53 = vmul.f32 2.0, %v1065_v47  ;;  %v1014_v47 = vpop.trf.xlu1 }
 0x133   : > { %1445 = vst [vmem:[#allocation3 + $0x128] sm:$0xff] %v1412_v24  ;;  %v1130_v54 = vmul.f32 2.0, %v1066_v48  ;;  %v1097_v55 = vmul.f32 2.0, %v1033_v6  ;;  %v1098_v56 = vmul.f32 2.0, %v1034_v5  ;;  %v1321_v30 = vmul.f32 %v3689_v38, %v4675_v60  ;;  %v982_v48 = vpop.trf.xlu0 }
 0x134   : > { %v1322_v57 = vmul.f32 %v3690_v39, %v4675_v60  ;;  %v1289_v59 = vmul.f32 %v3657_v40, %v4675_v60  ;;  %v1290_v4 = vmul.f32 %v3658_v41, %v4675_v60  ;;  %v3691_v7 = vclamps-f32 %v1129_v53, 1.0 }
 0x135   : > { %v3692_v58 = vclamps-f32 %v1130_v54, 1.0  ;;  %v3659_v44 = vclamps-f32 %v1097_v55, 1.0  ;;  %v3660_v33 = vclamps-f32 %v1098_v56, 1.0  ;;  %v1131_v10 = vmul.f32 2.0, %v1067_v25 }
 0x136   : > { %v1132_v32 = vmul.f32 2.0, %v1068_v49  ;;  %v1099_v11 = vmul.f32 2.0, %v1035_v50  ;;  %v1100_v12 = vmul.f32 2.0, %v1036_v51  ;;  %v1323_v45 = vmul.f32 %v3691_v7, %v4675_v60 }
 0x137   : > { %v1324_v62 = vmul.f32 %v3692_v58, %v4675_v60  ;;  %v1291_v13 = vmul.f32 %v3659_v44, %v4675_v60  ;;  %v1292_v14 = vmul.f32 %v3660_v33, %v4675_v60  ;;  %v1387_v15 = vadd.f32 %v4678_v61, %v1321_v30 }
 0x138   : > { %v1388_v20 = vadd.f32 %v4678_v61, %v1322_v57  ;;  %v1355_v17 = vadd.f32 %v4678_v61, %v1289_v59  ;;  %v1356_v18 = vadd.f32 %v4678_v61, %v1290_v4  ;;  %v1389_v19 = vadd.f32 %v4678_v61, %v1323_v45  ;;  %v1015_v45 = vpop.trf.xlu1 }
 0x139   : > { %v1390_v63 = vadd.f32 %v4678_v61, %v1324_v62  ;;  %v1357_v23 = vadd.f32 %v4678_v61, %v1291_v13  ;;  %v1358_v16 = vadd.f32 %v4678_v61, %v1292_v14  ;;  %v3693_v1 = vclamps-f32 %v1131_v10, 1.0  ;;  %v983_v62 = vpop.trf.xlu0 }
 0x13a   : > { %v3694_v21 = vclamps-f32 %v1132_v32, 1.0  ;;  %v3661_v28 = vclamps-f32 %v1099_v11, 1.0  ;;  %v3662_v26 = vclamps-f32 %v1100_v12, 1.0  ;;  %v1429_v31 = vpack.c.bf16 %v1389_v19, %v1387_v15 }
 0x13b   : > { %v1430_v27 = vpack.c.bf16 %v1390_v63, %v1388_v20  ;;  %v1413_v34 = vpack.c.bf16 %v1357_v23, %v1355_v17  ;;  %v1414_v3 = vpack.c.bf16 %v1358_v16, %v1356_v18  ;;  %v1069_v35 = vmul.f32 %v1012_v52, %v4580_v9 }
 0x13c   : > { %v1070_v36 = vmul.f32 %v1012_v52, %v4578_v8  ;;  %v1037_v37 = vmul.f32 %v980_v29, %v4580_v9  ;;  %v1038_v22 = vmul.f32 %v980_v29, %v4578_v8  ;;  %1462 = vst [vmem:[#allocation3 + $0x1b0] sm:$0xff] %v1429_v31  ;;  %v1071_v38 = vmul.f32 %v1013_v0, %v4580_v9 }
 0x13d   : > { %1463 = vst [vmem:[#allocation3 + $0x1b8] sm:$0xff] %v1430_v27  ;;  %1446 = vst [vmem:[#allocation3 + $0x130] sm:$0xff] %v1413_v34  ;;  %v1072_v39 = vmul.f32 %v1013_v0, %v4578_v8  ;;  %v1039_v40 = vmul.f32 %v981_v2, %v4580_v9  ;;  %v1040_v41 = vmul.f32 %v981_v2, %v4578_v8  ;;  %v1133_v42 = vmul.f32 2.0, %v1069_v35 }
 0x13e   : > { %1447 = vst [vmem:[#allocation3 + $0x138] sm:$0xff] %v1414_v3  ;;  %v1134_v43 = vmul.f32 2.0, %v1070_v36  ;;  %v1101_v46 = vmul.f32 2.0, %v1037_v37  ;;  %v1102_v24 = vmul.f32 2.0, %v1038_v22  ;;  %v1325_v6 = vmul.f32 %v3693_v1, %v4675_v60 }
 0x13f   : > { %v1326_v5 = vmul.f32 %v3694_v21, %v4675_v60  ;;  %v1293_v25 = vmul.f32 %v3661_v28, %v4675_v60  ;;  %v1294_v49 = vmul.f32 %v3662_v26, %v4675_v60  ;;  %v3695_v50 = vclamps-f32 %v1133_v42, 1.0 }
 0x140   : > { %v3696_v51 = vclamps-f32 %v1134_v43, 1.0  ;;  %v3663_v52 = vclamps-f32 %v1101_v46, 1.0  ;;  %v3664_v29 = vclamps-f32 %v1102_v24, 1.0  ;;  %v1135_v53 = vmul.f32 2.0, %v1071_v38  ;;  %v1016_v38 = vpop.trf.xlu1 }
 0x141   : > { %v1136_v54 = vmul.f32 2.0, %v1072_v39  ;;  %v1103_v55 = vmul.f32 2.0, %v1039_v40  ;;  %v1104_v56 = vmul.f32 2.0, %v1040_v41  ;;  %v1327_v30 = vmul.f32 %v3695_v50, %v4675_v60  ;;  %v984_v39 = vpop.trf.xlu0 }
 0x142   : > { %v1328_v57 = vmul.f32 %v3696_v51, %v4675_v60  ;;  %v1295_v59 = vmul.f32 %v3663_v52, %v4675_v60  ;;  %v1296_v4 = vmul.f32 %v3664_v29, %v4675_v60  ;;  %v1391_v7 = vadd.f32 %v4678_v61, %v1325_v6 }
 0x143   : > { %v1392_v58 = vadd.f32 %v4678_v61, %v1326_v5  ;;  %v1359_v44 = vadd.f32 %v4678_v61, %v1293_v25  ;;  %v1360_v33 = vadd.f32 %v4678_v61, %v1294_v49  ;;  %v1393_v10 = vadd.f32 %v4678_v61, %v1327_v30 }
 0x144   : > { %v1394_v32 = vadd.f32 %v4678_v61, %v1328_v57  ;;  %v1361_v11 = vadd.f32 %v4678_v61, %v1295_v59  ;;  %v1362_v12 = vadd.f32 %v4678_v61, %v1296_v4  ;;  %v3697_v13 = vclamps-f32 %v1135_v53, 1.0 }
 0x145   : > { %v3698_v14 = vclamps-f32 %v1136_v54, 1.0  ;;  %v3665_v15 = vclamps-f32 %v1103_v55, 1.0  ;;  %v3666_v20 = vclamps-f32 %v1104_v56, 1.0  ;;  %v1431_v17 = vpack.c.bf16 %v1393_v10, %v1391_v7  ;;  %v1017_v7 = vpop.trf.xlu1 }
 0x146   : > { %v1432_v18 = vpack.c.bf16 %v1394_v32, %v1392_v58  ;;  %v1415_v0 = vpack.c.bf16 %v1361_v11, %v1359_v44  ;;  %v1416_v2 = vpack.c.bf16 %v1362_v12, %v1360_v33  ;;  %v1073_v19 = vmul.f32 %v1014_v47, %v4580_v9  ;;  %v985_v58 = vpop.trf.xlu0 }
 0x147   : > { %v1074_v63 = vmul.f32 %v1014_v47, %v4578_v8  ;;  %v1041_v23 = vmul.f32 %v982_v48, %v4580_v9  ;;  %v1042_v16 = vmul.f32 %v982_v48, %v4578_v8  ;;  %1464 = vst [vmem:[#allocation3 + $0x1c0] sm:$0xff] %v1431_v17  ;;  %v1075_v1 = vmul.f32 %v1015_v45, %v4580_v9 }
 0x148   : > { %1465 = vst [vmem:[#allocation3 + $0x1c8] sm:$0xff] %v1432_v18  ;;  %1448 = vst [vmem:[#allocation3 + $0x140] sm:$0xff] %v1415_v0  ;;  %v1076_v21 = vmul.f32 %v1015_v45, %v4578_v8  ;;  %v1043_v28 = vmul.f32 %v983_v62, %v4580_v9  ;;  %v1044_v26 = vmul.f32 %v983_v62, %v4578_v8  ;;  %v1137_v31 = vmul.f32 2.0, %v1073_v19 }
 0x149   : > { %1449 = vst [vmem:[#allocation3 + $0x148] sm:$0xff] %v1416_v2  ;;  %v1138_v27 = vmul.f32 2.0, %v1074_v63  ;;  %v1105_v34 = vmul.f32 2.0, %v1041_v23  ;;  %v1106_v3 = vmul.f32 2.0, %v1042_v16  ;;  %v1329_v35 = vmul.f32 %v3697_v13, %v4675_v60 }
 0x14a   : > { %v1330_v36 = vmul.f32 %v3698_v14, %v4675_v60  ;;  %v1297_v37 = vmul.f32 %v3665_v15, %v4675_v60  ;;  %v1298_v22 = vmul.f32 %v3666_v20, %v4675_v60  ;;  %v3699_v40 = vclamps-f32 %v1137_v31, 1.0 }
 0x14b   : > { %v3700_v41 = vclamps-f32 %v1138_v27, 1.0  ;;  %v3667_v42 = vclamps-f32 %v1105_v34, 1.0  ;;  %v3668_v43 = vclamps-f32 %v1106_v3, 1.0  ;;  %v1139_v46 = vmul.f32 2.0, %v1075_v1 }
 0x14c   : > { %v1140_v24 = vmul.f32 2.0, %v1076_v21  ;;  %v1107_v47 = vmul.f32 2.0, %v1043_v28  ;;  %v1108_v48 = vmul.f32 2.0, %v1044_v26  ;;  %v1331_v6 = vmul.f32 %v3699_v40, %v4675_v60 }
 0x14d   : > { %v1332_v5 = vmul.f32 %v3700_v41, %v4675_v60  ;;  %v1299_v25 = vmul.f32 %v3667_v42, %v4675_v60  ;;  %v1300_v49 = vmul.f32 %v3668_v43, %v4675_v60  ;;  %v1395_v50 = vadd.f32 %v4678_v61, %v1329_v35 }
 0x14e   : > { %v1396_v51 = vadd.f32 %v4678_v61, %v1330_v36  ;;  %v1363_v52 = vadd.f32 %v4678_v61, %v1297_v37  ;;  %v1364_v29 = vadd.f32 %v4678_v61, %v1298_v22  ;;  %v1397_v53 = vadd.f32 %v4678_v61, %v1331_v6 }
 0x14f   : > { %v1398_v54 = vadd.f32 %v4678_v61, %v1332_v5  ;;  %v1365_v55 = vadd.f32 %v4678_v61, %v1299_v25  ;;  %v1366_v56 = vadd.f32 %v4678_v61, %v1300_v49  ;;  %v3701_v30 = vclamps-f32 %v1139_v46, 1.0 }
 0x150   : > { %v3702_v57 = vclamps-f32 %v1140_v24, 1.0  ;;  %v3669_v59 = vclamps-f32 %v1107_v47, 1.0  ;;  %v3670_v4 = vclamps-f32 %v1108_v48, 1.0  ;;  %v1433_v44 = vpack.c.bf16 %v1397_v53, %v1395_v50  ;;  %v1018_v47 = vpop.trf.xlu1  ;;  %v986_v48 = vpop.trf.xlu0 }
 0x151   : > { %v1434_v33 = vpack.c.bf16 %v1398_v54, %v1396_v51  ;;  %v1417_v10 = vpack.c.bf16 %v1365_v55, %v1363_v52  ;;  %v1418_v32 = vpack.c.bf16 %v1366_v56, %v1364_v29  ;;  %v1077_v11 = vmul.f32 %v1016_v38, %v4580_v9 }
 0x152   : > { %v1078_v12 = vmul.f32 %v1016_v38, %v4578_v8  ;;  %v1045_v45 = vmul.f32 %v984_v39, %v4580_v9  ;;  %v1046_v62 = vmul.f32 %v984_v39, %v4578_v8  ;;  %1466 = vst [vmem:[#allocation3 + $0x1d0] sm:$0xff] %v1433_v44  ;;  %v1079_v13 = vmul.f32 %v1017_v7, %v4580_v9 }
 0x153   : > { %1467 = vst [vmem:[#allocation3 + $0x1d8] sm:$0xff] %v1434_v33  ;;  %1450 = vst [vmem:[#allocation3 + $0x150] sm:$0xff] %v1417_v10  ;;  %v1080_v14 = vmul.f32 %v1017_v7, %v4578_v8  ;;  %v1047_v15 = vmul.f32 %v985_v58, %v4580_v9  ;;  %v1048_v20 = vmul.f32 %v985_v58, %v4578_v8  ;;  %v1141_v17 = vmul.f32 2.0, %v1077_v11 }
 0x154   : > { %1451 = vst [vmem:[#allocation3 + $0x158] sm:$0xff] %v1418_v32  ;;  %v1142_v18 = vmul.f32 2.0, %v1078_v12  ;;  %v1109_v0 = vmul.f32 2.0, %v1045_v45  ;;  %v1110_v2 = vmul.f32 2.0, %v1046_v62  ;;  %v1333_v19 = vmul.f32 %v3701_v30, %v4675_v60 }
 0x155   : > { %v1334_v63 = vmul.f32 %v3702_v57, %v4675_v60  ;;  %v1301_v23 = vmul.f32 %v3669_v59, %v4675_v60  ;;  %v1302_v16 = vmul.f32 %v3670_v4, %v4675_v60  ;;  %v3703_v1 = vclamps-f32 %v1141_v17, 1.0 }
 0x156   : > { %v3704_v21 = vclamps-f32 %v1142_v18, 1.0  ;;  %v3671_v28 = vclamps-f32 %v1109_v0, 1.0  ;;  %v3672_v26 = vclamps-f32 %v1110_v2, 1.0  ;;  %v5028_v31 = vmul.f32 2.0, %v1079_v13 }
 0x157   : > { %v5030_v27 = vmul.f32 2.0, %v1080_v14  ;;  %v5032_v34 = vmul.f32 2.0, %v1047_v15  ;;  %v5034_v3 = vmul.f32 2.0, %v1048_v20  ;;  %v1335_v35 = vmul.f32 %v3703_v1, %v4675_v60 }
 0x158   : > { %v1336_v36 = vmul.f32 %v3704_v21, %v4675_v60  ;;  %v1303_v37 = vmul.f32 %v3671_v28, %v4675_v60  ;;  %v1304_v22 = vmul.f32 %v3672_v26, %v4675_v60  ;;  %v1399_v38 = vadd.f32 %v4678_v61, %v1333_v19 }
 0x159   : > { %v1400_v39 = vadd.f32 %v4678_v61, %v1334_v63  ;;  %v1367_v40 = vadd.f32 %v4678_v61, %v1301_v23  ;;  %v1368_v41 = vadd.f32 %v4678_v61, %v1302_v16  ;;  %v1401_v42 = vadd.f32 %v4678_v61, %v1335_v35 }
 0x15a   : > { %v1402_v43 = vadd.f32 %v4678_v61, %v1336_v36  ;;  %v1369_v46 = vadd.f32 %v4678_v61, %v1303_v37  ;;  %v1370_v24 = vadd.f32 %v4678_v61, %v1304_v22  ;;  %v3705_v6 = vclamps-f32 %v5028_v31, 1.0 }
 0x15b   : > { %v3706_v5 = vclamps-f32 %v5030_v27, 1.0  ;;  %v3673_v25 = vclamps-f32 %v5032_v34, 1.0  ;;  %v3674_v49 = vclamps-f32 %v5034_v3, 1.0  ;;  %v1435_v50 = vpack.c.bf16 %v1401_v42, %v1399_v38 }
 0x15c   : > { %v1436_v51 = vpack.c.bf16 %v1402_v43, %v1400_v39  ;;  %v1419_v52 = vpack.c.bf16 %v1369_v46, %v1367_v40  ;;  %v1420_v29 = vpack.c.bf16 %v1370_v24, %v1368_v41  ;;  %v1081_v53 = vmul.f32 %v1018_v47, %v4580_v9 }
 0x15d   : > { %v1082_v54 = vmul.f32 %v1018_v47, %v4578_v8  ;;  %v1049_v55 = vmul.f32 %v986_v48, %v4580_v9  ;;  %v1050_v56 = vmul.f32 %v986_v48, %v4578_v8  ;;  %1468 = vst [vmem:[#allocation3 + $0x1e0] sm:$0xff] %v1435_v50  ;;  %v4403_v7 = vmov 0.0  }
 0x15e   : > { %1469 = vst [vmem:[#allocation3 + $0x1e8] sm:$0xff] %v1436_v51  ;;  %1452 = vst [vmem:[#allocation3 + $0x160] sm:$0xff] %v1419_v52  ;;  %v1145_v30 = vmul.f32 2.0, %v1081_v53  ;;  %v1337_v8 = vmul.f32 %v3705_v6, %v4675_v60  ;;  %v1338_v9 = vmul.f32 %v3706_v5, %v4675_v60  ;;  %v1305_v58 = vmul.f32 %v3673_v25, %v4675_v60 }
 0x15f   : > { %1453 = vst [vmem:[#allocation3 + $0x168] sm:$0xff] %v1420_v29  ;;  %v1146_v57 = vmul.f32 2.0, %v1082_v54  ;;  %v1113_v59 = vmul.f32 2.0, %v1049_v55  ;;  %v1114_v4 = vmul.f32 2.0, %v1050_v56  ;;  %382 = vst.msk [vmem:[#allocation2] sm:$0xff] %vm381_vm0, %v4403_v7  ;;  %v1306_v44 = vmul.f32 %v3674_v49, %v4675_v60 }
 0x160   : > { %383 = vst.msk [vmem:[#allocation2 + $0x8] sm:$0xff] %vm381_vm0, %v4403_v7  ;;  %384 = vst.msk [vmem:[#allocation2 + $0x10] sm:$0xff] %vm381_vm0, %v4403_v7  ;;  %v3707_v33 = vclamps-f32 %v1145_v30, 1.0  ;;  %v1403_v14 = vadd.f32 %v4678_v61, %v1337_v8  ;;  %v1404_v15 = vadd.f32 %v4678_v61, %v1338_v9  ;;  %v1371_v20 = vadd.f32 %v4678_v61, %v1305_v58 }
 0x161   : > { %385 = vst.msk [vmem:[#allocation2 + $0x18] sm:$0xff] %vm381_vm0, %v4403_v7  ;;  %386 = vst.msk [vmem:[#allocation2 + $0x20] sm:$0xff] %vm381_vm0, %v4403_v7  ;;  %v3708_v10 = vclamps-f32 %v1146_v57, 1.0  ;;  %v3675_v32 = vclamps-f32 %v1113_v59, 1.0  ;;  %v3676_v11 = vclamps-f32 %v1114_v4, 1.0  ;;  %v1372_v17 = vadd.f32 %v4678_v61, %v1306_v44 }
 0x162   : > { %387 = vst.msk [vmem:[#allocation2 + $0x28] sm:$0xff] %vm381_vm0, %v4403_v7  ;;  %388 = vst.msk [vmem:[#allocation2 + $0x30] sm:$0xff] %vm381_vm0, %v4403_v7  ;;  %v1339_v12 = vmul.f32 %v3707_v33, %v4675_v60 }
 0x163   : > { %389 = vst.msk [vmem:[#allocation2 + $0x38] sm:$0xff] %vm381_vm0, %v4403_v7  ;;  %390 = vst.msk [vmem:[#allocation2 + $0x40] sm:$0xff] %vm381_vm0, %v4403_v7  ;;  %v1340_v45 = vmul.f32 %v3708_v10, %v4675_v60  ;;  %v1307_v62 = vmul.f32 %v3675_v32, %v4675_v60  ;;  %v1308_v13 = vmul.f32 %v3676_v11, %v4675_v60 }
 0x164   : > { %391 = vst.msk [vmem:[#allocation2 + $0x48] sm:$0xff] %vm381_vm0, %v4403_v7  ;;  %392 = vst.msk [vmem:[#allocation2 + $0x50] sm:$0xff] %vm381_vm0, %v4403_v7  ;;  %v1405_v18 = vadd.f32 %v4678_v61, %v1339_v12 }
 0x165   : > { %393 = vst.msk [vmem:[#allocation2 + $0x58] sm:$0xff] %vm381_vm0, %v4403_v7  ;;  %394 = vst.msk [vmem:[#allocation2 + $0x60] sm:$0xff] %vm381_vm0, %v4403_v7  ;;  %v1406_v0 = vadd.f32 %v4678_v61, %v1340_v45  ;;  %v1373_v2 = vadd.f32 %v4678_v61, %v1307_v62  ;;  %v1374_v19 = vadd.f32 %v4678_v61, %v1308_v13 }
 0x166   : > { %395 = vst.msk [vmem:[#allocation2 + $0x68] sm:$0xff] %vm381_vm0, %v4403_v7  ;;  %396 = vst.msk [vmem:[#allocation2 + $0x70] sm:$0xff] %vm381_vm0, %v4403_v7  ;;  %v1437_v63 = vpack.c.bf16 %v1405_v18, %v1403_v14 }
 0x167   : > { %397 = vst.msk [vmem:[#allocation2 + $0x78] sm:$0xff] %vm381_vm0, %v4403_v7  ;;  %398 = vst.msk [vmem:[#allocation2 + $0x80] sm:$0xff] %vm381_vm0, %v4403_v7  ;;  %v1438_v23 = vpack.c.bf16 %v1406_v0, %v1404_v15  ;;  %v1421_v16 = vpack.c.bf16 %v1373_v2, %v1371_v20  ;;  %v1422_v60 = vpack.c.bf16 %v1374_v19, %v1372_v17 }
 0x168   : > { %399 = vst.msk [vmem:[#allocation2 + $0x88] sm:$0xff] %vm381_vm0, %v4403_v7  ;;  %400 = vst.msk [vmem:[#allocation2 + $0x90] sm:$0xff] %vm381_vm0, %v4403_v7 }
 0x169   : > { %401 = vst.msk [vmem:[#allocation2 + $0x98] sm:$0xff] %vm381_vm0, %v4403_v7  ;;  %402 = vst.msk [vmem:[#allocation2 + $0xa0] sm:$0xff] %vm381_vm0, %v4403_v7 }
 0x16a   : > { %403 = vst.msk [vmem:[#allocation2 + $0xa8] sm:$0xff] %vm381_vm0, %v4403_v7  ;;  %404 = vst.msk [vmem:[#allocation2 + $0xb0] sm:$0xff] %vm381_vm0, %v4403_v7 }
 0x16b   : > { %405 = vst.msk [vmem:[#allocation2 + $0xb8] sm:$0xff] %vm381_vm0, %v4403_v7  ;;  %406 = vst.msk [vmem:[#allocation2 + $0xc0] sm:$0xff] %vm381_vm0, %v4403_v7 }
 0x16c   : > { %407 = vst.msk [vmem:[#allocation2 + $0xc8] sm:$0xff] %vm381_vm0, %v4403_v7  ;;  %408 = vst.msk [vmem:[#allocation2 + $0xd0] sm:$0xff] %vm381_vm0, %v4403_v7 }
 0x16d   : > { %409 = vst.msk [vmem:[#allocation2 + $0xd8] sm:$0xff] %vm381_vm0, %v4403_v7  ;;  %410 = vst.msk [vmem:[#allocation2 + $0xe0] sm:$0xff] %vm381_vm0, %v4403_v7 }
 0x16e   : > { %411 = vst.msk [vmem:[#allocation2 + $0xe8] sm:$0xff] %vm381_vm0, %v4403_v7  ;;  %412 = vst.msk [vmem:[#allocation2 + $0xf0] sm:$0xff] %vm381_vm0, %v4403_v7 }
 0x16f   : > { %413 = vst.msk [vmem:[#allocation2 + $0xf8] sm:$0xff] %vm381_vm0, %v4403_v7  ;;  %1470 = vst [vmem:[#allocation3 + $0x1f0] sm:$0xff] %v1437_v63 }
 0x170   : > { %1471 = vst [vmem:[#allocation3 + $0x1f8] sm:$0xff] %v1438_v23  ;;  %1454 = vst [vmem:[#allocation3 + $0x170] sm:$0xff] %v1421_v16 }
 0x171   : > { %1455 = vst [vmem:[#allocation3 + $0x178] sm:$0xff] %v1422_v60 }
 0x172 PF: > { %v4131_v1 = vld [vmem:[%s4517_s9] sm:$0xff]   ;;  %v4132_v21 = vld [vmem:[%s4517_s9 + $0x8] sm:$0xff]   ;;  %v4133_v61 = vld [vmem:[%s4517_s9 + $0x10] sm:$0xff]   ;;  %vm1623_vm1 = vcmask 523264   ;;  %s4404_s16 = smov 120   ;;  %vm1945_vm2 = vcmask 64512  }
 0x173   : > { %3991 = vmatprep.subr.bf16.mxu0 %v4131_v1  ;;  %v4135_v28 = vld [vmem:[%s4511_s21] sm:$0xff]   ;;  %v4134_v26 = vld [vmem:[%s4517_s9 + $0x18] sm:$0xff]   ;;  %v4136_v31 = vld [vmem:[%s4511_s21 + $0x8] sm:$0xff]   ;;  %s2684_s9 = ssub.s32 0, %s4384_s24  ;;  %p2683_p5 = scmp.lt.s32.totalorder %s4384_s24, 0  ;;  %vm3100_vm3 = vcmask 1043456  }
 0x174   : > { %3992 = vmatpush3.bf16.msra.mxu0 %v4131_v1  ;;  %3999 = vmatprep.mubr.msk.bf16.mxu0 %vm1623_vm1, %v4135_v28  ;;  %v4137_v27 = vld [vmem:[%s4511_s21 + $0x10] sm:$0xff]   ;;  %v4138_v34 = vld [vmem:[%s4511_s21 + $0x18] sm:$0xff]   ;;  %v4139_v3 = vld [vmem:[%s4511_s21 + $0x20] sm:$0xff]   ;;  %s3764_s10 = smin.u32 %s4384_s24, %s2684_s9  ;;  %p3785_p7 = scmp.ne.s32.totalorder %s4384_s24, 7 }
 0x175   : > { %3993 = vmatprep.subr.bf16.mxu0 %v4132_v21  ;;  %v4140_v35 = vld [vmem:[%s4511_s21 + $0x28] sm:$0xff]   ;;  %v4141_v36 = vld [vmem:[%s4511_s21 + $0x30] sm:$0xff]   ;;  %v4142_v37 = vld [vmem:[%s4511_s21 + $0x38] sm:$0xff]   ;;  %s2686_s11 = sand.u32 1, %s3764_s10  }
 0x176   : > { %v4143_v22 = vld [vmem:[%s4511_s21 + $0x40] sm:$0xff]   ;;  %v4144_v38 = vld [vmem:[%s4511_s21 + $0x48] sm:$0xff]   ;;  %v4145_v39 = vld [vmem:[%s4511_s21 + $0x50] sm:$0xff]  }
 0x177   : > { %v4146_v40 = vld [vmem:[%s4511_s21 + $0x58] sm:$0xff]   ;;  %v4147_v41 = vld [vmem:[%s4511_s21 + $0x60] sm:$0xff]   ;;  %v4148_v42 = vld [vmem:[%s4511_s21 + $0x68] sm:$0xff]  }
 0x178   : > { %3994 = vmatpush3.bf16.msra.mxu0 %v4132_v21  ;;  %v4149_v43 = vld [vmem:[%s4511_s21 + $0x70] sm:$0xff]   ;;  %v4150_v46 = vld [vmem:[%s4511_s21 + $0x78] sm:$0xff]   ;;  %v5145_v24 = vld [vmem:[%s361_s12] ss:$0 sm:$0xff]  ;;  %s4405_s21 = smov 112   ;;  %s2687_s12 = ssub.s32 0, %s2686_s11 }
 0x179   : > { %3995 = vmatprep.subr.bf16.mxu0 %v4133_v61  ;;  %s6028_s12 = smov (!%p2683_p5, %s2687_s12), %s2686_s11 }
 0x17a   : > { %p3766_p6 = scmp.lt.s32.totalorder %s6028_s12, 0  ;;  %s2693_s13 = sadd.s32 2, %s6028_s12 }
 0x17c   : > { %3996 = vmatpush3.bf16.msra.mxu0 %v4133_v61  ;;  %s6030_s13 = smov (!%p3766_p6, %s2693_s13), %s6028_s12 }
 0x17d   : > { %3997 = vmatprep.subr.bf16.mxu0 %v4134_v26  ;;  %s3793_s14 = sshll.u32 %s6030_s13, 8 }
 0x17e   : > { %s5578_s15 = scalar_lea.vmem [#allocation3], %s3793_s14 }
 0x180   : > { %3998 = vmatpush3.bf16.msra.mxu0 %v4134_v26 }
 0x183   : > { %4000 = vmatmul.mubr.msk.bf16.vlgmr.msra.gmra.mrb[0].mxu0 %vm1623_vm1, %v4136_v31 }
 0x184   : > { %4003 = vmatprep.mubr.msk.bf16.mxu0 %vm1623_vm1, %v4137_v27 }
 0x18b   : > { %4004 = vmatmul.mubr.msk.bf16.gmra.mrb[4].mxu0 %vm1623_vm1, %v4138_v34 }
 0x18c   : > { %4007 = vmatprep.mubr.msk.bf16.mxu0 %vm1623_vm1, %v4139_v3 }
 0x193   : > { %4008 = vmatmul.mubr.msk.bf16.gmra.mrb[8].mxu0 %vm1623_vm1, %v4140_v35 }
 0x194   : > { %4011 = vmatprep.mubr.msk.bf16.mxu0 %vm1623_vm1, %v4141_v36 }
 0x19b   : > { %4012 = vmatmul.mubr.msk.bf16.gmra.mrb[12].mxu0 %vm1623_vm1, %v4142_v37 }
 0x19c   : > { %4015 = vmatprep.mubr.msk.bf16.mxu0 %vm1623_vm1, %v4143_v22 }
 0x1a3   : > { %4016 = vmatmul.mubr.msk.bf16.gmra.mrb[16].mxu0 %vm1623_vm1, %v4144_v38 }
 0x1a4   : > { %4019 = vmatprep.mubr.msk.bf16.mxu0 %vm1623_vm1, %v4145_v39 }
 0x1ab   : > { %4020 = vmatmul.mubr.msk.bf16.gmra.mrb[20].mxu0 %vm1623_vm1, %v4146_v40 }
 0x1ac   : > { %4023 = vmatprep.mubr.msk.bf16.mxu0 %vm1623_vm1, %v4147_v41 }
 0x1b3   : > { %4024 = vmatmul.mubr.msk.bf16.gmra.mrb[24].mxu0 %vm1623_vm1, %v4148_v42 }
 0x1b4   : > { %4027 = vmatprep.mubr.msk.bf16.mxu0 %vm1623_vm1, %v4149_v43 }
 0x1bb   : > { %4028 = vmatmul.mubr.msk.bf16.gmra.mrb[28].mxu0 %vm1623_vm1, %v4150_v46 }
 0x256   : > { %v4001_v47 = vpop.f32.mrb[0].mxu0 }
 0x257   : > { %v1715_v48 = vadd.f32 %v4001_v47, %v5145_v24  ;;  %v1706_v6 = vpop.f32.mrb[1].mxu0 }
 0x258   : > { %v1707_v5 = vadd.f32 %v5145_v24, %v1706_v6  ;;  %v4002_v25 = vpop.f32.mrb[2].mxu0 }
 0x259   : > { %v1718_v49 = vadd.f32 %v4002_v25, %v5145_v24  ;;  %v1709_v50 = vpop.f32.mrb[3].mxu0  ;;  %v1835_v52 = vmul.f32 0.35355338, %v1715_v48 }
 0x25a   : > { %v1710_v51 = vadd.f32 %v5145_v24, %v1709_v50  ;;  %v1833_v54 = vmul.f32 0.35355338, %v1707_v5 }
 0x25b   : > { %v1836_v29 = vmul.f32 0.35355338, %v1718_v49  ;;  %v5151_v53 = vpack.c.bf16 %v1718_v49, %v1715_v48 }
 0x25c   : > { %v1834_v55 = vmul.f32 0.35355338, %v1710_v51  ;;  %v5153_v56 = vpack.c.bf16 %v1710_v51, %v1707_v5 }
 0x25d   : > { %v5155_v30 = vpack.c.bf16 %v1836_v29, %v1835_v52  ;;  %1915 = vrot.lane.b32.xlu1 %v5151_v53, %s4404_s16 }
 0x25e   : > { %v4005_v57 = vpop.f32.mrb[4].mxu0  ;;  %1913 = vrot.lane.b32.xlu0 %v5153_v56, %s4404_s16  ;;  %v5161_v59 = vpack.c.bf16 %v1834_v55, %v1833_v54 }
 0x25f   : > { %v1731_v4 = vadd.f32 %v4005_v57, %v5145_v24  ;;  %v1722_v7 = vpop.f32.mrb[5].mxu0 }
 0x260   : > { %v1723_v8 = vadd.f32 %v5145_v24, %v1722_v7  ;;  %v4006_v9 = vpop.f32.mrb[6].mxu0  ;;  %3830 = vmatprep.mubr.msk.bf16.mxu1 %vm1945_vm2, %v5161_v59 }
 0x261   : > { %v1734_v58 = vadd.f32 %v4006_v9, %v5145_v24  ;;  %v1725_v44 = vpop.f32.mrb[7].mxu0  ;;  %v1839_v10 = vmul.f32 0.35355338, %v1731_v4 }
 0x262   : > { %v1726_v33 = vadd.f32 %v5145_v24, %v1725_v44  ;;  %v1837_v12 = vmul.f32 0.35355338, %v1723_v8 }
 0x263   : > { %v1840_v32 = vmul.f32 0.35355338, %v1734_v58  ;;  %v5169_v11 = vpack.c.bf16 %v1734_v58, %v1731_v4 }
 0x264   : > { %v1838_v45 = vmul.f32 0.35355338, %v1726_v33  ;;  %v5171_v62 = vpack.c.bf16 %v1726_v33, %v1723_v8 }
 0x265   : > { %v5173_v13 = vpack.c.bf16 %v1840_v32, %v1839_v10 }
 0x266   : > { %v5175_v14 = vpack.c.bf16 %v1838_v45, %v1837_v12  ;;  %v4009_v15 = vpop.f32.mrb[8].mxu0 }
 0x267   : > { %v1747_v20 = vadd.f32 %v4009_v15, %v5145_v24  ;;  %v1738_v17 = vpop.f32.mrb[9].mxu0 }
 0x268   : > { %v1739_v18 = vadd.f32 %v5145_v24, %v1738_v17  ;;  %v4010_v0 = vpop.f32.mrb[10].mxu0 }
 0x269   : > { %v1750_v2 = vadd.f32 %v4010_v0, %v5145_v24  ;;  %v1741_v19 = vpop.f32.mrb[11].mxu0  ;;  %v1843_v23 = vmul.f32 0.35355338, %v1747_v20 }
 0x26a   : > { %v1742_v63 = vadd.f32 %v5145_v24, %v1741_v19  ;;  %v1841_v1 = vmul.f32 0.35355338, %v1739_v18 }
 0x26b   : > { %v1844_v16 = vmul.f32 0.35355338, %v1750_v2  ;;  %v5181_v60 = vpack.c.bf16 %v1750_v2, %v1747_v20 }
 0x26c   : > { %v1842_v21 = vmul.f32 0.35355338, %v1742_v63  ;;  %v5183_v61 = vpack.c.bf16 %v1742_v63, %v1739_v18 }
 0x26d   : > { %v5185_v28 = vpack.c.bf16 %v1844_v16, %v1843_v23 }
 0x26e   : > { %v5187_v26 = vpack.c.bf16 %v1842_v21, %v1841_v1  ;;  %v4013_v31 = vpop.f32.mrb[12].mxu0 }
 0x26f   : > { %v1763_v27 = vadd.f32 %v4013_v31, %v5145_v24  ;;  %v1754_v34 = vpop.f32.mrb[13].mxu0 }
 0x270   : > { %v1755_v3 = vadd.f32 %v5145_v24, %v1754_v34  ;;  %v4014_v35 = vpop.f32.mrb[14].mxu0 }
 0x271   : > { %v1766_v36 = vadd.f32 %v4014_v35, %v5145_v24  ;;  %v1757_v37 = vpop.f32.mrb[15].mxu0  ;;  %v1847_v38 = vmul.f32 0.35355338, %v1763_v27 }
 0x272   : > { %v1758_v22 = vadd.f32 %v5145_v24, %v1757_v37  ;;  %v1845_v41 = vmul.f32 0.35355338, %v1755_v3 }
 0x273   : > { %v1848_v39 = vmul.f32 0.35355338, %v1766_v36  ;;  %v5193_v40 = vpack.c.bf16 %v1766_v36, %v1763_v27 }
 0x274   : > { %v1846_v42 = vmul.f32 0.35355338, %v1758_v22  ;;  %v5195_v43 = vpack.c.bf16 %v1758_v22, %v1755_v3 }
 0x275   : > { %v5197_v46 = vpack.c.bf16 %v1848_v39, %v1847_v38 }
 0x276   : > { %v5199_v47 = vpack.c.bf16 %v1846_v42, %v1845_v41  ;;  %v4017_v48 = vpop.f32.mrb[16].mxu0 }
 0x277   : > { %v1779_v6 = vadd.f32 %v4017_v48, %v5145_v24  ;;  %v1770_v5 = vpop.f32.mrb[17].mxu0 }
 0x278   : > { %v1771_v25 = vadd.f32 %v5145_v24, %v1770_v5  ;;  %v4018_v49 = vpop.f32.mrb[18].mxu0 }
 0x279   : > { %v1782_v50 = vadd.f32 %v4018_v49, %v5145_v24  ;;  %v1773_v51 = vpop.f32.mrb[19].mxu0  ;;  %v1851_v29 = vmul.f32 0.35355338, %v1779_v6 }
 0x27a   : > { %v1774_v52 = vadd.f32 %v5145_v24, %v1773_v51  ;;  %v1849_v57 = vmul.f32 0.35355338, %v1771_v25 }
 0x27b   : > { %v1852_v54 = vmul.f32 0.35355338, %v1782_v50  ;;  %v5205_v55 = vpack.c.bf16 %v1782_v50, %v1779_v6 }
 0x27c   : > { %v1850_v4 = vmul.f32 0.35355338, %v1774_v52  ;;  %v5207_v7 = vpack.c.bf16 %v1774_v52, %v1771_v25 }
 0x27d   : > { %v5209_v8 = vpack.c.bf16 %v1852_v54, %v1851_v29  ;;  %1931 = vrot.lane.b32.xlu1 %v5205_v55, %s4404_s16 }
 0x27e   : > { %v5213_v9 = vpack.c.bf16 %v1850_v4, %v1849_v57  ;;  %v4021_v58 = vpop.f32.mrb[20].mxu0  ;;  %1929 = vrot.lane.b32.xlu0 %v5207_v7, %s4404_s16 }
 0x27f   : > { %v1795_v44 = vadd.f32 %v4021_v58, %v5145_v24  ;;  %v1786_v33 = vpop.f32.mrb[21].mxu0 }
 0x280   : > { %v1787_v10 = vadd.f32 %v5145_v24, %v1786_v33  ;;  %v4022_v32 = vpop.f32.mrb[22].mxu0 }
 0x281   : > { %v1855_v12 = vmul.f32 0.35355338, %v1795_v44  ;;  %v1798_v45 = vadd.f32 %v4022_v32, %v5145_v24  ;;  %v1789_v15 = vpop.f32.mrb[23].mxu0 }
 0x282   : > { %v1853_v20 = vmul.f32 0.35355338, %v1787_v10  ;;  %v1790_v17 = vadd.f32 %v5145_v24, %v1789_v15  ;;  %1917 = vrot.lane.b32.xlu0 %v5171_v62, %s4404_s16 }
 0x283   : > { %v1856_v18 = vmul.f32 0.35355338, %v1798_v45  ;;  %v1892_v0 = vpack.c.bf16 %v1798_v45, %v1795_v44 }
 0x284   : > { %v1854_v2 = vmul.f32 0.35355338, %v1790_v17  ;;  %v1891_v19 = vpack.c.bf16 %v1790_v17, %v1787_v10 }
 0x285   : > { %v5223_v63 = vpack.c.bf16 %v1856_v18, %v1855_v12 }
 0x286   : > { %v5225_v23 = vpack.c.bf16 %v1854_v2, %v1853_v20  ;;  %v4025_v16 = vpop.f32.mrb[24].mxu0  ;;  %1933 = vrot.lane.b32.xlu1 %v1891_v19, %s4404_s16  ;;  %1919 = vrot.lane.b32.xlu0 %v5169_v11, %s4404_s16 }
 0x287   : > { %v1811_v1 = vadd.f32 %v4025_v16, %v5145_v24  ;;  %v1802_v21 = vpop.f32.mrb[25].mxu0 }
 0x288   : > { %v1803_v31 = vadd.f32 %v5145_v24, %v1802_v21  ;;  %v4026_v27 = vpop.f32.mrb[26].mxu0 }
 0x289   : > { %v1859_v34 = vmul.f32 0.35355338, %v1811_v1  ;;  %v1814_v3 = vadd.f32 %v4026_v27, %v5145_v24  ;;  %v1805_v35 = vpop.f32.mrb[27].mxu0 }
 0x28a   : > { %v1857_v36 = vmul.f32 0.35355338, %v1803_v31  ;;  %v1806_v37 = vadd.f32 %v5145_v24, %v1805_v35  ;;  %1935 = vrot.lane.b32.xlu1 %v1892_v0, %s4404_s16  ;;  %1921 = vrot.lane.b32.xlu0 %v5183_v61, %s4404_s16 }
 0x28b   : > { %v1860_v22 = vmul.f32 0.35355338, %v1814_v3  ;;  %v1894_v38 = vpack.c.bf16 %v1814_v3, %v1811_v1 }
 0x28c   : > { %v1858_v39 = vmul.f32 0.35355338, %v1806_v37  ;;  %v1893_v41 = vpack.c.bf16 %v1806_v37, %v1803_v31 }
 0x28d   : > { %v5237_v42 = vpack.c.bf16 %v1860_v22, %v1859_v34 }
 0x28e   : > { %v5239_v48 = vpack.c.bf16 %v1858_v39, %v1857_v36  ;;  %v4029_v6 = vpop.f32.mrb[28].mxu0  ;;  %1937 = vrot.lane.b32.xlu1 %v1893_v41, %s4404_s16  ;;  %1923 = vrot.lane.b32.xlu0 %v5181_v60, %s4404_s16 }
 0x28f   : > { %v1827_v5 = vadd.f32 %v4029_v6, %v5145_v24  ;;  %v1818_v25 = vpop.f32.mrb[29].mxu0 }
 0x290   : > { %v1819_v49 = vadd.f32 %v5145_v24, %v1818_v25  ;;  %v4030_v50 = vpop.f32.mrb[30].mxu0 }
 0x291   : > { %v1863_v51 = vmul.f32 0.35355338, %v1827_v5  ;;  %v1830_v52 = vadd.f32 %v4030_v50, %v5145_v24  ;;  %v1821_v29 = vpop.f32.mrb[31].mxu0 }
 0x292   : > { %v1861_v54 = vmul.f32 0.35355338, %v1819_v49  ;;  %v1822_v57 = vadd.f32 %v5145_v24, %v1821_v29  ;;  %1939 = vrot.lane.b32.xlu1 %v1894_v38, %s4404_s16  ;;  %1925 = vrot.lane.b32.xlu0 %v5195_v43, %s4404_s16 }
 0x293   : > { %v1864_v4 = vmul.f32 0.35355338, %v1830_v52  ;;  %v5251_v58 = vpack.c.bf16 %v1830_v52, %v1827_v5 }
 0x294   : > { %v1862_v44 = vmul.f32 0.35355338, %v1822_v57  ;;  %v1895_v33 = vpack.c.bf16 %v1822_v57, %v1819_v49 }
 0x295   : > { %v5253_v10 = vpack.c.bf16 %v1864_v4, %v1863_v51 }
 0x296   : > { %v5255_v32 = vpack.c.bf16 %v1862_v44, %v1861_v54  ;;  %1941 = vrot.lane.b32.xlu1 %v1895_v33, %s4404_s16  ;;  %1927 = vrot.lane.b32.xlu0 %v5193_v40, %s4404_s16 }
 0x29a   : > { %1943 = vrot.lane.b32.xlu1 %v5251_v58, %s4404_s16  ;;  %2778 = vrot.lane.b32.xlu0 %v5207_v7, %s4405_s21 }
 0x29e   : > { %2762 = vrot.lane.b32.xlu1 %v5153_v56, %s4405_s21  ;;  %2780 = vrot.lane.b32.xlu0 %v5205_v55, %s4405_s21 }
 0x2a2   : > { %2764 = vrot.lane.b32.xlu1 %v5151_v53, %s4405_s21  ;;  %2782 = vrot.lane.b32.xlu0 %v1891_v19, %s4405_s21 }
 0x2a6   : > { %2766 = vrot.lane.b32.xlu1 %v5171_v62, %s4405_s21  ;;  %2784 = vrot.lane.b32.xlu0 %v1892_v0, %s4405_s21 }
 0x2aa   : > { %2768 = vrot.lane.b32.xlu1 %v5169_v11, %s4405_s21  ;;  %2786 = vrot.lane.b32.xlu0 %v1893_v41, %s4405_s21 }
 0x2ae   : > { %2770 = vrot.lane.b32.xlu1 %v5183_v61, %s4405_s21  ;;  %2788 = vrot.lane.b32.xlu0 %v1894_v38, %s4405_s21 }
 0x2b2   : > { %2772 = vrot.lane.b32.xlu1 %v5181_v60, %s4405_s21  ;;  %2790 = vrot.lane.b32.xlu0 %v1895_v33, %s4405_s21 }
 0x2b6   : > { %2774 = vrot.lane.b32.xlu1 %v5195_v43, %s4405_s21 }
 0x2cf   : > { %v1916_v53 = vpop.permute.xlu1 %1915 }
 0x2d0   : > { %v1914_v24 = vpop.permute.xlu0 %1913  ;;  %v1998_v60 = vsel %vm1945_vm2, %v1916_v53, 0 }
 0x2d1   : > { %v1995_v11 = vsel %vm1945_vm2, %v1914_v24, 0 }
 0x2ef   : > { %v1932_v62 = vpop.permute.xlu1 %1931 }
 0x2f0   : > { %v1930_v56 = vpop.permute.xlu0 %1929 }
 0x2f1   : > { %4067 = vmatprep.subr.msk.bf16.mxu1 %vm1945_vm2, %v1930_v56 }
 0x2f2   : > { %3815 = vmatpush3.bf16.xpose.msra.mxu1 %v1995_v11 }
 0x2f3   : > { %4068 = vmatprep.subr.msk.bf16.mxu1 %vm1945_vm2, %v1932_v62 }
 0x2f4   : > { %v1918_v61 = vpop.permute.xlu0 %1917 }
 0x2f5   : > { %v2001_v20 = vsel %vm1945_vm2, %v1918_v61, 0 }
 0x2f8   : > { %v1934_v55 = vpop.permute.xlu1 %1933  ;;  %v1920_v7 = vpop.permute.xlu0 %1919 }
 0x2f9   : > { %v2004_v19 = vsel %vm1945_vm2, %v1920_v7, 0 }
 0x2fa   : > { %3817 = vmatpush3.bf16.xpose.msra.mxu1 %v1998_v60 }
 0x2fb   : > { %4069 = vmatprep.subr.msk.bf16.mxu1 %vm1945_vm2, %v1934_v55 }
 0x2fc   : > { %v1936_v43 = vpop.permute.xlu1 %1935  ;;  %v1922_v12 = vpop.permute.xlu0 %1921 }
 0x2fd   : > { %v2007_v27 = vsel %vm1945_vm2, %v1922_v12, 0 }
 0x300   : > { %v1938_v45 = vpop.permute.xlu1 %1937  ;;  %v1924_v15 = vpop.permute.xlu0 %1923 }
 0x301   : > { %v2010_v37 = vsel %vm1945_vm2, %v1924_v15, 0 }
 0x302   : > { %3819 = vmatpush3.bf16.xpose.msra.mxu1 %v2001_v20 }
 0x303   : > { %4070 = vmatprep.subr.msk.bf16.mxu1 %vm1945_vm2, %v1936_v43 }
 0x304   : > { %v1940_v17 = vpop.permute.xlu1 %1939  ;;  %v1926_v18 = vpop.permute.xlu0 %1925 }
 0x305   : > { %v2013_v6 = vsel %vm1945_vm2, %v1926_v18, 0 }
 0x308   : > { %v1942_v0 = vpop.permute.xlu1 %1941  ;;  %v1928_v2 = vpop.permute.xlu0 %1927 }
 0x309   : > { %v2016_v50 = vsel %vm1945_vm2, %v1928_v2, 0 }
 0x30a   : > { %3821 = vmatpush3.bf16.xpose.msra.mxu1 %v2004_v19 }
 0x30b   : > { %4071 = vmatprep.subr.msk.bf16.mxu1 %vm1945_vm2, %v1938_v45 }
 0x30c   : > { %v1944_v16 = vpop.permute.xlu1 %1943  ;;  %v2779_v1 = vpop.permute.xlu0 %2778 }
 0x30d   : > { %3862 = vmatprep.subr.bf16.mxu0 %v2779_v1 }
 0x310   : > { %v2763_v21 = vpop.permute.xlu1 %2762  ;;  %v2781_v31 = vpop.permute.xlu0 %2780 }
 0x311   : > { %3863 = vmatpush3.bf16.msra.mxu0 %v2763_v21 }
 0x312   : > { %3823 = vmatpush3.bf16.xpose.msra.mxu1 %v2007_v27  ;;  %3864 = vmatprep.subr.bf16.mxu0 %v2781_v31 }
 0x313   : > { %4072 = vmatprep.subr.msk.bf16.mxu1 %vm1945_vm2, %v1940_v17 }
 0x314   : > { %v2765_v34 = vpop.permute.xlu1 %2764  ;;  %v2783_v3 = vpop.permute.xlu0 %2782 }
 0x315   : > { %3865 = vmatpush3.bf16.msra.mxu0 %v2765_v34 }
 0x316   : > { %3866 = vmatprep.subr.bf16.mxu0 %v2783_v3 }
 0x318   : > { %v2767_v35 = vpop.permute.xlu1 %2766  ;;  %v2785_v36 = vpop.permute.xlu0 %2784 }
 0x319   : > { %3867 = vmatpush3.bf16.msra.mxu0 %v2767_v35 }
 0x31a   : > { %3825 = vmatpush3.bf16.xpose.msra.mxu1 %v2010_v37  ;;  %3868 = vmatprep.subr.bf16.mxu0 %v2785_v36 }
 0x31b   : > { %4073 = vmatprep.subr.msk.bf16.mxu1 %vm1945_vm2, %v1942_v0 }
 0x31c   : > { %v2769_v22 = vpop.permute.xlu1 %2768  ;;  %v2787_v38 = vpop.permute.xlu0 %2786 }
 0x31d   : > { %3869 = vmatpush3.bf16.msra.mxu0 %v2769_v22 }
 0x31e   : > { %3870 = vmatprep.subr.bf16.mxu0 %v2787_v38 }
 0x320   : > { %v2771_v39 = vpop.permute.xlu1 %2770  ;;  %v2789_v41 = vpop.permute.xlu0 %2788 }
 0x321   : > { %3871 = vmatpush3.bf16.msra.mxu0 %v2771_v39 }
 0x322   : > { %3827 = vmatpush3.bf16.xpose.msra.mxu1 %v2013_v6  ;;  %3872 = vmatprep.subr.bf16.mxu0 %v2789_v41 }
 0x323   : > { %4074 = vmatprep.subr.msk.bf16.mxu1 %vm1945_vm2, %v1944_v16 }
 0x324   : > { %v2773_v5 = vpop.permute.xlu1 %2772  ;;  %v2791_v25 = vpop.permute.xlu0 %2790 }
 0x325   : > { %3873 = vmatpush3.bf16.msra.mxu0 %v2773_v5 }
 0x326   : > { %3874 = vmatprep.subr.bf16.mxu0 %v2791_v25 }
 0x328   : > { %v2775_v49 = vpop.permute.xlu1 %2774 }
 0x329   : > { %3875 = vmatpush3.bf16.msra.mxu0 %v2775_v49 }
 0x32a   : > { %3829 = vmatpush3.bf16.xpose.msra.mxu1 %v2016_v50 }
 0x331   : > { %3831 = vmatmul.mubr.msk.bf16.vlgmr.msra.gmra.mrb[0].mxu1 %vm1945_vm2, %v5161_v59 }
 0x332   : > { %3832 = vmatprep.mubr.msk.bf16.mxu1 %vm1945_vm2, %v5155_v30 }
 0x339   : > { %3833 = vmatmul.mubr.msk.bf16.gmra.mrb[4].mxu1 %vm1945_vm2, %v5155_v30 }
 0x33a   : > { %3834 = vmatprep.mubr.msk.bf16.mxu1 %vm1945_vm2, %v5175_v14 }
 0x341   : > { %3835 = vmatmul.mubr.msk.bf16.gmra.mrb[8].mxu1 %vm1945_vm2, %v5175_v14 }
 0x342   : > { %3836 = vmatprep.mubr.msk.bf16.mxu1 %vm1945_vm2, %v5173_v13 }
 0x349   : > { %3837 = vmatmul.mubr.msk.bf16.gmra.mrb[12].mxu1 %vm1945_vm2, %v5173_v13 }
 0x34a   : > { %3838 = vmatprep.mubr.msk.bf16.mxu1 %vm1945_vm2, %v5187_v26 }
 0x351   : > { %3839 = vmatmul.mubr.msk.bf16.gmra.mrb[16].mxu1 %vm1945_vm2, %v5187_v26 }
 0x352   : > { %3840 = vmatprep.mubr.msk.bf16.mxu1 %vm1945_vm2, %v5185_v28 }
 0x359   : > { %3841 = vmatmul.mubr.msk.bf16.gmra.mrb[20].mxu1 %vm1945_vm2, %v5185_v28 }
 0x35a   : > { %3842 = vmatprep.mubr.msk.bf16.mxu1 %vm1945_vm2, %v5199_v47 }
 0x361   : > { %3843 = vmatmul.mubr.msk.bf16.gmra.mrb[24].mxu1 %vm1945_vm2, %v5199_v47 }
 0x362   : > { %3844 = vmatprep.mubr.msk.bf16.mxu1 %vm1945_vm2, %v5197_v46 }
 0x369   : > { %3845 = vmatmul.mubr.msk.bf16.gmra.mrb[28].mxu1 %vm1945_vm2, %v5197_v46 }
 0x36a   : > { %3846 = vmatprep.mubr.msk.bf16.mxu1 %vm1945_vm2, %v5213_v9 }
 0x371   : > { %3847 = vmatmul.mubr.msk.bf16.gmra.mrb[32].mxu1 %vm1945_vm2, %v5213_v9 }
 0x372   : > { %3848 = vmatprep.mubr.msk.bf16.mxu1 %vm1945_vm2, %v5209_v8 }
 0x379   : > { %3849 = vmatmul.mubr.msk.bf16.gmra.mrb[36].mxu1 %vm1945_vm2, %v5209_v8 }
 0x37a   : > { %3850 = vmatprep.mubr.msk.bf16.mxu1 %vm1945_vm2, %v5225_v23 }
 0x381   : > { %3851 = vmatmul.mubr.msk.bf16.gmra.mrb[40].mxu1 %vm1945_vm2, %v5225_v23 }
 0x382   : > { %3852 = vmatprep.mubr.msk.bf16.mxu1 %vm1945_vm2, %v5223_v63 }
 0x389   : > { %3853 = vmatmul.mubr.msk.bf16.gmra.mrb[44].mxu1 %vm1945_vm2, %v5223_v63 }
 0x38a   : > { %3854 = vmatprep.mubr.msk.bf16.mxu1 %vm1945_vm2, %v5239_v48 }
 0x391   : > { %3855 = vmatmul.mubr.msk.bf16.gmra.mrb[48].mxu1 %vm1945_vm2, %v5239_v48 }
 0x392   : > { %3856 = vmatprep.mubr.msk.bf16.mxu1 %vm1945_vm2, %v5237_v42 }
 0x399   : > { %3857 = vmatmul.mubr.msk.bf16.gmra.mrb[52].mxu1 %vm1945_vm2, %v5237_v42 }
 0x39a   : > { %3858 = vmatprep.mubr.msk.bf16.mxu1 %vm1945_vm2, %v5255_v32 }
 0x3a1   : > { %3859 = vmatmul.mubr.msk.bf16.gmra.mrb[56].mxu1 %vm1945_vm2, %v5255_v32 }
 0x3a2   : > { %3860 = vmatprep.mubr.msk.bf16.mxu1 %vm1945_vm2, %v5253_v10 }
 0x3a9   : > { %3861 = vmatmul.mubr.msk.bf16.gmra.mrb[60].mxu1 %vm1945_vm2, %v5253_v10 }
 0x404   : > { %v5363_v30 = vpop.f32.mrb[0].mxu1 }
 0x405   : > { %v5365_v59 = vpop.f32.mrb[1].mxu1 }
 0x406   : > { %v5367_v13 = vpop.f32.mrb[2].mxu1  ;;  %v2235_v14 = vmax.f32 %v5363_v30, %v5365_v59 }
 0x407   : > { %v5371_v28 = vpop.f32.mrb[3].mxu1 }
 0x408   : > { %2236 = vmax.xlane.f32.xlu0 %v2235_v14  ;;  %v2238_v26 = vmax.f32 %v5367_v13, %v5371_v28 }
 0x40a   : > { %2239 = vmax.xlane.f32.xlu1 %v2238_v26 }
 0x40c   : > { %v5375_v46 = vpop.f32.mrb[4].mxu1 }
 0x40d   : > { %v5377_v47 = vpop.f32.mrb[5].mxu1 }
 0x40e   : > { %v5379_v8 = vpop.f32.mrb[6].mxu1  ;;  %v2241_v9 = vmax.f32 %v5375_v46, %v5377_v47 }
 0x40f   : > { %v5383_v63 = vpop.f32.mrb[7].mxu1 }
 0x410   : > { %2242 = vmax.xlane.f32.xlu0 %v2241_v9  ;;  %v2244_v23 = vmax.f32 %v5379_v8, %v5383_v63 }
 0x412   : > { %2245 = vmax.xlane.f32.xlu1 %v2244_v23 }
 0x414   : > { %v5387_v42 = vpop.f32.mrb[8].mxu1 }
 0x415   : > { %v5389_v48 = vpop.f32.mrb[9].mxu1 }
 0x416   : > { %v5391_v51 = vpop.f32.mrb[10].mxu1  ;;  %v2247_v52 = vmax.f32 %v5387_v42, %v5389_v48 }
 0x417   : > { %v5395_v29 = vpop.f32.mrb[11].mxu1 }
 0x418   : > { %2248 = vmax.xlane.f32.xlu0 %v2247_v52  ;;  %v2250_v54 = vmax.f32 %v5391_v51, %v5395_v29 }
 0x41a   : > { %2251 = vmax.xlane.f32.xlu1 %v2250_v54 }
 0x41c   : > { %v5399_v57 = vpop.f32.mrb[12].mxu1 }
 0x41d   : > { %v5401_v4 = vpop.f32.mrb[13].mxu1 }
 0x41e   : > { %v5403_v44 = vpop.f32.mrb[14].mxu1  ;;  %v2253_v33 = vmax.f32 %v5399_v57, %v5401_v4 }
 0x41f   : > { %v5407_v10 = vpop.f32.mrb[15].mxu1 }
 0x420   : > { %2254 = vmax.xlane.f32.xlu0 %v2253_v33  ;;  %v2256_v32 = vmax.f32 %v5403_v44, %v5407_v10 }
 0x422   : > { %2257 = vmax.xlane.f32.xlu1 %v2256_v32 }
 0x424   : > { %v5411_v24 = vpop.f32.mrb[16].mxu1 }
 0x425   : > { %v5413_v53 = vpop.f32.mrb[17].mxu1 }
 0x426   : > { %v5415_v56 = vpop.f32.mrb[18].mxu1  ;;  %v2259_v11 = vmax.f32 %v5411_v24, %v5413_v53 }
 0x427   : > { %v5419_v62 = vpop.f32.mrb[19].mxu1 }
 0x428   : > { %v2262_v61 = vmax.f32 %v5415_v56, %v5419_v62 }
 0x42c   : > { %v5423_v55 = vpop.f32.mrb[20].mxu1 }
 0x42d   : > { %v5425_v7 = vpop.f32.mrb[21].mxu1 }
 0x42e   : > { %v5427_v60 = vpop.f32.mrb[22].mxu1  ;;  %v2265_v43 = vmax.f32 %v5423_v55, %v5425_v7 }
 0x42f   : > { %v5431_v12 = vpop.f32.mrb[23].mxu1 }
 0x430   : > { %v2268_v45 = vmax.f32 %v5427_v60, %v5431_v12 }
 0x433   : > { %2776 = vrot.lane.b32.xlu1 %v5193_v40, %s4405_s21 }
 0x434   : > { %v5437_v15 = vpop.f32.mrb[24].mxu1 }
 0x435   : > { %v5439_v20 = vpop.f32.mrb[25].mxu1 }
 0x436   : > { %2792 = vrot.lane.b32.xlu0 %v5251_v58, %s4405_s21  ;;  %v5443_v17 = vpop.f32.mrb[26].mxu1  ;;  %v2271_v18 = vmax.f32 %v5437_v15, %v5439_v20 }
 0x437   : > { %v5447_v0 = vpop.f32.mrb[27].mxu1 }
 0x438   : > { %v2274_v2 = vmax.f32 %v5443_v17, %v5447_v0 }
 0x43c   : > { %v5451_v19 = vpop.f32.mrb[28].mxu1 }
 0x43d   : > { %v5453_v40 = vpop.f32.mrb[29].mxu1 }
 0x43e   : > { %v5455_v16 = vpop.f32.mrb[30].mxu1  ;;  %v2277_v1 = vmax.f32 %v5451_v19, %v5453_v40 }
 0x43f   : > { %v5459_v58 = vpop.f32.mrb[31].mxu1 }
 0x440   : > { %v2280_v21 = vmax.f32 %v5455_v16, %v5459_v58 }
 0x444   : > { %v5463_v31 = vpop.f32.mrb[32].mxu1 }
 0x445   : > { %v5465_v27 = vpop.f32.mrb[33].mxu1 }
 0x446   : > { %v5467_v34 = vpop.f32.mrb[34].mxu1  ;;  %v2283_v3 = vmax.f32 %v5463_v31, %v5465_v27 }
 0x447   : > { %v5471_v35 = vpop.f32.mrb[35].mxu1 }
 0x448   : > { %v2286_v36 = vmax.f32 %v5467_v34, %v5471_v35 }
 0x44c   : > { %v5475_v37 = vpop.f32.mrb[36].mxu1 }
 0x44d   : > { %v5477_v22 = vpop.f32.mrb[37].mxu1 }
 0x44e   : > { %v5479_v38 = vpop.f32.mrb[38].mxu1  ;;  %v2289_v39 = vmax.f32 %v5475_v37, %v5477_v22 }
 0x44f   : > { %v5483_v41 = vpop.f32.mrb[39].mxu1 }
 0x450   : > { %v2292_v6 = vmax.f32 %v5479_v38, %v5483_v41 }
 0x454   : > { %v5487_v5 = vpop.f32.mrb[40].mxu1 }
 0x455   : > { %2260 = vmax.xlane.f32.xlu0 %v2259_v11  ;;  %v5489_v25 = vpop.f32.mrb[41].mxu1 }
 0x456   : > { %v5491_v49 = vpop.f32.mrb[42].mxu1  ;;  %v2295_v50 = vmax.f32 %v5487_v5, %v5489_v25 }
 0x457   : > { %2263 = vmax.xlane.f32.xlu1 %v2262_v61  ;;  %v5495_v14 = vpop.f32.mrb[43].mxu1 }
 0x458   : > { %v2298_v26 = vmax.f32 %v5491_v49, %v5495_v14 }
 0x459   : > { %2266 = vmax.xlane.f32.xlu0 %v2265_v43 }
 0x45b   : > { %2272 = vmax.xlane.f32.xlu1 %v2271_v18 }
 0x45c   : > { %v5499_v9 = vpop.f32.mrb[44].mxu1 }
 0x45d   : > { %2269 = vmax.xlane.f32.xlu0 %v2268_v45  ;;  %v5501_v23 = vpop.f32.mrb[45].mxu1 }
 0x45e   : > { %v5503_v52 = vpop.f32.mrb[46].mxu1  ;;  %v2301_v54 = vmax.f32 %v5499_v9, %v5501_v23 }
 0x45f   : > { %5992 = vst [vmem:[#allocation8_spill] sm:$0xff] %v5503_v52  ;;  %2278 = vmax.xlane.f32.xlu1 %v2277_v1  ;;  %v5507_v33 = vpop.f32.mrb[47].mxu1 }
 0x460   : > { %5993 = vst [vmem:[#allocation9_spill] sm:$0xff] %v5507_v33  ;;  %v2304_v32 = vmax.f32 %v5503_v52, %v5507_v33 }
 0x461   : > { %2275 = vmax.xlane.f32.xlu0 %v2274_v2 }
 0x463   : > { %2284 = vmax.xlane.f32.xlu1 %v2283_v3 }
 0x464   : > { %v5511_v11 = vpop.f32.mrb[48].mxu1 }
 0x465   : > { %2281 = vmax.xlane.f32.xlu0 %v2280_v21  ;;  %v5513_v61 = vpop.f32.mrb[49].mxu1 }
 0x466   : > { %v5515_v43 = vpop.f32.mrb[50].mxu1  ;;  %v2307_v45 = vmax.f32 %v5511_v11, %v5513_v61 }
 0x467   : > { %2290 = vmax.xlane.f32.xlu1 %v2289_v39  ;;  %v5519_v18 = vpop.f32.mrb[51].mxu1 }
 0x468   : > { %5994 = vst [vmem:[#allocation10_spill] sm:$0xff] %v5519_v18  ;;  %v2310_v1 = vmax.f32 %v5515_v43, %v5519_v18 }
 0x469   : > { %2287 = vmax.xlane.f32.xlu0 %v2286_v36 }
 0x46b   : > { %2296 = vmax.xlane.f32.xlu1 %v2295_v50 }
 0x46c   : > { %v5523_v2 = vpop.f32.mrb[52].mxu1 }
 0x46d   : > { %2293 = vmax.xlane.f32.xlu0 %v2292_v6  ;;  %v5525_v3 = vpop.f32.mrb[53].mxu1 }
 0x46e   : > { %v5527_v21 = vpop.f32.mrb[54].mxu1  ;;  %v2313_v33 = vmax.f32 %v5523_v2, %v5525_v3 }
 0x46f   : > { %5995 = vst [vmem:[#allocation11_spill] sm:$0xff] %v5527_v21  ;;  %2302 = vmax.xlane.f32.xlu1 %v2301_v54  ;;  %v5531_v52 = vpop.f32.mrb[55].mxu1 }
 0x470   : > { %5996 = vst [vmem:[#allocation12_spill] sm:$0xff] %v5531_v52  ;;  %v2316_v39 = vmax.f32 %v5527_v21, %v5531_v52 }
 0x471   : > { %2299 = vmax.xlane.f32.xlu0 %v2298_v26 }
 0x473   : > { %2308 = vmax.xlane.f32.xlu1 %v2307_v45 }
 0x474   : > { %v5535_v36 = vpop.f32.mrb[56].mxu1 }
 0x475   : > { %2305 = vmax.xlane.f32.xlu0 %v2304_v32  ;;  %v5537_v50 = vpop.f32.mrb[57].mxu1 }
 0x476   : > { %5997 = vst [vmem:[#allocation13_spill] sm:$0xff] %v5537_v50  ;;  %v5539_v6 = vpop.f32.mrb[58].mxu1  ;;  %v2319_v18 = vmax.f32 %v5535_v36, %v5537_v50 }
 0x477   : > { %5998 = vst [vmem:[#allocation14_spill] sm:$0xff] %v5539_v6  ;;  %2314 = vmax.xlane.f32.xlu1 %v2313_v33  ;;  %v5543_v54 = vpop.f32.mrb[59].mxu1 }
 0x478   : > { %5999 = vst [vmem:[#allocation15_spill] sm:$0xff] %v5543_v54  ;;  %v2322_v52 = vmax.f32 %v5539_v6, %v5543_v54 }
 0x479   : > { %2311 = vmax.xlane.f32.xlu0 %v2310_v1 }
 0x47b   : > { %2320 = vmax.xlane.f32.xlu1 %v2319_v18 }
 0x47c   : > { %v5547_v26 = vpop.f32.mrb[60].mxu1 }
 0x47d   : > { %2317 = vmax.xlane.f32.xlu0 %v2316_v39  ;;  %v5549_v32 = vpop.f32.mrb[61].mxu1 }
 0x47e   : > { %6000 = vst [vmem:[#allocation16_spill] sm:$0xff] %v5549_v32  ;;  %v5551_v45 = vpop.f32.mrb[62].mxu1  ;;  %v2325_v21 = vmax.f32 %v5547_v26, %v5549_v32 }
 0x47f   : > { %6001 = vst [vmem:[#allocation17_spill] sm:$0xff] %v5551_v45  ;;  %v5555_v33 = vpop.f32.mrb[63].mxu1 }
 0x480   : > { %6002 = vst [vmem:[#allocation18_spill] sm:$0xff] %v5555_v33  ;;  %2326 = vmax.xlane.f32.xlu1 %v2325_v21  ;;  %v2328_v50 = vmax.f32 %v5551_v45, %v5555_v33 }
 0x481   : > { %2323 = vmax.xlane.f32.xlu0 %v2322_v52 }
 0x485   : > { %2329 = vmax.xlane.f32.xlu0 %v2328_v50 }
 0x495   : > { %v2237_v18 = vpop.xlane.xlu0 %2236 }
 0x496   : > { %v2331_v1 = vsub.f32 %v5363_v30, %v2237_v18  ;;  %v2332_v39 = vsub.f32 %v5365_v59, %v2237_v18 }
 0x497   : > { %v2240_v54 = vpop.xlane.xlu1 %2239 }
 0x498   : > { %v2395_v6 = vmul.f32 1.442695, %v2331_v1  ;;  %v2397_v32 = vmul.f32 1.442695, %v2332_v39  ;;  %v2333_v21 = vsub.f32 %v5367_v13, %v2240_v54  ;;  %v2334_v33 = vsub.f32 %v5371_v28, %v2240_v54 }
 0x49a   : > { %4151 = vpow2.f32 %v2395_v6  ;;  %v2399_v52 = vmul.f32 1.442695, %v2333_v21  ;;  %v2401_v50 = vmul.f32 1.442695, %v2334_v33 }
 0x49b   : > { %4153 = vpow2.f32 %v2397_v32 }
 0x49c   : > { %4155 = vpow2.f32 %v2399_v52 }
 0x49d   : > { %4157 = vpow2.f32 %v2401_v50  ;;  %v2243_v45 = vpop.xlane.xlu0 %2242 }
 0x49e   : > { %v2335_v30 = vsub.f32 %v5375_v46, %v2243_v45  ;;  %v2336_v59 = vsub.f32 %v5377_v47, %v2243_v45 }
 0x49f   : > { %v2246_v18 = vpop.xlane.xlu1 %2245 }
 0x4a0   : > { %v2403_v1 = vmul.f32 1.442695, %v2335_v30  ;;  %v2405_v39 = vmul.f32 1.442695, %v2336_v59  ;;  %v2337_v13 = vsub.f32 %v5379_v8, %v2246_v18  ;;  %v2338_v28 = vsub.f32 %v5383_v63, %v2246_v18 }
 0x4a2   : > { %4159 = vpow2.f32 %v2403_v1  ;;  %v2407_v6 = vmul.f32 1.442695, %v2337_v13  ;;  %v2409_v54 = vmul.f32 1.442695, %v2338_v28 }
 0x4a3   : > { %4161 = vpow2.f32 %v2405_v39  ;;  %v2699_v39 = vld [vmem:[%s5578_s15 + $0x8] sm:$0xff] }
 0x4a4   : > { %v5570_v32 = vpop.eup %4151  ;;  %4163 = vpow2.f32 %v2407_v6 }
 0x4a5   : > { %v4154_v33 = vpop.eup %4153  ;;  %4165 = vpow2.f32 %v2409_v54  ;;  %v2249_v46 = vpop.xlane.xlu0 %2248 }
 0x4a6   : > { %v4156_v47 = vpop.eup %4155  ;;  %v2339_v45 = vsub.f32 %v5387_v42, %v2249_v46  ;;  %v2340_v21 = vsub.f32 %v5389_v48, %v2249_v46  ;;  %v2523_v8 = vadd.f32 %v4154_v33, %v5570_v32 }
 0x4a7   : > { %v4158_v52 = vpop.eup %4157  ;;  %v2651_v63 = vpack.c.bf16 %v4156_v47, %v5570_v32  ;;  %v2252_v50 = vpop.xlane.xlu1 %2251 }
 0x4a8   : > { %v2411_v30 = vmul.f32 1.442695, %v2339_v45  ;;  %v2413_v59 = vmul.f32 1.442695, %v2340_v21  ;;  %v2341_v18 = vsub.f32 %v5391_v51, %v2252_v50  ;;  %v2342_v1 = vsub.f32 %v5395_v29, %v2252_v50  ;;  %2524 = vadd.xlane.f32.xlu1 %v2523_v8 }
 0x4a9   : > { %v2526_v42 = vadd.f32 %v4158_v52, %v4156_v47  ;;  %v2652_v13 = vpack.c.bf16 %v4158_v52, %v4154_v33 }
 0x4aa   : > { %4167 = vpow2.f32 %v2411_v30  ;;  %v2415_v48 = vmul.f32 1.442695, %v2341_v18  ;;  %v2417_v28 = vmul.f32 1.442695, %v2342_v1 }
 0x4ab   : > { %4169 = vpow2.f32 %v2413_v59  ;;  %2527 = vadd.xlane.f32.xlu0 %v2526_v42  ;;  %v2731_v6 = vmul.bf16 %v2699_v39, %v2652_v13 }
 0x4ac   : > { %v4160_v54 = vpop.eup %4159  ;;  %4171 = vpow2.f32 %v2415_v48  ;;  %v2701_v48 = vld [vmem:[%s5578_s15 + $0x18] sm:$0xff] }
 0x4ad   : > { %v4162_v32 = vpop.eup %4161  ;;  %4173 = vpow2.f32 %v2417_v28  ;;  %2842 = vmatprep.mubr.bf16.mxu0 %v2731_v6  ;;  %v2255_v51 = vpop.xlane.xlu0 %2254 }
 0x4ae   : > { %v4164_v29 = vpop.eup %4163  ;;  %v2343_v46 = vsub.f32 %v5399_v57, %v2255_v51  ;;  %v2344_v45 = vsub.f32 %v5401_v4, %v2255_v51  ;;  %v2529_v21 = vadd.f32 %v4162_v32, %v4160_v54  ;;  %v2698_v4 = vld [vmem:[%s5578_s15] sm:$0xff] }
 0x4af   : > { %v4166_v33 = vpop.eup %4165  ;;  %v2258_v47 = vpop.xlane.xlu1 %2257  ;;  %v2653_v8 = vpack.c.bf16 %v4164_v29, %v4160_v54 }
 0x4b0   : > { %v2419_v52 = vmul.f32 1.442695, %v2343_v46  ;;  %v2421_v50 = vmul.f32 1.442695, %v2344_v45  ;;  %v2345_v30 = vsub.f32 %v5403_v44, %v2258_v47  ;;  %v2346_v59 = vsub.f32 %v5407_v10, %v2258_v47  ;;  %2530 = vadd.xlane.f32.xlu1 %v2529_v21  ;;  %v2700_v21 = vld [vmem:[%s5578_s15 + $0x10] sm:$0xff] }
 0x4b1   : > { %v2793_v18 = vpop.permute.xlu0 %2792  ;;  %v2532_v1 = vadd.f32 %v4166_v33, %v4164_v29  ;;  %v2654_v39 = vpack.c.bf16 %v4166_v33, %v4162_v32  ;;  %v2730_v10 = vmul.bf16 %v2698_v4, %v2651_v63  ;;  %v2703_v33 = vld [vmem:[%s5578_s15 + $0x28] sm:$0xff]  ;;  %v2705_v4 = vld [vmem:[%s5578_s15 + $0x38] sm:$0xff] }
 0x4b2   : > { %4175 = vpow2.f32 %v2419_v52  ;;  %v2423_v57 = vmul.f32 1.442695, %v2345_v30  ;;  %v2425_v42 = vmul.f32 1.442695, %v2346_v59  ;;  %3876 = vmatprep.subr.bf16.mxu0 %v2793_v18 }
 0x4b3   : > { %4177 = vpow2.f32 %v2421_v50  ;;  %2533 = vadd.xlane.f32.xlu0 %v2532_v1  ;;  %v2777_v13 = vpop.permute.xlu1 %2776  ;;  %v2733_v32 = vmul.bf16 %v2701_v48, %v2654_v39  ;;  %v2732_v50 = vmul.bf16 %v2700_v21, %v2653_v8 }
 0x4b4   : > { %v4168_v28 = vpop.eup %4167  ;;  %4179 = vpow2.f32 %v2423_v57  ;;  %3877 = vmatpush3.bf16.msra.mxu0 %v2777_v13 }
 0x4b5   : > { %v4170_v44 = vpop.eup %4169  ;;  %4181 = vpow2.f32 %v2425_v42  ;;  %v2702_v42 = vld [vmem:[%s5578_s15 + $0x20] sm:$0xff] }
 0x4b6   : > { %v4172_v6 = vpop.eup %4171  ;;  %v2535_v54 = vadd.f32 %v4170_v44, %v4168_v28 }
 0x4b7   : > { %v4174_v51 = vpop.eup %4173  ;;  %2843 = vmatmul.mubr.bf16.vlgmr.msra.gmra.mrb[32].mxu0 %v2730_v10  ;;  %v2655_v29 = vpack.c.bf16 %v4172_v6, %v4168_v28  ;;  %v2704_v28 = vld [vmem:[%s5578_s15 + $0x30] sm:$0xff] }
 0x4b8   : > { %2536 = vadd.xlane.f32.xlu1 %v2535_v54  ;;  %2850 = vmatprep.mubr.bf16.mxu0 %v2733_v32  ;;  %v2538_v46 = vadd.f32 %v4174_v51, %v4172_v6  ;;  %v2656_v45 = vpack.c.bf16 %v4174_v51, %v4170_v44 }
 0x4b9   : > { %v2734_v13 = vmul.bf16 %v2702_v42, %v2655_v29 }
 0x4ba   : > { %2539 = vadd.xlane.f32.xlu0 %v2538_v46  ;;  %v2735_v59 = vmul.bf16 %v2703_v33, %v2656_v45 }
 0x4bc   : > { %v4176_v47 = vpop.eup %4175 }
 0x4bd   : > { %v4178_v52 = vpop.eup %4177 }
 0x4be   : > { %v4180_v30 = vpop.eup %4179  ;;  %v2541_v63 = vadd.f32 %v4178_v52, %v4176_v47 }
 0x4bf   : > { %v4182_v18 = vpop.eup %4181  ;;  %2851 = vmatmul.mubr.bf16.gmra.mrb[36].mxu0 %v2732_v50  ;;  %v2657_v1 = vpack.c.bf16 %v4180_v30, %v4176_v47 }
 0x4c0   : > { %2542 = vadd.xlane.f32.xlu1 %v2541_v63  ;;  %2858 = vmatprep.mubr.bf16.mxu0 %v2735_v59  ;;  %v2544_v39 = vadd.f32 %v4182_v18, %v4180_v30  ;;  %v2658_v57 = vpack.c.bf16 %v4182_v18, %v4178_v52 }
 0x4c1   : > { %v2736_v8 = vmul.bf16 %v2704_v28, %v2657_v1 }
 0x4c2   : > { %2545 = vadd.xlane.f32.xlu0 %v2544_v39  ;;  %v2737_v48 = vmul.bf16 %v2705_v4, %v2658_v57 }
 0x4c7   : > { %2859 = vmatmul.mubr.bf16.gmra.mrb[40].mxu0 %v2734_v13 }
 0x4c8   : > { %2866 = vmatprep.mubr.bf16.mxu0 %v2737_v48 }
 0x4cf   : > { %2867 = vmatmul.mubr.bf16.gmra.mrb[44].mxu0 %v2736_v8 }
 0x4e2   : > { %v2261_v44 = vpop.xlane.xlu0 %2260 }
 0x4e3   : > { %v2347_v10 = vsub.f32 %v5411_v24, %v2261_v44  ;;  %v2348_v6 = vsub.f32 %v5413_v53, %v2261_v44 }
 0x4e4   : > { %v2264_v54 = vpop.xlane.xlu1 %2263 }
 0x4e5   : > { %v2427_v32 = vmul.f32 1.442695, %v2347_v10  ;;  %v2429_v51 = vmul.f32 1.442695, %v2348_v6  ;;  %v2349_v46 = vsub.f32 %v5415_v56, %v2264_v54  ;;  %v2350_v45 = vsub.f32 %v5419_v62, %v2264_v54 }
 0x4e6   : > { %v2267_v21 = vpop.xlane.xlu0 %2266 }
 0x4e7   : > { %4183 = vpow2.f32 %v2427_v32  ;;  %v2431_v29 = vmul.f32 1.442695, %v2349_v46  ;;  %v2433_v33 = vmul.f32 1.442695, %v2350_v45  ;;  %v2351_v47 = vsub.f32 %v5423_v55, %v2267_v21 }
 0x4e8   : > { %4185 = vpow2.f32 %v2429_v51  ;;  %v2352_v52 = vsub.f32 %v5425_v7, %v2267_v21  ;;  %v2273_v50 = vpop.xlane.xlu1 %2272 }
 0x4e9   : > { %4187 = vpow2.f32 %v2431_v29  ;;  %v2435_v24 = vmul.f32 1.442695, %v2351_v47  ;;  %v2355_v53 = vsub.f32 %v5437_v15, %v2273_v50  ;;  %v2356_v30 = vsub.f32 %v5439_v20, %v2273_v50  ;;  %v2707_v47 = vld [vmem:[%s5578_s15 + $0x48] sm:$0xff] }
 0x4ea   : > { %4189 = vpow2.f32 %v2433_v33  ;;  %v2437_v56 = vmul.f32 1.442695, %v2352_v52  ;;  %v2270_v63 = vpop.xlane.xlu0 %2269 }
 0x4eb   : > { %4191 = vpow2.f32 %v2435_v24  ;;  %v2443_v62 = vmul.f32 1.442695, %v2355_v53  ;;  %v2445_v59 = vmul.f32 1.442695, %v2356_v30  ;;  %v2353_v18 = vsub.f32 %v5427_v60, %v2270_v63 }
 0x4ec   : > { %4193 = vpow2.f32 %v2437_v56  ;;  %v2354_v55 = vsub.f32 %v5431_v12, %v2270_v63  ;;  %v2279_v1 = vpop.xlane.xlu1 %2278 }
 0x4ed   : > { %4195 = vpow2.f32 %v2443_v62  ;;  %v2439_v7 = vmul.f32 1.442695, %v2353_v18  ;;  %v2359_v39 = vsub.f32 %v5451_v19, %v2279_v1  ;;  %v2360_v15 = vsub.f32 %v5453_v40, %v2279_v1  ;;  %v2706_v62 = vld [vmem:[%s5578_s15 + $0x40] sm:$0xff] }
 0x4ee   : > { %4197 = vpow2.f32 %v2445_v59  ;;  %v2441_v20 = vmul.f32 1.442695, %v2354_v55  ;;  %v2276_v57 = vpop.xlane.xlu0 %2275 }
 0x4ef   : > { %4199 = vpow2.f32 %v2439_v7  ;;  %v2451_v42 = vmul.f32 1.442695, %v2359_v39  ;;  %v2453_v4 = vmul.f32 1.442695, %v2360_v15  ;;  %v2357_v13 = vsub.f32 %v5443_v17, %v2276_v57 }
 0x4f0   : > { %4201 = vpow2.f32 %v2441_v20  ;;  %v2358_v60 = vsub.f32 %v5447_v0, %v2276_v57  ;;  %v2285_v48 = vpop.xlane.xlu1 %2284 }
 0x4f1   : > { %v4184_v12 = vpop.eup %4183  ;;  %4203 = vpow2.f32 %v2451_v42  ;;  %v2447_v28 = vmul.f32 1.442695, %v2357_v13  ;;  %v2363_v8 = vsub.f32 %v5463_v31, %v2285_v48  ;;  %v2364_v19 = vsub.f32 %v5465_v27, %v2285_v48 }
 0x4f2   : > { %v4186_v40 = vpop.eup %4185  ;;  %4205 = vpow2.f32 %v2453_v4  ;;  %v2449_v44 = vmul.f32 1.442695, %v2358_v60  ;;  %v2282_v10 = vpop.xlane.xlu0 %2281 }
 0x4f3   : > { %v4188_v6 = vpop.eup %4187  ;;  %4207 = vpow2.f32 %v2447_v28  ;;  %v2459_v54 = vmul.f32 1.442695, %v2363_v8  ;;  %v2461_v17 = vmul.f32 1.442695, %v2364_v19  ;;  %v2361_v32 = vsub.f32 %v5455_v16, %v2282_v10 }
 0x4f4   : > { %v4190_v0 = vpop.eup %4189  ;;  %4209 = vpow2.f32 %v2449_v44  ;;  %v2362_v51 = vsub.f32 %v5459_v58, %v2282_v10  ;;  %v2291_v46 = vpop.xlane.xlu1 %2290  ;;  %v2547_v45 = vadd.f32 %v4186_v40, %v4184_v12  ;;  %v2659_v31 = vpack.c.bf16 %v4188_v6, %v4184_v12 }
 0x4f5   : > { %v5610_v21 = vpop.eup %4191  ;;  %4211 = vpow2.f32 %v2459_v54  ;;  %v2455_v27 = vmul.f32 1.442695, %v2361_v32  ;;  %v2367_v29 = vsub.f32 %v5475_v37, %v2291_v46  ;;  %v2368_v33 = vsub.f32 %v5477_v22, %v2291_v46 }
 0x4f6   : > { %v4194_v52 = vpop.eup %4193  ;;  %4213 = vpow2.f32 %v2461_v17  ;;  %v2457_v16 = vmul.f32 1.442695, %v2362_v51  ;;  %2548 = vadd.xlane.f32.xlu1 %v2547_v45  ;;  %v2288_v50 = vpop.xlane.xlu0 %2287  ;;  %v2550_v24 = vadd.f32 %v4190_v0, %v4188_v6  ;;  %v2660_v58 = vpack.c.bf16 %v4190_v0, %v4186_v40  ;;  %v2708_v45 = vld [vmem:[%s5578_s15 + $0x50] sm:$0xff] }
 0x4f7   : > { %v5615_v53 = vpop.eup %4195  ;;  %4215 = vpow2.f32 %v2455_v27  ;;  %v2467_v30 = vmul.f32 1.442695, %v2367_v29  ;;  %v2469_v56 = vmul.f32 1.442695, %v2368_v33  ;;  %v2365_v63 = vsub.f32 %v5467_v34, %v2288_v50 }
 0x4f8   : > { %v5619_v59 = vpop.eup %4197  ;;  %4217 = vpow2.f32 %v2457_v16  ;;  %v2366_v37 = vsub.f32 %v5471_v35, %v2288_v50  ;;  %2551 = vadd.xlane.f32.xlu0 %v2550_v24  ;;  %v2739_v22 = vmul.bf16 %v2707_v47, %v2660_v58  ;;  %v2297_v18 = vpop.xlane.xlu1 %2296  ;;  %v2553_v55 = vadd.f32 %v4194_v52, %v5610_v21  ;;  %v2711_v50 = vld [vmem:[%s5578_s15 + $0x68] sm:$0xff] }
 0x4f9   : > { %v5623_v1 = vpop.eup %4199  ;;  %4219 = vpow2.f32 %v2467_v30  ;;  %v2463_v7 = vmul.f32 1.442695, %v2365_v63  ;;  %v2371_v39 = vsub.f32 %v5487_v5, %v2297_v18  ;;  %v2372_v34 = vsub.f32 %v5489_v25, %v2297_v18  ;;  %v2709_v5 = vld [vmem:[%s5578_s15 + $0x58] sm:$0xff]  ;;  %v6004_v18 = vld [vmem:[#allocation9_spill] sm:$0xff] }
 0x4fa   : > { %v4202_v15 = vpop.eup %4201  ;;  %4221 = vpow2.f32 %v2469_v56  ;;  %v2465_v20 = vmul.f32 1.442695, %v2366_v37  ;;  %2874 = vmatprep.mubr.bf16.mxu0 %v2739_v22  ;;  %2554 = vadd.xlane.f32.xlu1 %v2553_v55  ;;  %v2738_v35 = vmul.bf16 %v2706_v62, %v2659_v31  ;;  %v2294_v57 = vpop.xlane.xlu0 %2293  ;;  %v2559_v42 = vadd.f32 %v5619_v59, %v5615_v53  ;;  %v6003_v37 = vld [vmem:[#allocation8_spill] sm:$0xff] }
 0x4fb   : > { %v5629_v4 = vpop.eup %4203  ;;  %4223 = vpow2.f32 %v2463_v7  ;;  %v2475_v13 = vmul.f32 1.442695, %v2371_v39  ;;  %v2477_v60 = vmul.f32 1.442695, %v2372_v34  ;;  %v2369_v48 = vsub.f32 %v5479_v38, %v2294_v57 }
 0x4fc   : > { %v5633_v12 = vpop.eup %4205  ;;  %4225 = vpow2.f32 %v2465_v20  ;;  %2875 = vmatmul.mubr.bf16.gmra.mrb[48].mxu0 %v2738_v35  ;;  %v2370_v25 = vsub.f32 %v5483_v41, %v2294_v57  ;;  %v2303_v28 = vpop.xlane.xlu1 %2302  ;;  %v2556_v8 = vadd.f32 %v4202_v15, %v5623_v1  ;;  %v2662_v19 = vpack.c.bf16 %v4202_v15, %v4194_v52 }
 0x4fd   : > { %v5637_v40 = vpop.eup %4207  ;;  %4227 = vpow2.f32 %v2475_v13  ;;  %v2471_v44 = vmul.f32 1.442695, %v2369_v48  ;;  %v2375_v10 = vsub.f32 %v5499_v9, %v2303_v28  ;;  %v2376_v38 = vsub.f32 %v5501_v23, %v2303_v28  ;;  %v6005_v28 = vld [vmem:[#allocation10_spill] sm:$0xff] }
 0x4fe   : > { %v4210_v6 = vpop.eup %4209  ;;  %4229 = vpow2.f32 %v2477_v60  ;;  %v2473_v54 = vmul.f32 1.442695, %v2370_v25  ;;  %2560 = vadd.xlane.f32.xlu1 %v2559_v42  ;;  %2557 = vadd.xlane.f32.xlu0 %v2556_v8  ;;  %v2741_v17 = vmul.bf16 %v2709_v5, %v2662_v19  ;;  %v2300_v41 = vpop.xlane.xlu0 %2299  ;;  %v2565_v32 = vadd.f32 %v5633_v12, %v5629_v4  ;;  %v2710_v5 = vld [vmem:[%s5578_s15 + $0x60] sm:$0xff] }
 0x4ff   : > { %v5643_v0 = vpop.eup %4211  ;;  %4231 = vpow2.f32 %v2471_v44  ;;  %v2483_v51 = vmul.f32 1.442695, %v2375_v10  ;;  %v2485_v46 = vmul.f32 1.442695, %v2376_v38  ;;  %v2373_v9 = vsub.f32 %v5491_v49, %v2300_v41 }
 0x500   : > { %v5647_v23 = vpop.eup %4213  ;;  %4233 = vpow2.f32 %v2473_v54  ;;  %2882 = vmatprep.mubr.bf16.mxu0 %v2741_v17  ;;  %v2374_v31 = vsub.f32 %v5495_v14, %v2300_v41  ;;  %v2309_v27 = vpop.xlane.xlu1 %2308  ;;  %v2562_v29 = vadd.f32 %v4210_v6, %v5637_v40  ;;  %v2661_v33 = vpack.c.bf16 %v5623_v1, %v5610_v21  ;;  %v6006_v54 = vld [vmem:[#allocation13_spill] sm:$0xff]  ;;  %v2713_v41 = vld [vmem:[%s5578_s15 + $0x78] sm:$0xff] }
 0x501   : > { %v5653_v47 = vpop.eup %4215  ;;  %4235 = vpow2.f32 %v2483_v51  ;;  %v2479_v52 = vmul.f32 1.442695, %v2373_v9  ;;  %v2379_v16 = vsub.f32 %v5511_v11, %v2309_v27  ;;  %v2380_v49 = vsub.f32 %v5513_v61, %v2309_v27  ;;  %v6007_v27 = vld [vmem:[#allocation11_spill] sm:$0xff] }
 0x502   : > { %v5658_v24 = vpop.eup %4217  ;;  %4237 = vpow2.f32 %v2485_v46  ;;  %v2481_v58 = vmul.f32 1.442695, %v2374_v31  ;;  %2566 = vadd.xlane.f32.xlu1 %v2565_v32  ;;  %2563 = vadd.xlane.f32.xlu0 %v2562_v29  ;;  %v2740_v14 = vmul.bf16 %v2708_v45, %v2661_v33  ;;  %v2664_v30 = vpack.c.bf16 %v4210_v6, %v5619_v59  ;;  %v2306_v56 = vpop.xlane.xlu0 %2305 }
 0x503   : > { %v5661_v21 = vpop.eup %4219  ;;  %4239 = vpow2.f32 %v2479_v52  ;;  %v2491_v63 = vmul.f32 1.442695, %v2379_v16  ;;  %v2493_v62 = vmul.f32 1.442695, %v2380_v49  ;;  %v2377_v11 = vsub.f32 %v6003_v37, %v2306_v56  ;;  %v6008_v52 = vld [vmem:[#allocation12_spill] sm:$0xff] }
 0x504   : > { %v5664_v22 = vpop.eup %4221  ;;  %4241 = vpow2.f32 %v2481_v58  ;;  %2883 = vmatmul.mubr.bf16.gmra.mrb[52].mxu0 %v2740_v14  ;;  %v2743_v61 = vmul.bf16 %v2711_v50, %v2664_v30  ;;  %v2378_v55 = vsub.f32 %v6004_v18, %v2306_v56  ;;  %v2315_v1 = vpop.xlane.xlu1 %2314  ;;  %v2571_v7 = vadd.f32 %v5647_v23, %v5643_v0  ;;  %v6010_v18 = vld [vmem:[#allocation14_spill] sm:$0xff] }
 0x505   : > { %v5669_v59 = vpop.eup %4223  ;;  %4243 = vpow2.f32 %v2491_v63  ;;  %v2487_v39 = vmul.f32 1.442695, %v2377_v11  ;;  %v2383_v34 = vsub.f32 %v5523_v2, %v2315_v1  ;;  %v2384_v15 = vsub.f32 %v5525_v3, %v2315_v1  ;;  %v6011_v1 = vld [vmem:[#allocation15_spill] sm:$0xff] }
 0x506   : > { %v5673_v20 = vpop.eup %4225  ;;  %4245 = vpow2.f32 %v2493_v62  ;;  %2890 = vmatprep.mubr.bf16.mxu0 %v2743_v61  ;;  %v2489_v35 = vmul.f32 1.442695, %v2378_v55  ;;  %2572 = vadd.xlane.f32.xlu1 %v2571_v7  ;;  %v2568_v57 = vadd.f32 %v5658_v24, %v5653_v47  ;;  %v2312_v42 = vpop.xlane.xlu0 %2311  ;;  %v2577_v13 = vadd.f32 %v5664_v22, %v5661_v21  ;;  %v6009_v62 = vld [vmem:[#allocation16_spill] sm:$0xff] }
 0x507   : > { %v5679_v60 = vpop.eup %4227  ;;  %4247 = vpow2.f32 %v2487_v39  ;;  %v2499_v48 = vmul.f32 1.442695, %v2383_v34  ;;  %v2501_v2 = vmul.f32 1.442695, %v2384_v15  ;;  %v2381_v3 = vsub.f32 %v5515_v43, %v2312_v42  ;;  %v2712_v34 = vld [vmem:[%s5578_s15 + $0x70] sm:$0xff] }
 0x508   : > { %v5683_v25 = vpop.eup %4229  ;;  %4249 = vpow2.f32 %v2489_v35  ;;  %2569 = vadd.xlane.f32.xlu0 %v2568_v57  ;;  %v2382_v8 = vsub.f32 %v6005_v28, %v2312_v42  ;;  %v2321_v19 = vpop.xlane.xlu1 %2320  ;;  %v2574_v44 = vadd.f32 %v5673_v20, %v5669_v59  ;;  %v2663_v10 = vpack.c.bf16 %v5637_v40, %v5615_v53  ;;  %v2715_v42 = vld [vmem:[%s5578_s15 + $0x88] sm:$0xff] }
 0x509   : > { %v5690_v38 = vpop.eup %4231  ;;  %4251 = vpow2.f32 %v2499_v48  ;;  %v2495_v6 = vmul.f32 1.442695, %v2381_v3  ;;  %v2387_v43 = vsub.f32 %v5535_v36, %v2321_v19  ;;  %v2388_v17 = vsub.f32 %v6006_v54, %v2321_v19 }
 0x50a   : > { %v5695_v32 = vpop.eup %4233  ;;  %4253 = vpow2.f32 %v2501_v2  ;;  %v2497_v51 = vmul.f32 1.442695, %v2382_v8  ;;  %2578 = vadd.xlane.f32.xlu1 %v2577_v13  ;;  %v2742_v46 = vmul.bf16 %v2710_v5, %v2663_v10  ;;  %v2666_v9 = vpack.c.bf16 %v5658_v24, %v5633_v12  ;;  %v2318_v45 = vpop.xlane.xlu0 %2317 }
 0x50b   : > { %v5699_v53 = vpop.eup %4235  ;;  %4255 = vpow2.f32 %v2495_v6  ;;  %v2507_v40 = vmul.f32 1.442695, %v2387_v43  ;;  %v2509_v31 = vmul.f32 1.442695, %v2388_v17  ;;  %v2385_v36 = vsub.f32 %v6007_v27, %v2318_v45  ;;  %v6013_v6 = vld [vmem:[#allocation18_spill] sm:$0xff]  ;;  %v2714_v27 = vld [vmem:[%s5578_s15 + $0x80] sm:$0xff] }
 0x50c   : > { %v5702_v29 = vpop.eup %4237  ;;  %4257 = vpow2.f32 %v2497_v51  ;;  %2575 = vadd.xlane.f32.xlu0 %v2574_v44  ;;  %2891 = vmatmul.mubr.bf16.gmra.mrb[56].mxu0 %v2742_v46  ;;  %v2745_v33 = vmul.bf16 %v2713_v41, %v2666_v9  ;;  %v2386_v16 = vsub.f32 %v6008_v52, %v2318_v45  ;;  %v2583_v49 = vadd.f32 %v5683_v25, %v5679_v60 }
 0x50d   : > { %v5707_v12 = vpop.eup %4239  ;;  %4259 = vpow2.f32 %v2507_v40  ;;  %v2503_v50 = vmul.f32 1.442695, %v2385_v36  ;;  %v2580_v24 = vadd.f32 %v5695_v32, %v5690_v38  ;;  %v2327_v58 = vpop.xlane.xlu1 %2326  ;;  %v2589_v14 = vadd.f32 %v5702_v29, %v5699_v53 }
 0x50e   : > { %v5713_v30 = vpop.eup %4241  ;;  %4261 = vpow2.f32 %v2509_v31  ;;  %2898 = vmatprep.mubr.bf16.mxu0 %v2745_v33  ;;  %v2505_v56 = vmul.f32 1.442695, %v2386_v16  ;;  %2584 = vadd.xlane.f32.xlu1 %v2583_v49  ;;  %v2391_v63 = vsub.f32 %v5547_v26, %v2327_v58  ;;  %v2392_v37 = vsub.f32 %v6009_v62, %v2327_v58  ;;  %v2324_v11 = vpop.xlane.xlu0 %2323 }
 0x50f   : > { %v5717_v61 = vpop.eup %4243  ;;  %4263 = vpow2.f32 %v2503_v50  ;;  %v2389_v55 = vsub.f32 %v6010_v18, %v2324_v11  ;;  %v2390_v7 = vsub.f32 %v6011_v1, %v2324_v11  ;;  %v2586_v39 = vadd.f32 %v5713_v30, %v5707_v12  ;;  %v2719_v18 = vld [vmem:[%s5578_s15 + $0xa8] sm:$0xff] }
 0x510   : > { %v5724_v15 = vpop.eup %4245  ;;  %4265 = vpow2.f32 %v2505_v56  ;;  %2581 = vadd.xlane.f32.xlu0 %v2580_v24  ;;  %v2515_v35 = vmul.f32 1.442695, %v2391_v63  ;;  %v2517_v26 = vmul.f32 1.442695, %v2392_v37  ;;  %v2665_v57 = vpack.c.bf16 %v5653_v47, %v5629_v4  ;;  %v2716_v37 = vld [vmem:[%s5578_s15 + $0x90] sm:$0xff] }
 0x511   : > { %v5729_v13 = vpop.eup %4247  ;;  %v2511_v48 = vmul.f32 1.442695, %v2389_v55  ;;  %v2513_v2 = vmul.f32 1.442695, %v2390_v7  ;;  %v2668_v3 = vpack.c.bf16 %v5673_v20, %v5647_v23  ;;  %v2595_v5 = vadd.f32 %v5724_v15, %v5717_v61  ;;  %v6012_v23 = vld [vmem:[#allocation17_spill] sm:$0xff] }
 0x512   : > { %v5735_v28 = vpop.eup %4249  ;;  %4267 = vpow2.f32 %v2515_v35  ;;  %2590 = vadd.xlane.f32.xlu1 %v2589_v14  ;;  %v2744_v8 = vmul.bf16 %v2712_v34, %v2665_v57  ;;  %v2330_v19 = vpop.xlane.xlu0 %2329  ;;  %v2667_v4 = vpack.c.bf16 %v5669_v59, %v5643_v0  ;;  %v2670_v47 = vpack.c.bf16 %v5695_v32, %v5664_v22  ;;  %v2718_v57 = vld [vmem:[%s5578_s15 + $0xa0] sm:$0xff] }
 0x513   : > { %v5741_v44 = vpop.eup %4251  ;;  %4269 = vpow2.f32 %v2517_v26  ;;  %v2747_v10 = vmul.bf16 %v2715_v42, %v2668_v3  ;;  %v2393_v20 = vsub.f32 %v6012_v23, %v2330_v19  ;;  %v2394_v43 = vsub.f32 %v6013_v6, %v2330_v19  ;;  %v2721_v42 = vld [vmem:[%s5578_s15 + $0xb8] sm:$0xff]  ;;  %v2723_v3 = vld [vmem:[%s5578_s15 + $0xc8] sm:$0xff]  ;;  %v2726_v6 = vld [vmem:[%s5578_s15 + $0xe0] sm:$0xff] }
 0x514   : > { %v5745_v54 = vpop.eup %4253  ;;  %4271 = vpow2.f32 %v2511_v48  ;;  %2587 = vadd.xlane.f32.xlu0 %v2586_v39  ;;  %2899 = vmatmul.mubr.bf16.gmra.mrb[60].mxu0 %v2744_v8  ;;  %v2592_v17 = vadd.f32 %v5735_v28, %v5729_v13  ;;  %v2669_v51 = vpack.c.bf16 %v5690_v38, %v5661_v21  ;;  %v2672_v46 = vpack.c.bf16 %v5713_v30, %v5683_v25  ;;  %v3051_v38 = vld [vmem:[%s4532_s17] sm:$0xf]  ;;  %v2725_v19 = vld [vmem:[%s5578_s15 + $0xd8] sm:$0xff] }
 0x515   : > { %v5749_v0 = vpop.eup %4255  ;;  %4273 = vpow2.f32 %v2513_v2  ;;  %2906 = vmatprep.mubr.bf16.mxu0 %v2747_v10  ;;  %v2519_v22 = vmul.f32 1.442695, %v2393_v20  ;;  %v2521_v59 = vmul.f32 1.442695, %v2394_v43  ;;  %v2601_v41 = vadd.f32 %v5745_v54, %v5741_v44  ;;  %4076 = vmatprep.subr.msk.bf16.mxu1 %vm3100_vm3, %v3051_v38  ;;  %v2720_v2 = vld [vmem:[%s5578_s15 + $0xb0] sm:$0xff]  ;;  %v2722_v8 = vld [vmem:[%s5578_s15 + $0xc0] sm:$0xff] }
 0x516   : > { %v5753_v32 = vpop.eup %4257  ;;  %2596 = vadd.xlane.f32.xlu1 %v2595_v5  ;;  %v2671_v9 = vpack.c.bf16 %v5707_v12, %v5679_v60  ;;  %v2674_v45 = vpack.c.bf16 %v5735_v28, %v5702_v29  ;;  %v2673_v36 = vpack.c.bf16 %v5729_v13, %v5699_v53  ;;  %v2717_v60 = vld [vmem:[%s5578_s15 + $0x98] sm:$0xff]  ;;  %v2746_v16 = vmul.bf16 %v2714_v27, %v2667_v4  ;;  %v2727_v10 = vld [vmem:[%s5578_s15 + $0xe8] sm:$0xff] }
 0x517   : > { %v5763_v40 = vpop.eup %4259  ;;  %4275 = vpow2.f32 %v2519_v22  ;;  %v2598_v31 = vadd.f32 %v5753_v32, %v5749_v0  ;;  %v2676_v21 = vpack.c.bf16 %v5753_v32, %v5724_v15  ;;  %v2675_v53 = vpack.c.bf16 %v5749_v0, %v5717_v61  ;;  %4075 = vmatprep.subr.msk.bf16.mxu0 %vm3100_vm3, %v3051_v38  ;;  %v2729_v43 = vld [vmem:[%s5578_s15 + $0xf8] sm:$0xff]  ;;  %v2728_v0 = vld [vmem:[%s5578_s15 + $0xf0] sm:$0xff] }
 0x518   : > { %v5772_v25 = vpop.eup %4261  ;;  %4277 = vpow2.f32 %v2521_v59  ;;  %2593 = vadd.xlane.f32.xlu0 %v2592_v17  ;;  %v2749_v12 = vmul.bf16 %v2717_v60, %v2670_v47  ;;  %v3102_v58 = vsel %vm3100_vm3, %v3051_v38, 0  ;;  %v2748_v39 = vmul.bf16 %v2716_v37, %v2669_v51 }
 0x519   : > { %v5776_v29 = vpop.eup %4263  ;;  %v2607_v33 = vadd.f32 %v5772_v25, %v5763_v40  ;;  %4066 = vmatpush3.bf16.msra.mxu1 %v3102_v58  ;;  %4032 = vmatpush3.bf16.msra.mxu0 %v3102_v58  ;;  %v2751_v15 = vmul.bf16 %v2719_v18, %v2672_v46  ;;  %v2750_v13 = vmul.bf16 %v2718_v57, %v2671_v9 }
 0x51a   : > { %v4266_v52 = vpop.eup %4265  ;;  %2602 = vadd.xlane.f32.xlu1 %v2601_v41  ;;  %v2677_v49 = vpack.c.bf16 %v5776_v29, %v5741_v44  ;;  %v2753_v48 = vmul.bf16 %v2721_v42, %v2674_v45  ;;  %v2752_v5 = vmul.bf16 %v2720_v2, %v2673_v36  ;;  %v2755_v28 = vmul.bf16 %v2723_v3, %v2676_v21  ;;  %v2724_v44 = vld [vmem:[%s5578_s15 + $0xd0] sm:$0xff] }
 0x51b   : > { %v2604_v50 = vadd.f32 %v4266_v52, %v5776_v29  ;;  %v2678_v24 = vpack.c.bf16 %v4266_v52, %v5745_v54  ;;  %v2754_v4 = vmul.bf16 %v2722_v8, %v2675_v53 }
 0x51c   : > { %v4268_v14 = vpop.eup %4267  ;;  %2599 = vadd.xlane.f32.xlu0 %v2598_v31  ;;  %2907 = vmatmul.mubr.bf16.gmra.mrb[64].mxu0 %v2746_v16  ;;  %v2756_v23 = vmul.bf16 %v2724_v44, %v2677_v49 }
 0x51d   : > { %v4270_v30 = vpop.eup %4269  ;;  %2914 = vmatprep.mubr.bf16.mxu0 %v2749_v12  ;;  %v2757_v47 = vmul.bf16 %v2725_v19, %v2678_v24 }
 0x51e   : > { %v4272_v56 = vpop.eup %4271  ;;  %2608 = vadd.xlane.f32.xlu1 %v2607_v33  ;;  %v2613_v63 = vadd.f32 %v4270_v30, %v4268_v14 }
 0x51f   : > { %v4274_v62 = vpop.eup %4273  ;;  %v2679_v11 = vpack.c.bf16 %v4272_v56, %v5763_v40 }
 0x520   : > { %2605 = vadd.xlane.f32.xlu0 %v2604_v50  ;;  %v2610_v61 = vadd.f32 %v4274_v62, %v4272_v56  ;;  %v2680_v55 = vpack.c.bf16 %v4274_v62, %v5772_v25 }
 0x521   : > { %v4276_v1 = vpop.eup %4275  ;;  %v2758_v54 = vmul.bf16 %v2726_v6, %v2679_v11 }
 0x522   : > { %v4278_v7 = vpop.eup %4277  ;;  %2614 = vadd.xlane.f32.xlu1 %v2613_v63  ;;  %v2681_v34 = vpack.c.bf16 %v4276_v1, %v4268_v14  ;;  %v2759_v20 = vmul.bf16 %v2727_v10, %v2680_v55 }
 0x523   : > { %v2616_v35 = vadd.f32 %v4278_v7, %v4276_v1  ;;  %v2682_v26 = vpack.c.bf16 %v4278_v7, %v4270_v30 }
 0x524   : > { %2611 = vadd.xlane.f32.xlu0 %v2610_v61  ;;  %2915 = vmatmul.mubr.bf16.gmra.mrb[68].mxu0 %v2748_v39  ;;  %v2760_v22 = vmul.bf16 %v2728_v0, %v2681_v34 }
 0x525   : > { %2922 = vmatprep.mubr.bf16.mxu0 %v2751_v15  ;;  %v2761_v17 = vmul.bf16 %v2729_v43, %v2682_v26 }
 0x528   : > { %2617 = vadd.xlane.f32.xlu0 %v2616_v35 }
 0x52c   : > { %2923 = vmatmul.mubr.bf16.gmra.mrb[72].mxu0 %v2750_v13 }
 0x52d   : > { %2930 = vmatprep.mubr.bf16.mxu0 %v2753_v48 }
 0x534   : > { %2931 = vmatmul.mubr.bf16.gmra.mrb[76].mxu0 %v2752_v5 }
 0x535   : > { %2938 = vmatprep.mubr.bf16.mxu0 %v2755_v28  ;;  %v2525_v59 = vpop.xlane.xlu1 %2524 }
 0x536   : > { %4279 = vrcp.f32 %v2525_v59 }
 0x538   : > { %v2528_v41 = vpop.xlane.xlu0 %2527 }
 0x539   : > { %4281 = vrcp.f32 %v2528_v41 }
 0x53c   : > { %2939 = vmatmul.mubr.bf16.gmra.mrb[80].mxu0 %v2754_v4 }
 0x53d   : > { %2946 = vmatprep.mubr.bf16.mxu0 %v2757_v47  ;;  %v2531_v32 = vpop.xlane.xlu1 %2530 }
 0x53e   : > { %4283 = vrcp.f32 %v2531_v32 }
 0x540   : > { %v2534_v51 = vpop.xlane.xlu0 %2533  ;;  %v4280_v27 = vpop.eup %4279 }
 0x541   : > { %4285 = vrcp.f32 %v2534_v51 }
 0x543   : > { %v4282_v21 = vpop.eup %4281 }
 0x544   : > { %2947 = vmatmul.mubr.bf16.gmra.mrb[84].mxu0 %v2756_v23 }
 0x545   : > { %2954 = vmatprep.mubr.bf16.mxu0 %v2759_v20  ;;  %v2537_v25 = vpop.xlane.xlu1 %2536 }
 0x546   : > { %4287 = vrcp.f32 %v2537_v25 }
 0x547   : > { %v2540_v29 = vpop.xlane.xlu0 %2539 }
 0x548   : > { %4289 = vrcp.f32 %v2540_v29  ;;  %v4284_v50 = vpop.eup %4283 }
 0x54b   : > { %v4286_v58 = vpop.eup %4285 }
 0x54c   : > { %2955 = vmatmul.mubr.bf16.gmra.mrb[88].mxu0 %v2758_v54 }
 0x54d   : > { %2962 = vmatprep.mubr.bf16.mxu0 %v2761_v17  ;;  %v2543_v56 = vpop.xlane.xlu1 %2542 }
 0x54e   : > { %4291 = vrcp.f32 %v2543_v56 }
 0x54f   : > { %v2546_v63 = vpop.xlane.xlu0 %2545 }
 0x550   : > { %4293 = vrcp.f32 %v2546_v63  ;;  %v4288_v1 = vpop.eup %4287 }
 0x552   : > { %v4290_v39 = vpop.eup %4289 }
 0x554   : > { %2963 = vmatmul.mubr.bf16.gmra.mrb[92].mxu0 %v2760_v22 }
 0x558   : > { %v4292_v2 = vpop.eup %4291 }
 0x55a   : > { %v4294_v5 = vpop.eup %4293 }
 0x583   : > { %v2549_v4 = vpop.xlane.xlu1 %2548 }
 0x584   : > { %4295 = vrcp.f32 %v2549_v4 }
 0x585   : > { %v2552_v47 = vpop.xlane.xlu0 %2551 }
 0x586   : > { %4297 = vrcp.f32 %v2552_v47 }
 0x587   : > { %v2555_v44 = vpop.xlane.xlu1 %2554 }
 0x588   : > { %4299 = vrcp.f32 %v2555_v44 }
 0x58a   : > { %v3878_v46 = vpop.f32.mrb[32].mxu0 }
 0x58b   : > { %v3879_v9 = vpop.f32.mrb[33].mxu0  ;;  %v2558_v10 = vpop.xlane.xlu0 %2557 }
 0x58c   : > { %v3880_v45 = vadd.f32 %v3879_v9, %v3878_v46  ;;  %v3881_v40 = vpop.f32.mrb[34].mxu0  ;;  %4301 = vrcp.f32 %v2558_v10  ;;  %v2561_v32 = vpop.xlane.xlu1 %2560 }
 0x58d   : > { %v3882_v31 = vpop.f32.mrb[35].mxu0  ;;  %4303 = vrcp.f32 %v2561_v32 }
 0x58e   : > { %v3883_v36 = vadd.f32 %v3882_v31, %v3881_v40  ;;  %v2971_v60 = vmul.f32 %v4280_v27, %v3880_v45  ;;  %v4296_v17 = vpop.eup %4295 }
 0x58f   : > { %v2564_v51 = vpop.xlane.xlu0 %2563 }
 0x590   : > { %v2972_v38 = vmul.f32 %v4282_v21, %v3883_v36  ;;  %v4298_v22 = vpop.eup %4297  ;;  %4305 = vrcp.f32 %v2564_v51  ;;  %v2567_v29 = vpop.xlane.xlu1 %2566 }
 0x591   : > { %4307 = vrcp.f32 %v2567_v29 }
 0x592   : > { %v3884_v33 = vpop.f32.mrb[36].mxu0  ;;  %v3003_v52 = vpack.c.bf16 %v2972_v38, %v2971_v60  ;;  %v4300_v36 = vpop.eup %4299 }
 0x593   : > { %v3885_v16 = vpop.f32.mrb[37].mxu0 }
 0x594   : > { %v3886_v53 = vadd.f32 %v3885_v16, %v3884_v33  ;;  %v3887_v49 = vpop.f32.mrb[38].mxu0  ;;  %4033 = vmatprep.mubr.msk.bf16.mxu0 %vm1945_vm2, %v3003_v52  ;;  %v2573_v63 = vpop.xlane.xlu1 %2572 }
 0x595   : > { %v3888_v12 = vpop.f32.mrb[39].mxu0  ;;  %v2570_v33 = vpop.xlane.xlu0 %2569 }
 0x596   : > { %v3889_v24 = vadd.f32 %v3888_v12, %v3887_v49  ;;  %v2973_v14 = vmul.f32 %v4284_v50, %v3886_v53  ;;  %v4302_v25 = vpop.eup %4301  ;;  %4309 = vrcp.f32 %v2570_v33 }
 0x597   : > { %4311 = vrcp.f32 %v2573_v63 }
 0x598   : > { %v2974_v30 = vmul.f32 %v4286_v58, %v3889_v24  ;;  %v4304_v24 = vpop.eup %4303 }
 0x59a   : > { %v3004_v62 = vpack.c.bf16 %v2974_v30, %v2973_v14  ;;  %v3890_v37 = vpop.f32.mrb[40].mxu0  ;;  %v4306_v14 = vpop.eup %4305 }
 0x59b   : > { %v3891_v11 = vpop.f32.mrb[41].mxu0 }
 0x59c   : > { %v3892_v61 = vadd.f32 %v3891_v11, %v3890_v37  ;;  %v3893_v18 = vpop.f32.mrb[42].mxu0  ;;  %4034 = vmatmul.mubr.msk.bf16.vlgmr.msra.gmra.mrb[96].mxu0 %vm1945_vm2, %v3004_v62  ;;  %v2576_v62 = vpop.xlane.xlu0 %2575 }
 0x59d   : > { %v3894_v55 = vpop.f32.mrb[43].mxu0  ;;  %4313 = vrcp.f32 %v2576_v62 }
 0x59e   : > { %v3895_v7 = vadd.f32 %v3894_v55, %v3893_v18  ;;  %v2975_v34 = vmul.f32 %v4288_v1, %v3892_v61 }
 0x5a0   : > { %v2976_v15 = vmul.f32 %v4290_v39, %v3895_v7  ;;  %v4308_v7 = vpop.eup %4307 }
 0x5a2   : > { %v3005_v35 = vpack.c.bf16 %v2976_v15, %v2975_v34  ;;  %v3896_v26 = vpop.f32.mrb[44].mxu0  ;;  %v4310_v34 = vpop.eup %4309 }
 0x5a3   : > { %v3897_v57 = vpop.f32.mrb[45].mxu0 }
 0x5a4   : > { %v3898_v42 = vadd.f32 %v3897_v57, %v3896_v26  ;;  %v3899_v13 = vpop.f32.mrb[46].mxu0  ;;  %4037 = vmatprep.mubr.msk.bf16.mxu0 %vm1945_vm2, %v3005_v35  ;;  %v2579_v26 = vpop.xlane.xlu1 %2578 }
 0x5a5   : > { %v3900_v48 = vpop.f32.mrb[47].mxu0  ;;  %v2582_v57 = vpop.xlane.xlu0 %2581  ;;  %4315 = vrcp.f32 %v2579_v26 }
 0x5a6   : > { %v3901_v3 = vadd.f32 %v3900_v48, %v3899_v13  ;;  %v2977_v28 = vmul.f32 %v4292_v2, %v3898_v42  ;;  %4317 = vrcp.f32 %v2582_v57 }
 0x5a8   : > { %v2978_v8 = vmul.f32 %v4294_v5, %v3901_v3  ;;  %v2585_v44 = vpop.xlane.xlu1 %2584 }
 0x5a9   : > { %v2588_v10 = vpop.xlane.xlu0 %2587  ;;  %4319 = vrcp.f32 %v2585_v44 }
 0x5aa   : > { %v3006_v19 = vpack.c.bf16 %v2978_v8, %v2977_v28  ;;  %v4312_v28 = vpop.eup %4311  ;;  %4321 = vrcp.f32 %v2588_v10 }
 0x5ac   : > { %4038 = vmatmul.mubr.msk.bf16.gmra.mrb[100].mxu0 %vm1945_vm2, %v3006_v19  ;;  %v4314_v19 = vpop.eup %4313  ;;  %v2591_v51 = vpop.xlane.xlu1 %2590 }
 0x5ad   : > { %4323 = vrcp.f32 %v2591_v51 }
 0x5b0   : > { %v2597_v33 = vpop.xlane.xlu1 %2596 }
 0x5b4   : > { %v2603_v62 = vpop.xlane.xlu1 %2602 }
 0x5b8   : > { %v2609_v57 = vpop.xlane.xlu1 %2608 }
 0x5bc   : > { %v2615_v10 = vpop.xlane.xlu1 %2614 }
 0x5cf   : > { %v3902_v23 = vpop.f32.mrb[48].mxu0 }
 0x5d0   : > { %v3903_v20 = vpop.f32.mrb[49].mxu0 }
 0x5d1   : > { %v3904_v6 = vadd.f32 %v3903_v20, %v3902_v23  ;;  %v3905_v43 = vpop.f32.mrb[50].mxu0 }
 0x5d2   : > { %v3906_v54 = vpop.f32.mrb[51].mxu0 }
 0x5d3   : > { %v3907_v0 = vadd.f32 %v3906_v54, %v3905_v43  ;;  %v2979_v59 = vmul.f32 %v4296_v17, %v3904_v6 }
 0x5d5   : > { %v2980_v41 = vmul.f32 %v4298_v22, %v3907_v0  ;;  %v4316_v0 = vpop.eup %4315 }
 0x5d7   : > { %v3007_v46 = vpack.c.bf16 %v2980_v41, %v2979_v59  ;;  %v3908_v9 = vpop.f32.mrb[52].mxu0  ;;  %v4318_v59 = vpop.eup %4317 }
 0x5d8   : > { %v3909_v45 = vpop.f32.mrb[53].mxu0 }
 0x5d9   : > { %v3910_v40 = vadd.f32 %v3909_v45, %v3908_v9  ;;  %v3911_v31 = vpop.f32.mrb[54].mxu0  ;;  %4041 = vmatprep.mubr.msk.bf16.mxu0 %vm1945_vm2, %v3007_v46  ;;  %v2594_v46 = vpop.xlane.xlu0 %2593 }
 0x5da   : > { %v3912_v27 = vpop.f32.mrb[55].mxu0  ;;  %4325 = vrcp.f32 %v2594_v46 }
 0x5db   : > { %v3913_v21 = vadd.f32 %v3912_v27, %v3911_v31  ;;  %v2981_v60 = vmul.f32 %v4300_v36, %v3910_v40  ;;  %4327 = vrcp.f32 %v2597_v33  ;;  %v3021_v33 = vld [vmem:[#allocation2 + $0x10] sm:$0xff] }
 0x5dd   : > { %v2982_v38 = vmul.f32 %v4302_v25, %v3913_v21  ;;  %v4320_v21 = vpop.eup %4319 }
 0x5df   : > { %v3008_v52 = vpack.c.bf16 %v2982_v38, %v2981_v60  ;;  %v3914_v16 = vpop.f32.mrb[56].mxu0  ;;  %v4322_v60 = vpop.eup %4321 }
 0x5e0   : > { %v3915_v53 = vpop.f32.mrb[57].mxu0 }
 0x5e1   : > { %v3916_v49 = vadd.f32 %v3915_v53, %v3914_v16  ;;  %v3917_v12 = vpop.f32.mrb[58].mxu0  ;;  %4042 = vmatmul.mubr.msk.bf16.gmra.mrb[104].mxu0 %vm1945_vm2, %v3008_v52  ;;  %v2600_v52 = vpop.xlane.xlu0 %2599 }
 0x5e2   : > { %v3918_v50 = vpop.f32.mrb[59].mxu0  ;;  %4329 = vrcp.f32 %v2600_v52  ;;  %v3019_v52 = vld [vmem:[#allocation2] sm:$0xff] }
 0x5e3   : > { %v3919_v58 = vadd.f32 %v3918_v50, %v3917_v12  ;;  %v2983_v30 = vmul.f32 %v4304_v24, %v3916_v49  ;;  %4331 = vrcp.f32 %v2603_v62  ;;  %v3023_v62 = vld [vmem:[#allocation2 + $0x20] sm:$0xff] }
 0x5e5   : > { %v2984_v56 = vmul.f32 %v4306_v14, %v3919_v58  ;;  %v4324_v58 = vpop.eup %4323 }
 0x5e7   : > { %v3009_v37 = vpack.c.bf16 %v2984_v56, %v2983_v30  ;;  %v3920_v11 = vpop.f32.mrb[60].mxu0  ;;  %v4326_v30 = vpop.eup %4325 }
 0x5e8   : > { %v3921_v61 = vpop.f32.mrb[61].mxu0 }
 0x5e9   : > { %v3922_v18 = vadd.f32 %v3921_v61, %v3920_v11  ;;  %v3923_v55 = vpop.f32.mrb[62].mxu0  ;;  %4045 = vmatprep.mubr.msk.bf16.mxu1 %vm1945_vm2, %v3009_v37  ;;  %v2606_v37 = vpop.xlane.xlu0 %2605 }
 0x5ea   : > { %v3924_v1 = vpop.f32.mrb[63].mxu0  ;;  %4333 = vrcp.f32 %v2606_v37 }
 0x5eb   : > { %v3925_v39 = vadd.f32 %v3924_v1, %v3923_v55  ;;  %v2985_v15 = vmul.f32 %v4308_v7, %v3922_v18  ;;  %4335 = vrcp.f32 %v2609_v57 }
 0x5ed   : > { %v2986_v35 = vmul.f32 %v4310_v34, %v3925_v39  ;;  %v4328_v39 = vpop.eup %4327 }
 0x5ef   : > { %v3010_v42 = vpack.c.bf16 %v2986_v35, %v2985_v15  ;;  %v3926_v13 = vpop.f32.mrb[64].mxu0  ;;  %v4330_v15 = vpop.eup %4329 }
 0x5f0   : > { %v3927_v48 = vpop.f32.mrb[65].mxu0 }
 0x5f1   : > { %v3928_v2 = vadd.f32 %v3927_v48, %v3926_v13  ;;  %v3929_v3 = vpop.f32.mrb[66].mxu0  ;;  %4046 = vmatmul.mubr.msk.bf16.vlgmr.msra.gmra.mrb[64].mxu1 %vm1945_vm2, %v3010_v42  ;;  %v2612_v42 = vpop.xlane.xlu0 %2611 }
 0x5f2   : > { %v3930_v5 = vpop.f32.mrb[67].mxu0  ;;  %4337 = vrcp.f32 %v2612_v42  ;;  %v3030_v42 = vld [vmem:[#allocation2 + $0x58] sm:$0xff] }
 0x5f3   : > { %v3931_v8 = vadd.f32 %v3930_v5, %v3929_v3  ;;  %v2987_v4 = vmul.f32 %v4312_v28, %v3928_v2  ;;  %4339 = vrcp.f32 %v2615_v10  ;;  %v3034_v10 = vld [vmem:[#allocation2 + $0x78] sm:$0xff] }
 0x5f5   : > { %v2988_v47 = vmul.f32 %v4314_v19, %v3931_v8  ;;  %v4332_v8 = vpop.eup %4331 }
 0x5f7   : > { %v3011_v23 = vpack.c.bf16 %v2988_v47, %v2987_v4  ;;  %v3932_v20 = vpop.f32.mrb[68].mxu0  ;;  %v4334_v4 = vpop.eup %4333 }
 0x5f8   : > { %v3933_v6 = vpop.f32.mrb[69].mxu0 }
 0x5f9   : > { %v3934_v43 = vadd.f32 %v3933_v6, %v3932_v20  ;;  %v3935_v54 = vpop.f32.mrb[70].mxu0  ;;  %4049 = vmatprep.mubr.msk.bf16.mxu1 %vm1945_vm2, %v3011_v23  ;;  %v2618_v23 = vpop.xlane.xlu0 %2617 }
 0x5fa   : > { %v3936_v17 = vpop.f32.mrb[71].mxu0  ;;  %4341 = vrcp.f32 %v2618_v23 }
 0x5fb   : > { %v3937_v22 = vadd.f32 %v3936_v17, %v3935_v54  ;;  %v2989_v41 = vmul.f32 %v4316_v0, %v3934_v43 }
 0x5fd   : > { %v2990_v32 = vmul.f32 %v4318_v59, %v3937_v22  ;;  %v4336_v22 = vpop.eup %4335 }
 0x5ff   : > { %v3012_v9 = vpack.c.bf16 %v2990_v32, %v2989_v41  ;;  %v3938_v45 = vpop.f32.mrb[72].mxu0  ;;  %v4338_v41 = vpop.eup %4337 }
 0x600   : > { %v3939_v40 = vpop.f32.mrb[73].mxu0 }
 0x601   : > { %v3940_v31 = vadd.f32 %v3939_v40, %v3938_v45  ;;  %v3941_v27 = vpop.f32.mrb[74].mxu0  ;;  %4050 = vmatmul.mubr.msk.bf16.gmra.mrb[68].mxu1 %vm1945_vm2, %v3012_v9 }
 0x602   : > { %v3942_v36 = vpop.f32.mrb[75].mxu0 }
 0x603   : > { %v3943_v25 = vadd.f32 %v3942_v36, %v3941_v27  ;;  %v2991_v38 = vmul.f32 %v4320_v21, %v3940_v31  ;;  %v4340_v36 = vpop.eup %4339 }
 0x605   : > { %v2992_v29 = vmul.f32 %v4322_v60, %v3943_v25  ;;  %v4342_v25 = vpop.eup %4341 }
 0x607   : > { %v3013_v16 = vpack.c.bf16 %v2992_v29, %v2991_v38  ;;  %v3944_v53 = vpop.f32.mrb[76].mxu0 }
 0x608   : > { %v3945_v49 = vpop.f32.mrb[77].mxu0 }
 0x609   : > { %v3946_v12 = vadd.f32 %v3945_v49, %v3944_v53  ;;  %v3947_v50 = vpop.f32.mrb[78].mxu0  ;;  %4053 = vmatprep.mubr.msk.bf16.mxu1 %vm1945_vm2, %v3013_v16  ;;  %v3022_v53 = vld [vmem:[#allocation2 + $0x18] sm:$0xff] }
 0x60a   : > { %v3948_v24 = vpop.f32.mrb[79].mxu0 }
 0x60b   : > { %v3949_v14 = vadd.f32 %v3948_v24, %v3947_v50  ;;  %v2993_v56 = vmul.f32 %v4324_v58, %v3946_v12  ;;  %v3020_v50 = vld [vmem:[#allocation2 + $0x8] sm:$0xff] }
 0x60d   : > { %v2994_v63 = vmul.f32 %v4326_v30, %v3949_v14 }
 0x60f   : > { %v3014_v11 = vpack.c.bf16 %v2994_v63, %v2993_v56  ;;  %v3950_v61 = vpop.f32.mrb[80].mxu0  ;;  %v3025_v63 = vld [vmem:[#allocation2 + $0x30] sm:$0xff] }
 0x610   : > { %v3951_v18 = vpop.f32.mrb[81].mxu0 }
 0x611   : > { %v3952_v55 = vadd.f32 %v3951_v18, %v3950_v61  ;;  %v3953_v1 = vpop.f32.mrb[82].mxu0  ;;  %4054 = vmatmul.mubr.msk.bf16.gmra.mrb[72].mxu1 %vm1945_vm2, %v3014_v11  ;;  %v3026_v11 = vld [vmem:[#allocation2 + $0x38] sm:$0xff] }
 0x612   : > { %v3954_v7 = vpop.f32.mrb[83].mxu0 }
 0x613   : > { %v3955_v34 = vadd.f32 %v3954_v7, %v3953_v1  ;;  %v2995_v35 = vmul.f32 %v4328_v39, %v3952_v55  ;;  %v3024_v55 = vld [vmem:[#allocation2 + $0x28] sm:$0xff] }
 0x615   : > { %v2996_v26 = vmul.f32 %v4330_v15, %v3955_v34 }
 0x617   : > { %v3015_v13 = vpack.c.bf16 %v2996_v26, %v2995_v35  ;;  %v3956_v48 = vpop.f32.mrb[84].mxu0  ;;  %v3029_v35 = vld [vmem:[#allocation2 + $0x50] sm:$0xff]  ;;  %v3027_v26 = vld [vmem:[#allocation2 + $0x40] sm:$0xff] }
 0x618   : > { %v3957_v2 = vpop.f32.mrb[85].mxu0 }
 0x619   : > { %v3958_v3 = vadd.f32 %v3957_v2, %v3956_v48  ;;  %v3959_v5 = vpop.f32.mrb[86].mxu0  ;;  %4057 = vmatprep.mubr.msk.bf16.mxu1 %vm1945_vm2, %v3015_v13  ;;  %v3028_v2 = vld [vmem:[#allocation2 + $0x48] sm:$0xff] }
 0x61a   : > { %v3960_v28 = vpop.f32.mrb[87].mxu0 }
 0x61b   : > { %v3961_v19 = vadd.f32 %v3960_v28, %v3959_v5  ;;  %v2997_v47 = vmul.f32 %v4332_v8, %v3958_v3 }
 0x61d   : > { %v2998_v44 = vmul.f32 %v4334_v4, %v3961_v19  ;;  %v3033_v4 = vld [vmem:[#allocation2 + $0x70] sm:$0xff] }
 0x61f   : > { %v3016_v20 = vpack.c.bf16 %v2998_v44, %v2997_v47  ;;  %v3962_v6 = vpop.f32.mrb[88].mxu0  ;;  %v3031_v47 = vld [vmem:[#allocation2 + $0x60] sm:$0xff] }
 0x620   : > { %v3963_v43 = vpop.f32.mrb[89].mxu0 }
 0x621   : > { %v3964_v54 = vadd.f32 %v3963_v43, %v3962_v6  ;;  %v3965_v17 = vpop.f32.mrb[90].mxu0  ;;  %4058 = vmatmul.mubr.msk.bf16.gmra.mrb[76].mxu1 %vm1945_vm2, %v3016_v20  ;;  %v3032_v6 = vld [vmem:[#allocation2 + $0x68] sm:$0xff] }
 0x622   : > { %v3966_v0 = vpop.f32.mrb[91].mxu0 }
 0x623   : > { %v3967_v59 = vadd.f32 %v3966_v0, %v3965_v17  ;;  %v2999_v32 = vmul.f32 %v4336_v22, %v3964_v54 }
 0x625   : > { %v3000_v51 = vmul.f32 %v4338_v41, %v3967_v59  ;;  %v3037_v59 = vld [vmem:[#allocation2 + $0x90] sm:$0xff]  ;;  %v3035_v41 = vld [vmem:[#allocation2 + $0x80] sm:$0xff] }
 0x627   : > { %v3017_v46 = vpack.c.bf16 %v3000_v51, %v2999_v32  ;;  %v3968_v9 = vpop.f32.mrb[92].mxu0  ;;  %v3038_v51 = vld [vmem:[#allocation2 + $0x98] sm:$0xff] }
 0x628   : > { %v3969_v45 = vpop.f32.mrb[93].mxu0 }
 0x629   : > { %v3970_v40 = vadd.f32 %v3969_v45, %v3968_v9  ;;  %v3971_v31 = vpop.f32.mrb[94].mxu0  ;;  %4061 = vmatprep.mubr.msk.bf16.mxu1 %vm1945_vm2, %v3017_v46  ;;  %v3036_v45 = vld [vmem:[#allocation2 + $0x88] sm:$0xff] }
 0x62a   : > { %v3972_v27 = vpop.f32.mrb[95].mxu0 }
 0x62b   : > { %v3973_v21 = vadd.f32 %v3972_v27, %v3971_v31  ;;  %v3001_v60 = vmul.f32 %v4340_v36, %v3970_v40 }
 0x62d   : > { %v3002_v38 = vmul.f32 %v4342_v25, %v3973_v21  ;;  %v3041_v25 = vld [vmem:[#allocation2 + $0xb0] sm:$0xff] }
 0x62f   : > { %v3018_v29 = vpack.c.bf16 %v3002_v38, %v3001_v60  ;;  %v3039_v60 = vld [vmem:[#allocation2 + $0xa0] sm:$0xff] }
 0x631   : > { %4062 = vmatmul.mubr.msk.bf16.gmra.mrb[80].mxu1 %vm1945_vm2, %v3018_v29  ;;  %v3042_v29 = vld [vmem:[#allocation2 + $0xb8] sm:$0xff] }
 0x66f   : > { %v4035_v16 = vpop.f32.mrb[96].mxu0 }
 0x670   : > { %v3267_v49 = vadd.f32 %v4035_v16, %v3021_v33  ;;  %v3138_v12 = vpop.f32.mrb[97].mxu0  ;;  %v3040_v16 = vld [vmem:[#allocation2 + $0xa8] sm:$0xff] }
 0x671   : > { %v3265_v24 = vadd.f32 %v3138_v12, %v3019_v52  ;;  %v4036_v58 = vpop.f32.mrb[98].mxu0 }
 0x672   : > { %3299 = vst.msk [vmem:[#allocation2 + $0x10] sm:$0xff] %vm1623_vm1, %v3267_v49  ;;  %v3268_v14 = vadd.f32 %v4036_v58, %v3022_v53  ;;  %v3141_v30 = vpop.f32.mrb[99].mxu0  ;;  %v3045_v58 = vld [vmem:[#allocation2 + $0xd0] sm:$0xff] }
 0x673   : > { %3297 = vst.msk [vmem:[#allocation2] sm:$0xff] %vm1623_vm1, %v3265_v24  ;;  %v3266_v56 = vadd.f32 %v3141_v30, %v3020_v50 }
 0x674   : > { %3300 = vst.msk [vmem:[#allocation2 + $0x18] sm:$0xff] %vm1623_vm1, %v3268_v14  ;;  %v3043_v14 = vld [vmem:[#allocation2 + $0xc0] sm:$0xff] }
 0x675   : > { %3298 = vst.msk [vmem:[#allocation2 + $0x8] sm:$0xff] %vm1623_vm1, %v3266_v56  ;;  %v3046_v56 = vld [vmem:[#allocation2 + $0xd8] sm:$0xff] }
 0x67f   : > { %v4039_v37 = vpop.f32.mrb[100].mxu0 }
 0x680   : > { %v3271_v61 = vadd.f32 %v4039_v37, %v3025_v63  ;;  %v3154_v18 = vpop.f32.mrb[101].mxu0  ;;  %v3044_v37 = vld [vmem:[#allocation2 + $0xc8] sm:$0xff] }
 0x681   : > { %v3269_v1 = vadd.f32 %v3154_v18, %v3023_v62  ;;  %v4040_v7 = vpop.f32.mrb[102].mxu0 }
 0x682   : > { %3303 = vst.msk [vmem:[#allocation2 + $0x30] sm:$0xff] %vm1623_vm1, %v3271_v61  ;;  %v3272_v39 = vadd.f32 %v4040_v7, %v3026_v11  ;;  %v3157_v34 = vpop.f32.mrb[103].mxu0  ;;  %v3049_v7 = vld [vmem:[#allocation2 + $0xf0] sm:$0xff] }
 0x683   : > { %3301 = vst.msk [vmem:[#allocation2 + $0x20] sm:$0xff] %vm1623_vm1, %v3269_v1  ;;  %v3270_v15 = vadd.f32 %v3157_v34, %v3024_v55 }
 0x684   : > { %3304 = vst.msk [vmem:[#allocation2 + $0x38] sm:$0xff] %vm1623_vm1, %v3272_v39  ;;  %v3047_v39 = vld [vmem:[#allocation2 + $0xe0] sm:$0xff] }
 0x685   : > { %3302 = vst.msk [vmem:[#allocation2 + $0x28] sm:$0xff] %vm1623_vm1, %v3270_v15  ;;  %v3050_v15 = vld [vmem:[#allocation2 + $0xf8] sm:$0xff] }
 0x6b4   : > { %v4043_v57 = vpop.f32.mrb[104].mxu0 }
 0x6b5   : > { %v3275_v13 = vadd.f32 %v4043_v57, %v3029_v35  ;;  %v3170_v48 = vpop.f32.mrb[105].mxu0  ;;  %v3048_v57 = vld [vmem:[#allocation2 + $0xe8] sm:$0xff] }
 0x6b6   : > { %v3273_v3 = vadd.f32 %v3170_v48, %v3027_v26  ;;  %v4044_v5 = vpop.f32.mrb[106].mxu0 }
 0x6b7   : > { %3307 = vst.msk [vmem:[#allocation2 + $0x50] sm:$0xff] %vm1623_vm1, %v3275_v13  ;;  %v3276_v28 = vadd.f32 %v4044_v5, %v3030_v42  ;;  %v3173_v8 = vpop.f32.mrb[107].mxu0  ;;  %v3333_v5 = vld [vmem:[#allocation2] sm:$0xff] (!%p3785_p7) }
 0x6b8   : > { %3305 = vst.msk [vmem:[#allocation2 + $0x40] sm:$0xff] %vm1623_vm1, %v3273_v3  ;;  %v3274_v19 = vadd.f32 %v3173_v8, %v3028_v2  ;;  %v3334_v8 = vld [vmem:[#allocation2 + $0x8] sm:$0xff] (!%p3785_p7) }
 0x6b9   : > { %3308 = vst.msk [vmem:[#allocation2 + $0x58] sm:$0xff] %vm1623_vm1, %v3276_v28  ;;  %v5853_v28 = vld [vmem:[%s5970_s4] ss:$0 sm:$0xff] (!%p3785_p7) }
 0x6ba   : > { %3306 = vst.msk [vmem:[#allocation2 + $0x48] sm:$0xff] %vm1623_vm1, %v3274_v19  ;;  %v3372_v19 = vadd.f32 (!%p3785_p7), %v5853_v28, %v3333_v5 }
 0x6bc   : > { %3404 = vst.msk [vmem:[%s4537_s22] sm:$0xff] (!%p3785_p7), %vm1623_vm1, %v3372_v19 }
 0x6c4   : > { %v4047_v44 = vpop.f32.mrb[64].mxu1 }
 0x6c5   : > { %v3279_v23 = vadd.f32 %v4047_v44, %v3033_v4  ;;  %v3186_v20 = vpop.f32.mrb[65].mxu1  ;;  %v3373_v4 = vadd.f32 (!%p3785_p7), %v5853_v28, %v3334_v8  ;;  %v3336_v44 = vld [vmem:[#allocation2 + $0x18] sm:$0xff] (!%p3785_p7) }
 0x6c6   : > { %v3277_v43 = vadd.f32 %v3186_v20, %v3031_v47  ;;  %v4048_v54 = vpop.f32.mrb[66].mxu1  ;;  %v3335_v47 = vld [vmem:[#allocation2 + $0x10] sm:$0xff] (!%p3785_p7)  ;;  %v3375_v20 = vadd.f32 (!%p3785_p7), %v5853_v28, %v3336_v44 }
 0x6c7   : > { %3311 = vst.msk [vmem:[#allocation2 + $0x70] sm:$0xff] %vm1623_vm1, %v3279_v23  ;;  %v3280_v17 = vadd.f32 %v4048_v54, %v3034_v10  ;;  %v3189_v0 = vpop.f32.mrb[67].mxu1  ;;  %v3337_v10 = vld [vmem:[#allocation2 + $0x20] sm:$0xff] (!%p3785_p7)  ;;  %v3374_v23 = vadd.f32 (!%p3785_p7), %v5853_v28, %v3335_v47  ;;  %v3339_v54 = vld [vmem:[#allocation2 + $0x30] sm:$0xff] (!%p3785_p7)  ;;  %3405 = vst.msk [vmem:[%s4537_s22 + $0x8] sm:$0xff] (!%p3785_p7), %vm1623_vm1, %v3373_v4 }
 0x6c8   : > { %3309 = vst.msk [vmem:[#allocation2 + $0x60] sm:$0xff] %vm1623_vm1, %v3277_v43  ;;  %v3278_v22 = vadd.f32 %v3189_v0, %v3032_v6  ;;  %v3376_v6 = vadd.f32 (!%p3785_p7), %v5853_v28, %v3337_v10  ;;  %v3338_v43 = vld [vmem:[#allocation2 + $0x28] sm:$0xff] (!%p3785_p7)  ;;  %3407 = vst.msk [vmem:[%s4537_s22 + $0x18] sm:$0xff] (!%p3785_p7), %vm1623_vm1, %v3375_v20 }
 0x6c9   : > { %3312 = vst.msk [vmem:[#allocation2 + $0x78] sm:$0xff] %vm1623_vm1, %v3280_v17  ;;  %v3340_v17 = vld [vmem:[#allocation2 + $0x38] sm:$0xff] (!%p3785_p7)  ;;  %v3377_v0 = vadd.f32 (!%p3785_p7), %v5853_v28, %v3338_v43  ;;  %3406 = vst.msk [vmem:[%s4537_s22 + $0x10] sm:$0xff] (!%p3785_p7), %vm1623_vm1, %v3374_v23 }
 0x6ca   : > { %3310 = vst.msk [vmem:[#allocation2 + $0x68] sm:$0xff] %vm1623_vm1, %v3278_v22  ;;  %v3378_v22 = vadd.f32 (!%p3785_p7), %v5853_v28, %v3339_v54  ;;  %3408 = vst.msk [vmem:[%s4537_s22 + $0x20] sm:$0xff] (!%p3785_p7), %vm1623_vm1, %v3376_v6 }
 0x6cb   : > { %3409 = vst.msk [vmem:[%s4537_s22 + $0x28] sm:$0xff] (!%p3785_p7), %vm1623_vm1, %v3377_v0 }
 0x6cc   : > { %3410 = vst.msk [vmem:[%s4537_s22 + $0x30] sm:$0xff] (!%p3785_p7), %vm1623_vm1, %v3378_v22 }
 0x6d4   : > { %v4051_v32 = vpop.f32.mrb[68].mxu1 }
 0x6d5   : > { %v3283_v46 = vadd.f32 %v4051_v32, %v3037_v59  ;;  %v3202_v9 = vpop.f32.mrb[69].mxu1  ;;  %v3379_v59 = vadd.f32 (!%p3785_p7), %v5853_v28, %v3340_v17  ;;  %v3342_v32 = vld [vmem:[#allocation2 + $0x48] sm:$0xff] (!%p3785_p7) }
 0x6d6   : > { %v3281_v40 = vadd.f32 %v3202_v9, %v3035_v41  ;;  %v4052_v31 = vpop.f32.mrb[70].mxu1  ;;  %v3341_v41 = vld [vmem:[#allocation2 + $0x40] sm:$0xff] (!%p3785_p7)  ;;  %v3381_v9 = vadd.f32 (!%p3785_p7), %v5853_v28, %v3342_v32 }
 0x6d7   : > { %3315 = vst.msk [vmem:[#allocation2 + $0x90] sm:$0xff] %vm1623_vm1, %v3283_v46  ;;  %v3284_v27 = vadd.f32 %v4052_v31, %v3038_v51  ;;  %v3205_v36 = vpop.f32.mrb[71].mxu1  ;;  %v3343_v51 = vld [vmem:[#allocation2 + $0x50] sm:$0xff] (!%p3785_p7)  ;;  %v3380_v46 = vadd.f32 (!%p3785_p7), %v5853_v28, %v3341_v41  ;;  %v3345_v31 = vld [vmem:[#allocation2 + $0x60] sm:$0xff] (!%p3785_p7)  ;;  %3411 = vst.msk [vmem:[%s4537_s22 + $0x38] sm:$0xff] (!%p3785_p7), %vm1623_vm1, %v3379_v59 }
 0x6d8   : > { %3313 = vst.msk [vmem:[#allocation2 + $0x80] sm:$0xff] %vm1623_vm1, %v3281_v40  ;;  %v3282_v21 = vadd.f32 %v3205_v36, %v3036_v45  ;;  %v3382_v45 = vadd.f32 (!%p3785_p7), %v5853_v28, %v3343_v51  ;;  %v3344_v40 = vld [vmem:[#allocation2 + $0x58] sm:$0xff] (!%p3785_p7)  ;;  %3413 = vst.msk [vmem:[%s4537_s22 + $0x48] sm:$0xff] (!%p3785_p7), %vm1623_vm1, %v3381_v9 }
 0x6d9   : > { %3316 = vst.msk [vmem:[#allocation2 + $0x98] sm:$0xff] %vm1623_vm1, %v3284_v27  ;;  %v3346_v27 = vld [vmem:[#allocation2 + $0x68] sm:$0xff] (!%p3785_p7)  ;;  %v3383_v36 = vadd.f32 (!%p3785_p7), %v5853_v28, %v3344_v40  ;;  %3412 = vst.msk [vmem:[%s4537_s22 + $0x40] sm:$0xff] (!%p3785_p7), %vm1623_vm1, %v3380_v46 }
 0x6da   : > { %3314 = vst.msk [vmem:[#allocation2 + $0x88] sm:$0xff] %vm1623_vm1, %v3282_v21  ;;  %v3384_v21 = vadd.f32 (!%p3785_p7), %v5853_v28, %v3345_v31  ;;  %3414 = vst.msk [vmem:[%s4537_s22 + $0x50] sm:$0xff] (!%p3785_p7), %vm1623_vm1, %v3382_v45 }
 0x6db   : > { %3415 = vst.msk [vmem:[%s4537_s22 + $0x58] sm:$0xff] (!%p3785_p7), %vm1623_vm1, %v3383_v36 }
 0x6dc   : > { %3416 = vst.msk [vmem:[%s4537_s22 + $0x60] sm:$0xff] (!%p3785_p7), %vm1623_vm1, %v3384_v21 }
 0x6e4   : > { %v4055_v38 = vpop.f32.mrb[72].mxu1 }
 0x6e5   : > { %v3287_v33 = vadd.f32 %v4055_v38, %v3041_v25  ;;  %v3218_v52 = vpop.f32.mrb[73].mxu1  ;;  %v3385_v25 = vadd.f32 (!%p3785_p7), %v5853_v28, %v3346_v27  ;;  %v3348_v38 = vld [vmem:[#allocation2 + $0x78] sm:$0xff] (!%p3785_p7) }
 0x6e6   : > { %v3285_v53 = vadd.f32 %v3218_v52, %v3039_v60  ;;  %v4056_v49 = vpop.f32.mrb[74].mxu1  ;;  %v3347_v60 = vld [vmem:[#allocation2 + $0x70] sm:$0xff] (!%p3785_p7)  ;;  %v3387_v52 = vadd.f32 (!%p3785_p7), %v5853_v28, %v3348_v38 }
 0x6e7   : > { %3319 = vst.msk [vmem:[#allocation2 + $0xb0] sm:$0xff] %vm1623_vm1, %v3287_v33  ;;  %v3288_v12 = vadd.f32 %v4056_v49, %v3042_v29  ;;  %v3221_v50 = vpop.f32.mrb[75].mxu1  ;;  %v3349_v29 = vld [vmem:[#allocation2 + $0x80] sm:$0xff] (!%p3785_p7)  ;;  %v3386_v33 = vadd.f32 (!%p3785_p7), %v5853_v28, %v3347_v60  ;;  %v3351_v49 = vld [vmem:[#allocation2 + $0x90] sm:$0xff] (!%p3785_p7)  ;;  %3417 = vst.msk [vmem:[%s4537_s22 + $0x68] sm:$0xff] (!%p3785_p7), %vm1623_vm1, %v3385_v25 }
 0x6e8   : > { %3317 = vst.msk [vmem:[#allocation2 + $0xa0] sm:$0xff] %vm1623_vm1, %v3285_v53  ;;  %v3286_v24 = vadd.f32 %v3221_v50, %v3040_v16  ;;  %v3388_v16 = vadd.f32 (!%p3785_p7), %v5853_v28, %v3349_v29  ;;  %v3350_v53 = vld [vmem:[#allocation2 + $0x88] sm:$0xff] (!%p3785_p7)  ;;  %3419 = vst.msk [vmem:[%s4537_s22 + $0x78] sm:$0xff] (!%p3785_p7), %vm1623_vm1, %v3387_v52 }
 0x6e9   : > { %3320 = vst.msk [vmem:[#allocation2 + $0xb8] sm:$0xff] %vm1623_vm1, %v3288_v12  ;;  %v3352_v12 = vld [vmem:[#allocation2 + $0x98] sm:$0xff] (!%p3785_p7)  ;;  %v3389_v50 = vadd.f32 (!%p3785_p7), %v5853_v28, %v3350_v53  ;;  %3418 = vst.msk [vmem:[%s4537_s22 + $0x70] sm:$0xff] (!%p3785_p7), %vm1623_vm1, %v3386_v33 }
 0x6ea   : > { %3318 = vst.msk [vmem:[#allocation2 + $0xa8] sm:$0xff] %vm1623_vm1, %v3286_v24  ;;  %v3390_v24 = vadd.f32 (!%p3785_p7), %v5853_v28, %v3351_v49  ;;  %3420 = vst.msk [vmem:[%s4537_s22 + $0x80] sm:$0xff] (!%p3785_p7), %vm1623_vm1, %v3388_v16 }
 0x6eb   : > { %3421 = vst.msk [vmem:[%s4537_s22 + $0x88] sm:$0xff] (!%p3785_p7), %vm1623_vm1, %v3389_v50 }
 0x6ec   : > { %3422 = vst.msk [vmem:[%s4537_s22 + $0x90] sm:$0xff] (!%p3785_p7), %vm1623_vm1, %v3390_v24 }
 0x6f4   : > { %v4059_v30 = vpop.f32.mrb[76].mxu1 }
 0x6f5   : > { %v3291_v63 = vadd.f32 %v4059_v30, %v3045_v58  ;;  %v3234_v62 = vpop.f32.mrb[77].mxu1  ;;  %v3391_v58 = vadd.f32 (!%p3785_p7), %v5853_v28, %v3352_v12  ;;  %v3354_v30 = vld [vmem:[#allocation2 + $0xa8] sm:$0xff] (!%p3785_p7) }
 0x6f6   : > { %v3289_v11 = vadd.f32 %v3234_v62, %v3043_v14  ;;  %v4060_v61 = vpop.f32.mrb[78].mxu1  ;;  %v3353_v14 = vld [vmem:[#allocation2 + $0xa0] sm:$0xff] (!%p3785_p7)  ;;  %v3393_v62 = vadd.f32 (!%p3785_p7), %v5853_v28, %v3354_v30 }
 0x6f7   : > { %3323 = vst.msk [vmem:[#allocation2 + $0xd0] sm:$0xff] %vm1623_vm1, %v3291_v63  ;;  %v3292_v18 = vadd.f32 %v4060_v61, %v3046_v56  ;;  %v3237_v55 = vpop.f32.mrb[79].mxu1  ;;  %v3355_v56 = vld [vmem:[#allocation2 + $0xb0] sm:$0xff] (!%p3785_p7)  ;;  %v3392_v63 = vadd.f32 (!%p3785_p7), %v5853_v28, %v3353_v14  ;;  %3423 = vst.msk [vmem:[%s4537_s22 + $0x98] sm:$0xff] (!%p3785_p7), %vm1623_vm1, %v3391_v58 }
 0x6f8   : > { %3321 = vst.msk [vmem:[#allocation2 + $0xc0] sm:$0xff] %vm1623_vm1, %v3289_v11  ;;  %v3290_v1 = vadd.f32 %v3237_v55, %v3044_v37  ;;  %v3394_v37 = vadd.f32 (!%p3785_p7), %v5853_v28, %v3355_v56  ;;  %v3356_v11 = vld [vmem:[#allocation2 + $0xb8] sm:$0xff] (!%p3785_p7)  ;;  %3425 = vst.msk [vmem:[%s4537_s22 + $0xa8] sm:$0xff] (!%p3785_p7), %vm1623_vm1, %v3393_v62 }
 0x6f9   : > { %3324 = vst.msk [vmem:[#allocation2 + $0xd8] sm:$0xff] %vm1623_vm1, %v3292_v18  ;;  %v3395_v55 = vadd.f32 (!%p3785_p7), %v5853_v28, %v3356_v11  ;;  %3424 = vst.msk [vmem:[%s4537_s22 + $0xa0] sm:$0xff] (!%p3785_p7), %vm1623_vm1, %v3392_v63 }
 0x6fa   : > { %3322 = vst.msk [vmem:[#allocation2 + $0xc8] sm:$0xff] %vm1623_vm1, %v3290_v1  ;;  %3426 = vst.msk [vmem:[%s4537_s22 + $0xb0] sm:$0xff] (!%p3785_p7), %vm1623_vm1, %v3394_v37 }
 0x6fb   : > { %3427 = vst.msk [vmem:[%s4537_s22 + $0xb8] sm:$0xff] (!%p3785_p7), %vm1623_vm1, %v3395_v55 }
 0x6ff   : > { %v3357_v61 = vld [vmem:[#allocation2 + $0xc0] sm:$0xff] (!%p3785_p7) }
 0x700   : > { %v3396_v1 = vadd.f32 (!%p3785_p7), %v5853_v28, %v3357_v61 }
 0x701   : > { %v3358_v18 = vld [vmem:[#allocation2 + $0xc8] sm:$0xff] (!%p3785_p7) }
 0x702   : > { %3428 = vst.msk [vmem:[%s4537_s22 + $0xc0] sm:$0xff] (!%p3785_p7), %vm1623_vm1, %v3396_v1 }
 0x704   : > { %v4063_v34 = vpop.f32.mrb[80].mxu1  ;;  %3332 = sbr.rel (%p3785_p7) target bundleno = 1813 (0x715), region = 60 }
 0x705   : > { %v3295_v35 = vadd.f32 %v4063_v34, %v3049_v7  ;;  %v3250_v26 = vpop.f32.mrb[81].mxu1  ;;  %v3397_v7 = vadd.f32 (!%p3785_p7), %v5853_v28, %v3358_v18  ;;  %v3360_v34 = vld [vmem:[#allocation2 + $0xd8] sm:$0xff] (!%p3785_p7) }
 0x706   : > { %v3293_v42 = vadd.f32 %v3250_v26, %v3047_v39  ;;  %v4064_v13 = vpop.f32.mrb[82].mxu1  ;;  %v3359_v39 = vld [vmem:[#allocation2 + $0xd0] sm:$0xff] (!%p3785_p7)  ;;  %v3399_v26 = vadd.f32 (!%p3785_p7), %v5853_v28, %v3360_v34 }
 0x707   : > { %3327 = vst.msk [vmem:[#allocation2 + $0xf0] sm:$0xff] %vm1623_vm1, %v3295_v35  ;;  %v3296_v48 = vadd.f32 %v4064_v13, %v3050_v15  ;;  %v3253_v2 = vpop.f32.mrb[83].mxu1  ;;  %v3398_v35 = vadd.f32 (!%p3785_p7), %v5853_v28, %v3359_v39  ;;  %3429 = vst.msk [vmem:[%s4537_s22 + $0xc8] sm:$0xff] (!%p3785_p7), %vm1623_vm1, %v3397_v7 }
 0x708   : > { %3325 = vst.msk [vmem:[#allocation2 + $0xe0] sm:$0xff] %vm1623_vm1, %v3293_v42  ;;  %v3294_v3 = vadd.f32 %v3253_v2, %v3048_v57  ;;  %3431 = vst.msk [vmem:[%s4537_s22 + $0xd8] sm:$0xff] (!%p3785_p7), %vm1623_vm1, %v3399_v26 }
 0x709   : > { %3328 = vst.msk [vmem:[#allocation2 + $0xf8] sm:$0xff] %vm1623_vm1, %v3296_v48  ;;  %3430 = vst.msk [vmem:[%s4537_s22 + $0xd0] sm:$0xff] (!%p3785_p7), %vm1623_vm1, %v3398_v35 }
 0x70a   : > { %3326 = vst.msk [vmem:[#allocation2 + $0xe8] sm:$0xff] %vm1623_vm1, %v3294_v3 }
 0x70e   : > { %v3363_v13 = vld [vmem:[#allocation2 + $0xf0] sm:$0xff] }
 0x70f   : > { %v3361_v15 = vld [vmem:[#allocation2 + $0xe0] sm:$0xff]  ;;  %v3402_v3 = vadd.f32 %v5853_v28, %v3363_v13 }
 0x710   : > { %v3400_v57 = vadd.f32 %v5853_v28, %v3361_v15  ;;  %v3364_v48 = vld [vmem:[#allocation2 + $0xf8] sm:$0xff] }
 0x711   : > { %v3362_v42 = vld [vmem:[#allocation2 + $0xe8] sm:$0xff]  ;;  %v3403_v5 = vadd.f32 %v5853_v28, %v3364_v48  ;;  %3434 = vst.msk [vmem:[%s4537_s22 + $0xf0] sm:$0xff] %vm1623_vm1, %v3402_v3 }
 0x712   : > { %v3401_v2 = vadd.f32 %v5853_v28, %v3362_v42  ;;  %3432 = vst.msk [vmem:[%s4537_s22 + $0xe0] sm:$0xff] %vm1623_vm1, %v3400_v57 }
 0x713   : > { %3435 = vst.msk [vmem:[%s4537_s22 + $0xf8] sm:$0xff] %vm1623_vm1, %v3403_v5 }
 0x714   : > { %3433 = vst.msk [vmem:[%s4537_s22 + $0xe8] sm:$0xff] %vm1623_vm1, %v3401_v2 }
 0x715 PF: > { %s18_s28 = sadd.s32 1, %s4400_s28   ;;  %s6014_s20 = sld [smem:[#allocation7_spill]] }
 0x716   : > { %p15_p8 = scmp.ge.s32.totalorder %s18_s28, 18   ;;  %s6015_s24 = smov %s4392_s26 }
 0x717   : > { %s6016_s25 = smov %s4396_s27  ;;  %s6017_s26 = smov %s6020_s30 }
 0x718   :  { %17 = sbr.rel (!%p15_p8) target bundleno = 6 (0x6), region = 106 }
 0x71b   : > { %s6018_s27 = smov %s6014_s20 }
 0x71f   :  { %3457 = vsyncpa [#allocation5], 1 }
 0x720   :  { %3459 = vsyncpa [#allocation5 + $0x1], 1 }

</bundles_post_ra>
